<compile_context>
chip_gen: v7x
topology: tpu7x:2x2x1
jax: 0.10.0
libtpu: 0.0.40
codegen_flags: <defaults>
</compile_context>

<pallas_src>
import jax
import jax.numpy as jnp
from jax.experimental import pallas as pl
from jax.experimental.pallas import tpu as pltpu


# ---------------------------------------------------------------------------
# Fused Pallas kernel: 4 x (Conv3d + BatchNorm(eval) + ReLU), VMEM resident.
# ---------------------------------------------------------------------------
def _make_fused_kernel(layer_meta):
    """layer_meta: per layer (kd, kh, d_in, h_in, d_out, h_out, k, co) ints."""
    n_layers = len(layer_meta)

    def kernel(*refs):
        w_refs = [refs[1 + 2 * i] for i in range(n_layers)]   # bf16 weights
        b_refs = [refs[2 + 2 * i] for i in range(n_layers)]   # f32 biases
        o_ref = refs[1 + 2 * n_layers]
        r_scr = refs[2 + 2 * n_layers:]          # im2row scratches (layers 2..)

        r1v = refs[0][0]                         # host-built layer-1 im2row, f32
        y = None
        for li, (kd, kh, d_in, h_in, do, ho, k, co) in enumerate(layer_meta):
            m = do * ho
            if li == 0:
                # Layer-1 im2row was prebuilt on the host.
                lhs_rows = lambda a, _v=r1v, _ho=ho, _m=m: \
                    _v[a * _ho:a * _ho + _m, :]
            else:
                r = r_scr[li - 1]
                # Build this layer's im2row staging buffer in VMEM:
                #   r[dd*Ho + ho', b*K + k'] = y[dd*Hin + ho' + b, k']
                for dd in range(d_in):
                    for b in range(kh):
                        r[dd * ho:(dd + 1) * ho, b * k:(b + 1) * k] = (
                            y[dd * h_in + b: dd * h_in + b + ho, :])
                lhs_rows = lambda a, _r=r, _ho=ho, _m=m: \
                    _r[a * _ho:a * _ho + _m, :]

            # kd (<=5) K-wide MXU matmuls per layer, f32 accumulation.
            acc = jnp.zeros((m, co), jnp.float32)
            for a in range(kd):                  # fully unrolled
                lhs = lhs_rows(a).astype(jnp.bfloat16)
                acc = acc + jnp.dot(lhs, w_refs[li][a],
                                    preferred_element_type=jnp.float32)
            # bias = beta + (conv_b - mean) * scale;  BN scale folded into w.
            z = jnp.maximum(acc + b_refs[li][...], 0.0)
            if li + 1 < n_layers:
                y = z                            # [Do*Ho, Wo*Cout] f32
            else:
                o_ref[0] = z                     # final [Do4*Ho4, Wo4*Cout4]

    return kernel


# ---------------------------------------------------------------------------
# Parameter folding: Conv3d + eval BatchNorm -> (Weff, bias)
# ---------------------------------------------------------------------------
def _fold_layer(p, d, h, w, c, eps):
    """Fold Conv3d weight + eval BN into the W-only-Toeplitz matmul form.

    Weff[a, b*(W*Cin) + wi*Cin + ci, wo*Cout + co]
        = scale[co] * w[co, ci, a, b, wi - wo]   if 0 <= wi - wo < kw else 0
    so the VALID conv + BN becomes, with R the per-layer im2row buffer,
        out[do*Ho + ho, :] = sum_a R[(do+a)*Ho + ho, :] @ Weff[a]  + bias
    """
    cout, cin, kd, kh, kw = p["w"].shape
    assert cin == c
    do, ho, wo = d - kd + 1, h - kh + 1, w - kw + 1
    scale = p["gamma"] * jax.lax.rsqrt(p["rvar"] + eps)           # [Cout]
    bias = p["beta"] + (p["b"] - p["rmean"]) * scale              # [Cout]
    wt = jnp.transpose(p["w"], (2, 3, 4, 1, 0)) * scale           # [kd,kh,kw,Cin,Cout]
    weff = jnp.zeros((kd, kh, w, cin, wo, cout), jnp.float32)
    for j in range(wo):
        weff = weff.at[:, :, j:j + kw, :, j, :].set(wt)
    weff = weff.reshape(kd, kh * w * cin, wo * cout).astype(jnp.bfloat16)
    bias = jnp.tile(bias, wo).reshape(1, wo * cout).astype(jnp.float32)
    meta = (kd, kh, d, h, do, ho, w * cin, wo * cout)
    return weff, bias, meta, (do, ho, wo, cout)


# ---------------------------------------------------------------------------
# Wrapper: layout prep + pallas_call
# ---------------------------------------------------------------------------
def cnn_layers_2_forward(x, params, eps=1e-5):
    """x: [N, Cin, D, H, W] (PyTorch NCDHW).  Returns [N, Cout, Do, Ho, Wo]."""
    n, c, d, h, w = x.shape

    # Channel-last, W and C folded onto the lane axis: [N, D, H, W*C].
    xt = jnp.transpose(x, (0, 2, 3, 4, 1)).reshape(n, d, h, w * c)
    kh1 = params[0]["w"].shape[3]
    ho1 = h - kh1 + 1
    # Host-side im2row for layer 1 only (data-independent):
    #   r1[n, dd*Ho1 + ho, b*(W*C) + k] = xt[n, dd, ho + b, k]
    r1 = jnp.stack([xt[:, :, b:b + ho1, :] for b in range(kh1)], axis=3)
    r1 = r1.reshape(n, d * ho1, kh1 * w * c).astype(jnp.float32)

    operands = [r1]
    in_specs = [pl.BlockSpec((1,) + r1.shape[1:], lambda i: (i, 0, 0))]
    meta, scratch_shapes = [], []
    flops = 0
    bytes_accessed = r1.size * 4
    for li, p in enumerate(params):
        weff, bias, m, (d, h, w, c) = _fold_layer(p, d, h, w, c, eps)
        meta.append(m)
        operands += [weff, bias]
        in_specs += [pl.BlockSpec(weff.shape, lambda i: (0, 0, 0)),
                     pl.BlockSpec(bias.shape, lambda i: (0, 0))]
        kd_, kh_, d_in, h_in, do_, ho_, k_, co_ = m
        if li > 0:
            # Per-layer f32 im2row staging buffer, built inside the kernel.
            scratch_shapes.append(
                pltpu.VMEM((d_in * ho_, kh_ * k_), jnp.float32))
        flops += 2 * n * kd_ * (do_ * ho_) * (kh_ * k_) * co_
        bytes_accessed += weff.size * 2 + bias.size * 4
    bytes_accessed += n * d * h * w * c * 4            # final output

    out = pl.pallas_call(
        _make_fused_kernel(tuple(meta)),
        out_shape=jax.ShapeDtypeStruct((n, d * h, w * c), jnp.float32),
        grid=(n,),
        in_specs=in_specs,
        out_specs=pl.BlockSpec((1, d * h, w * c), lambda i: (i, 0, 0)),
        scratch_shapes=scratch_shapes,
        compiler_params=pltpu.CompilerParams(
            dimension_semantics=("parallel",),          # v7x: one sample per TC
            vmem_limit_bytes=16 * 1024 * 1024),
        cost_estimate=pl.CostEstimate(flops=flops, transcendentals=0,
                                      bytes_accessed=bytes_accessed),
    )(*operands)

    # Back to NCDHW only at the model boundary.
    out = out.reshape(n, d, h, w, c)                    # [N, Do, Ho, Wo, Cout]
    return jnp.transpose(out, (0, 4, 1, 2, 3))          # [N, Cout, Do, Ho, Wo]


# ---------------------------------------------------------------------------
# Module: cnn_layers_2 (deterministic synthetic parameters)
# ---------------------------------------------------------------------------
_LAYER_SPECS = lambda input_size: [
    (input_size, 64, (5, 5, 2)),
    (64, 64, (5, 5, 2)),
    (64, 32, (5, 5, 1)),
    (32, 16, (5, 2, 1)),
]


def init_params(key, input_size=1):
    params = []
    for cin, cout, (kd, kh, kw) in _LAYER_SPECS(input_size):
        key, kw_, kb_, kg_, kbt_, km_, kv_ = jax.random.split(key, 7)
        fan_in = cin * kd * kh * kw
        params.append(dict(
            w=jax.random.normal(kw_, (cout, cin, kd, kh, kw), jnp.float32)
              / jnp.sqrt(float(fan_in)),
            b=0.1 * jax.random.normal(kb_, (cout,), jnp.float32),
            gamma=1.0 + 0.1 * jax.random.normal(kg_, (cout,), jnp.float32),
            beta=0.1 * jax.random.normal(kbt_, (cout,), jnp.float32),
            rmean=0.1 * jax.random.normal(km_, (cout,), jnp.float32),
            rvar=1.0 + jnp.abs(jax.random.normal(kv_, (cout,), jnp.float32)),
        ))
    return params


# Pure-JAX reference (XLA f32 conv) for correctness checking.
def reference_forward(x, params, eps=1e-5):
    for p in params:
        y = jax.lax.conv_general_dilated(
            x, p["w"], window_strides=(1, 1, 1), padding="VALID",
            dimension_numbers=("NCDHW", "OIDHW", "NCDHW"))
        y = y + p["b"].reshape(1, -1, 1, 1, 1)
        scale = (p["gamma"] / jnp.sqrt(p["rvar"] + eps)).reshape(1, -1, 1, 1, 1)
        y = (y - p["rmean"].reshape(1, -1, 1, 1, 1)) * scale \
            + p["beta"].reshape(1, -1, 1, 1, 1)
        x = jnp.maximum(y, 0.0)
    return x


if __name__ == "__main__":
    key = jax.random.PRNGKey(0)
    k_x, k_p = jax.random.split(key)

    # Small shapes consistent with the module: N=2, Cin=1, D=20, H=16, W=3
    # (W=3 ~ 3-axis accelerometer); output is [2, 16, 4, 3, 1].
    x = jax.random.normal(k_x, (2, 1, 20, 16, 3), jnp.float32)
    params = init_params(k_p, input_size=1)

    fwd = jax.jit(cnn_layers_2_forward)
    out = jax.block_until_ready(fwd(x, params))
    ref = jax.block_until_ready(reference_forward(x, params))

    assert out.shape == (2, 16, 4, 3, 1), out.shape
    # bf16 MXU operands (with f32 accumulation) compounded over 4 layers give
    # ~1e-2-level differences vs the f32 XLA reference; 5e-2 still catches any
    # indexing / weight-folding bug (those show up as O(1) errors).
    err = float(jnp.max(jnp.abs(out - ref)))
    assert jnp.allclose(out, ref, rtol=5e-2, atol=5e-2), err
    print("KERNEL_OK")
</pallas_src>

<mosaic_0001>
module attributes {stable_mosaic.version = 11 : i64} {
  func.func @kernel(%arg0: i32, %arg1: memref<1x240x15xf32, #tpu.memory_space<vmem>>, %arg2: memref<5x15x128xbf16, #tpu.memory_space<vmem>>, %arg3: memref<1x128xf32, #tpu.memory_space<vmem>>, %arg4: memref<5x640x64xbf16, #tpu.memory_space<vmem>>, %arg5: memref<1x64xf32, #tpu.memory_space<vmem>>, %arg6: memref<5x320x32xbf16, #tpu.memory_space<vmem>>, %arg7: memref<1x32xf32, #tpu.memory_space<vmem>>, %arg8: memref<5x64x16xbf16, #tpu.memory_space<vmem>>, %arg9: memref<1x16xf32, #tpu.memory_space<vmem>>, %arg10: memref<1x12x16xf32, #tpu.memory_space<vmem>>, %arg11: memref<128x640xf32, #tpu.memory_space<vmem>>, %arg12: memref<48x320xf32, #tpu.memory_space<vmem>>, %arg13: memref<24x64xf32, #tpu.memory_space<vmem>>) attributes {dimension_semantics = [#tpu.dimension_semantics<parallel>], iteration_bounds = array<i64: 2>, scalar_prefetch = 0 : i64, scratch_operands = 3 : i64, tpu.core_type = #tpu.core_type<tc>, window_params = [{transform_indices = @transform_0, window_bounds = array<i64: 1, 240, 15>}, {pipeline_mode = #tpu.pipeline_mode<synchronous>, transform_indices = @transform_1, window_bounds = array<i64: 5, 15, 128>}, {pipeline_mode = #tpu.pipeline_mode<synchronous>, transform_indices = @transform_2, window_bounds = array<i64: 1, 128>}, {pipeline_mode = #tpu.pipeline_mode<synchronous>, transform_indices = @transform_3, window_bounds = array<i64: 5, 640, 64>}, {pipeline_mode = #tpu.pipeline_mode<synchronous>, transform_indices = @transform_4, window_bounds = array<i64: 1, 64>}, {pipeline_mode = #tpu.pipeline_mode<synchronous>, transform_indices = @transform_5, window_bounds = array<i64: 5, 320, 32>}, {pipeline_mode = #tpu.pipeline_mode<synchronous>, transform_indices = @transform_6, window_bounds = array<i64: 1, 32>}, {pipeline_mode = #tpu.pipeline_mode<synchronous>, transform_indices = @transform_7, window_bounds = array<i64: 5, 64, 16>}, {pipeline_mode = #tpu.pipeline_mode<synchronous>, transform_indices = @transform_8, window_bounds = array<i64: 1, 16>}, {transform_indices = @transform_9, window_bounds = array<i64: 1, 12, 16>}]} {
    %c0 = arith.constant 0 : index
    %c0_0 = arith.constant 0 : index
    %c0_1 = arith.constant 0 : index
    %0 = vector.load %arg1[%c0, %c0_0, %c0_1] : memref<1x240x15xf32, #tpu.memory_space<vmem>>, vector<1x240x15xf32>
    %1 = vector.shape_cast %0 : vector<1x240x15xf32> to vector<240x15xf32>
    %cst = arith.constant 0.000000e+00 : f32
    %2 = vector.broadcast %cst : f32 to vector<192x128xf32>
    %3 = vector.extract_strided_slice %1 {offsets = [0, 0], sizes = [192, 15], strides = [1, 1]} : vector<240x15xf32> to vector<192x15xf32>
    %4 = arith.truncf %3 : vector<192x15xf32> to vector<192x15xbf16>
    %c0_2 = arith.constant 0 : index
    %c0_3 = arith.constant 0 : index
    %c0_4 = arith.constant 0 : index
    %5 = vector.load %arg2[%c0_2, %c0_3, %c0_4] : memref<5x15x128xbf16, #tpu.memory_space<vmem>>, vector<1x15x128xbf16>
    %6 = vector.shape_cast %5 : vector<1x15x128xbf16> to vector<15x128xbf16>
    %cst_5 = arith.constant dense<0.000000e+00> : vector<192x128xf32>
    %7 = tpu.matmul %4, %6, %cst_5 {dimension_numbers = #tpu.dot_dimension_numbers<[1], [0], [0], [1], [0, 0, 1, 1], [], []>} : vector<192x15xbf16>, vector<15x128xbf16>, vector<192x128xf32> -> vector<192x128xf32>
    %8 = arith.addf %2, %7 : vector<192x128xf32>
    %9 = vector.extract_strided_slice %1 {offsets = [12, 0], sizes = [192, 15], strides = [1, 1]} : vector<240x15xf32> to vector<192x15xf32>
    %10 = arith.truncf %9 : vector<192x15xf32> to vector<192x15xbf16>
    %c1 = arith.constant 1 : index
    %c0_6 = arith.constant 0 : index
    %c0_7 = arith.constant 0 : index
    %11 = vector.load %arg2[%c1, %c0_6, %c0_7] : memref<5x15x128xbf16, #tpu.memory_space<vmem>>, vector<1x15x128xbf16>
    %12 = vector.shape_cast %11 : vector<1x15x128xbf16> to vector<15x128xbf16>
    %cst_8 = arith.constant dense<0.000000e+00> : vector<192x128xf32>
    %13 = tpu.matmul %10, %12, %cst_8 {dimension_numbers = #tpu.dot_dimension_numbers<[1], [0], [0], [1], [0, 0, 1, 1], [], []>} : vector<192x15xbf16>, vector<15x128xbf16>, vector<192x128xf32> -> vector<192x128xf32>
    %14 = arith.addf %8, %13 : vector<192x128xf32>
    %15 = vector.extract_strided_slice %1 {offsets = [24, 0], sizes = [192, 15], strides = [1, 1]} : vector<240x15xf32> to vector<192x15xf32>
    %16 = arith.truncf %15 : vector<192x15xf32> to vector<192x15xbf16>
    %c2 = arith.constant 2 : index
    %c0_9 = arith.constant 0 : index
    %c0_10 = arith.constant 0 : index
    %17 = vector.load %arg2[%c2, %c0_9, %c0_10] : memref<5x15x128xbf16, #tpu.memory_space<vmem>>, vector<1x15x128xbf16>
    %18 = vector.shape_cast %17 : vector<1x15x128xbf16> to vector<15x128xbf16>
    %cst_11 = arith.constant dense<0.000000e+00> : vector<192x128xf32>
    %19 = tpu.matmul %16, %18, %cst_11 {dimension_numbers = #tpu.dot_dimension_numbers<[1], [0], [0], [1], [0, 0, 1, 1], [], []>} : vector<192x15xbf16>, vector<15x128xbf16>, vector<192x128xf32> -> vector<192x128xf32>
    %20 = arith.addf %14, %19 : vector<192x128xf32>
    %21 = vector.extract_strided_slice %1 {offsets = [36, 0], sizes = [192, 15], strides = [1, 1]} : vector<240x15xf32> to vector<192x15xf32>
    %22 = arith.truncf %21 : vector<192x15xf32> to vector<192x15xbf16>
    %c3 = arith.constant 3 : index
    %c0_12 = arith.constant 0 : index
    %c0_13 = arith.constant 0 : index
    %23 = vector.load %arg2[%c3, %c0_12, %c0_13] : memref<5x15x128xbf16, #tpu.memory_space<vmem>>, vector<1x15x128xbf16>
    %24 = vector.shape_cast %23 : vector<1x15x128xbf16> to vector<15x128xbf16>
    %cst_14 = arith.constant dense<0.000000e+00> : vector<192x128xf32>
    %25 = tpu.matmul %22, %24, %cst_14 {dimension_numbers = #tpu.dot_dimension_numbers<[1], [0], [0], [1], [0, 0, 1, 1], [], []>} : vector<192x15xbf16>, vector<15x128xbf16>, vector<192x128xf32> -> vector<192x128xf32>
    %26 = arith.addf %20, %25 : vector<192x128xf32>
    %27 = vector.extract_strided_slice %1 {offsets = [48, 0], sizes = [192, 15], strides = [1, 1]} : vector<240x15xf32> to vector<192x15xf32>
    %28 = arith.truncf %27 : vector<192x15xf32> to vector<192x15xbf16>
    %c4 = arith.constant 4 : index
    %c0_15 = arith.constant 0 : index
    %c0_16 = arith.constant 0 : index
    %29 = vector.load %arg2[%c4, %c0_15, %c0_16] : memref<5x15x128xbf16, #tpu.memory_space<vmem>>, vector<1x15x128xbf16>
    %30 = vector.shape_cast %29 : vector<1x15x128xbf16> to vector<15x128xbf16>
    %cst_17 = arith.constant dense<0.000000e+00> : vector<192x128xf32>
    %31 = tpu.matmul %28, %30, %cst_17 {dimension_numbers = #tpu.dot_dimension_numbers<[1], [0], [0], [1], [0, 0, 1, 1], [], []>} : vector<192x15xbf16>, vector<15x128xbf16>, vector<192x128xf32> -> vector<192x128xf32>
    %32 = arith.addf %26, %31 : vector<192x128xf32>
    %c0_18 = arith.constant 0 : index
    %c0_19 = arith.constant 0 : index
    %33 = vector.load %arg3[%c0_18, %c0_19] : memref<1x128xf32, #tpu.memory_space<vmem>>, vector<1x128xf32>
    %34 = vector.broadcast %33 : vector<1x128xf32> to vector<192x128xf32>
    %35 = arith.addf %32, %34 : vector<192x128xf32>
    %cst_20 = arith.constant 0.000000e+00 : f32
    %36 = vector.broadcast %cst_20 : f32 to vector<192x128xf32>
    %37 = arith.maximumf %35, %36 : vector<192x128xf32>
    %38 = vector.extract_strided_slice %37 {offsets = [0, 0], sizes = [8, 128], strides = [1, 1]} : vector<192x128xf32> to vector<8x128xf32>
    %c0_21 = arith.constant 0 : index
    %c0_22 = arith.constant 0 : index
    %39 = vector.load %arg11[%c0_21, %c0_22] : memref<128x640xf32, #tpu.memory_space<vmem>>, vector<8x128xf32>
    tpu.vector_store %arg11[%c0_21, %c0_22], %38 {strides = array<i32>} : memref<128x640xf32, #tpu.memory_space<vmem>>, vector<8x128xf32>,
    %40 = vector.extract_strided_slice %37 {offsets = [1, 0], sizes = [8, 128], strides = [1, 1]} : vector<192x128xf32> to vector<8x128xf32>
    %c0_23 = arith.constant 0 : index
    %c128 = arith.constant 128 : index
    %41 = vector.load %arg11[%c0_23, %c128] : memref<128x640xf32, #tpu.memory_space<vmem>>, vector<8x128xf32>
    tpu.vector_store %arg11[%c0_23, %c128], %40 {strides = array<i32>} : memref<128x640xf32, #tpu.memory_space<vmem>>, vector<8x128xf32>,
    %42 = vector.extract_strided_slice %37 {offsets = [2, 0], sizes = [8, 128], strides = [1, 1]} : vector<192x128xf32> to vector<8x128xf32>
    %c0_24 = arith.constant 0 : index
    %c256 = arith.constant 256 : index
    %43 = vector.load %arg11[%c0_24, %c256] : memref<128x640xf32, #tpu.memory_space<vmem>>, vector<8x128xf32>
    tpu.vector_store %arg11[%c0_24, %c256], %42 {strides = array<i32>} : memref<128x640xf32, #tpu.memory_space<vmem>>, vector<8x128xf32>,
    %44 = vector.extract_strided_slice %37 {offsets = [3, 0], sizes = [8, 128], strides = [1, 1]} : vector<192x128xf32> to vector<8x128xf32>
    %c0_25 = arith.constant 0 : index
    %c384 = arith.constant 384 : index
    %45 = vector.load %arg11[%c0_25, %c384] : memref<128x640xf32, #tpu.memory_space<vmem>>, vector<8x128xf32>
    tpu.vector_store %arg11[%c0_25, %c384], %44 {strides = array<i32>} : memref<128x640xf32, #tpu.memory_space<vmem>>, vector<8x128xf32>,
    %46 = vector.extract_strided_slice %37 {offsets = [4, 0], sizes = [8, 128], strides = [1, 1]} : vector<192x128xf32> to vector<8x128xf32>
    %c0_26 = arith.constant 0 : index
    %c512 = arith.constant 512 : index
    %47 = vector.load %arg11[%c0_26, %c512] : memref<128x640xf32, #tpu.memory_space<vmem>>, vector<8x128xf32>
    tpu.vector_store %arg11[%c0_26, %c512], %46 {strides = array<i32>} : memref<128x640xf32, #tpu.memory_space<vmem>>, vector<8x128xf32>,
    %48 = vector.extract_strided_slice %37 {offsets = [12, 0], sizes = [8, 128], strides = [1, 1]} : vector<192x128xf32> to vector<8x128xf32>
    %c8 = arith.constant 8 : index
    %c0_27 = arith.constant 0 : index
    %49 = vector.load %arg11[%c8, %c0_27] : memref<128x640xf32, #tpu.memory_space<vmem>>, vector<8x128xf32>
    tpu.vector_store %arg11[%c8, %c0_27], %48 {strides = array<i32>} : memref<128x640xf32, #tpu.memory_space<vmem>>, vector<8x128xf32>,
    %50 = vector.extract_strided_slice %37 {offsets = [13, 0], sizes = [8, 128], strides = [1, 1]} : vector<192x128xf32> to vector<8x128xf32>
    %c8_28 = arith.constant 8 : index
    %c128_29 = arith.constant 128 : index
    %51 = vector.load %arg11[%c8_28, %c128_29] : memref<128x640xf32, #tpu.memory_space<vmem>>, vector<8x128xf32>
    tpu.vector_store %arg11[%c8_28, %c128_29], %50 {strides = array<i32>} : memref<128x640xf32, #tpu.memory_space<vmem>>, vector<8x128xf32>,
    %52 = vector.extract_strided_slice %37 {offsets = [14, 0], sizes = [8, 128], strides = [1, 1]} : vector<192x128xf32> to vector<8x128xf32>
    %c8_30 = arith.constant 8 : index
    %c256_31 = arith.constant 256 : index
    %53 = vector.load %arg11[%c8_30, %c256_31] : memref<128x640xf32, #tpu.memory_space<vmem>>, vector<8x128xf32>
    tpu.vector_store %arg11[%c8_30, %c256_31], %52 {strides = array<i32>} : memref<128x640xf32, #tpu.memory_space<vmem>>, vector<8x128xf32>,
    %54 = vector.extract_strided_slice %37 {offsets = [15, 0], sizes = [8, 128], strides = [1, 1]} : vector<192x128xf32> to vector<8x128xf32>
    %c8_32 = arith.constant 8 : index
    %c384_33 = arith.constant 384 : index
    %55 = vector.load %arg11[%c8_32, %c384_33] : memref<128x640xf32, #tpu.memory_space<vmem>>, vector<8x128xf32>
    tpu.vector_store %arg11[%c8_32, %c384_33], %54 {strides = array<i32>} : memref<128x640xf32, #tpu.memory_space<vmem>>, vector<8x128xf32>,
    %56 = vector.extract_strided_slice %37 {offsets = [16, 0], sizes = [8, 128], strides = [1, 1]} : vector<192x128xf32> to vector<8x128xf32>
    %c8_34 = arith.constant 8 : index
    %c512_35 = arith.constant 512 : index
    %57 = vector.load %arg11[%c8_34, %c512_35] : memref<128x640xf32, #tpu.memory_space<vmem>>, vector<8x128xf32>
    tpu.vector_store %arg11[%c8_34, %c512_35], %56 {strides = array<i32>} : memref<128x640xf32, #tpu.memory_space<vmem>>, vector<8x128xf32>,
    %58 = vector.extract_strided_slice %37 {offsets = [24, 0], sizes = [8, 128], strides = [1, 1]} : vector<192x128xf32> to vector<8x128xf32>
    %c16 = arith.constant 16 : index
    %c0_36 = arith.constant 0 : index
    %59 = vector.load %arg11[%c16, %c0_36] : memref<128x640xf32, #tpu.memory_space<vmem>>, vector<8x128xf32>
    tpu.vector_store %arg11[%c16, %c0_36], %58 {strides = array<i32>} : memref<128x640xf32, #tpu.memory_space<vmem>>, vector<8x128xf32>,
    %60 = vector.extract_strided_slice %37 {offsets = [25, 0], sizes = [8, 128], strides = [1, 1]} : vector<192x128xf32> to vector<8x128xf32>
    %c16_37 = arith.constant 16 : index
    %c128_38 = arith.constant 128 : index
    %61 = vector.load %arg11[%c16_37, %c128_38] : memref<128x640xf32, #tpu.memory_space<vmem>>, vector<8x128xf32>
    tpu.vector_store %arg11[%c16_37, %c128_38], %60 {strides = array<i32>} : memref<128x640xf32, #tpu.memory_space<vmem>>, vector<8x128xf32>,
    %62 = vector.extract_strided_slice %37 {offsets = [26, 0], sizes = [8, 128], strides = [1, 1]} : vector<192x128xf32> to vector<8x128xf32>
    %c16_39 = arith.constant 16 : index
    %c256_40 = arith.constant 256 : index
    %63 = vector.load %arg11[%c16_39, %c256_40] : memref<128x640xf32, #tpu.memory_space<vmem>>, vector<8x128xf32>
    tpu.vector_store %arg11[%c16_39, %c256_40], %62 {strides = array<i32>} : memref<128x640xf32, #tpu.memory_space<vmem>>, vector<8x128xf32>,
    %64 = vector.extract_strided_slice %37 {offsets = [27, 0], sizes = [8, 128], strides = [1, 1]} : vector<192x128xf32> to vector<8x128xf32>
    %c16_41 = arith.constant 16 : index
    %c384_42 = arith.constant 384 : index
    %65 = vector.load %arg11[%c16_41, %c384_42] : memref<128x640xf32, #tpu.memory_space<vmem>>, vector<8x128xf32>
    tpu.vector_store %arg11[%c16_41, %c384_42], %64 {strides = array<i32>} : memref<128x640xf32, #tpu.memory_space<vmem>>, vector<8x128xf32>,
    %66 = vector.extract_strided_slice %37 {offsets = [28, 0], sizes = [8, 128], strides = [1, 1]} : vector<192x128xf32> to vector<8x128xf32>
    %c16_43 = arith.constant 16 : index
    %c512_44 = arith.constant 512 : index
    %67 = vector.load %arg11[%c16_43, %c512_44] : memref<128x640xf32, #tpu.memory_space<vmem>>, vector<8x128xf32>
    tpu.vector_store %arg11[%c16_43, %c512_44], %66 {strides = array<i32>} : memref<128x640xf32, #tpu.memory_space<vmem>>, vector<8x128xf32>,
    %68 = vector.extract_strided_slice %37 {offsets = [36, 0], sizes = [8, 128], strides = [1, 1]} : vector<192x128xf32> to vector<8x128xf32>
    %c24 = arith.constant 24 : index
    %c0_45 = arith.constant 0 : index
    %69 = vector.load %arg11[%c24, %c0_45] : memref<128x640xf32, #tpu.memory_space<vmem>>, vector<8x128xf32>
    tpu.vector_store %arg11[%c24, %c0_45], %68 {strides = array<i32>} : memref<128x640xf32, #tpu.memory_space<vmem>>, vector<8x128xf32>,
    %70 = vector.extract_strided_slice %37 {offsets = [37, 0], sizes = [8, 128], strides = [1, 1]} : vector<192x128xf32> to vector<8x128xf32>
    %c24_46 = arith.constant 24 : index
    %c128_47 = arith.constant 128 : index
    %71 = vector.load %arg11[%c24_46, %c128_47] : memref<128x640xf32, #tpu.memory_space<vmem>>, vector<8x128xf32>
    tpu.vector_store %arg11[%c24_46, %c128_47], %70 {strides = array<i32>} : memref<128x640xf32, #tpu.memory_space<vmem>>, vector<8x128xf32>,
    %72 = vector.extract_strided_slice %37 {offsets = [38, 0], sizes = [8, 128], strides = [1, 1]} : vector<192x128xf32> to vector<8x128xf32>
    %c24_48 = arith.constant 24 : index
    %c256_49 = arith.constant 256 : index
    %73 = vector.load %arg11[%c24_48, %c256_49] : memref<128x640xf32, #tpu.memory_space<vmem>>, vector<8x128xf32>
    tpu.vector_store %arg11[%c24_48, %c256_49], %72 {strides = array<i32>} : memref<128x640xf32, #tpu.memory_space<vmem>>, vector<8x128xf32>,
    %74 = vector.extract_strided_slice %37 {offsets = [39, 0], sizes = [8, 128], strides = [1, 1]} : vector<192x128xf32> to vector<8x128xf32>
    %c24_50 = arith.constant 24 : index
    %c384_51 = arith.constant 384 : index
    %75 = vector.load %arg11[%c24_50, %c384_51] : memref<128x640xf32, #tpu.memory_space<vmem>>, vector<8x128xf32>
    tpu.vector_store %arg11[%c24_50, %c384_51], %74 {strides = array<i32>} : memref<128x640xf32, #tpu.memory_space<vmem>>, vector<8x128xf32>,
    %76 = vector.extract_strided_slice %37 {offsets = [40, 0], sizes = [8, 128], strides = [1, 1]} : vector<192x128xf32> to vector<8x128xf32>
    %c24_52 = arith.constant 24 : index
    %c512_53 = arith.constant 512 : index
    %77 = vector.load %arg11[%c24_52, %c512_53] : memref<128x640xf32, #tpu.memory_space<vmem>>, vector<8x128xf32>
    tpu.vector_store %arg11[%c24_52, %c512_53], %76 {strides = array<i32>} : memref<128x640xf32, #tpu.memory_space<vmem>>, vector<8x128xf32>,
    %78 = vector.extract_strided_slice %37 {offsets = [48, 0], sizes = [8, 128], strides = [1, 1]} : vector<192x128xf32> to vector<8x128xf32>
    %c32 = arith.constant 32 : index
    %c0_54 = arith.constant 0 : index
    %79 = vector.load %arg11[%c32, %c0_54] : memref<128x640xf32, #tpu.memory_space<vmem>>, vector<8x128xf32>
    tpu.vector_store %arg11[%c32, %c0_54], %78 {strides = array<i32>} : memref<128x640xf32, #tpu.memory_space<vmem>>, vector<8x128xf32>,
    %80 = vector.extract_strided_slice %37 {offsets = [49, 0], sizes = [8, 128], strides = [1, 1]} : vector<192x128xf32> to vector<8x128xf32>
    %c32_55 = arith.constant 32 : index
    %c128_56 = arith.constant 128 : index
    %81 = vector.load %arg11[%c32_55, %c128_56] : memref<128x640xf32, #tpu.memory_space<vmem>>, vector<8x128xf32>
    tpu.vector_store %arg11[%c32_55, %c128_56], %80 {strides = array<i32>} : memref<128x640xf32, #tpu.memory_space<vmem>>, vector<8x128xf32>,
    %82 = vector.extract_strided_slice %37 {offsets = [50, 0], sizes = [8, 128], strides = [1, 1]} : vector<192x128xf32> to vector<8x128xf32>
    %c32_57 = arith.constant 32 : index
    %c256_58 = arith.constant 256 : index
    %83 = vector.load %arg11[%c32_57, %c256_58] : memref<128x640xf32, #tpu.memory_space<vmem>>, vector<8x128xf32>
    tpu.vector_store %arg11[%c32_57, %c256_58], %82 {strides = array<i32>} : memref<128x640xf32, #tpu.memory_space<vmem>>, vector<8x128xf32>,
    %84 = vector.extract_strided_slice %37 {offsets = [51, 0], sizes = [8, 128], strides = [1, 1]} : vector<192x128xf32> to vector<8x128xf32>
    %c32_59 = arith.constant 32 : index
    %c384_60 = arith.constant 384 : index
    %85 = vector.load %arg11[%c32_59, %c384_60] : memref<128x640xf32, #tpu.memory_space<vmem>>, vector<8x128xf32>
    tpu.vector_store %arg11[%c32_59, %c384_60], %84 {strides = array<i32>} : memref<128x640xf32, #tpu.memory_space<vmem>>, vector<8x128xf32>,
    %86 = vector.extract_strided_slice %37 {offsets = [52, 0], sizes = [8, 128], strides = [1, 1]} : vector<192x128xf32> to vector<8x128xf32>
    %c32_61 = arith.constant 32 : index
    %c512_62 = arith.constant 512 : index
    %87 = vector.load %arg11[%c32_61, %c512_62] : memref<128x640xf32, #tpu.memory_space<vmem>>, vector<8x128xf32>
    tpu.vector_store %arg11[%c32_61, %c512_62], %86 {strides = array<i32>} : memref<128x640xf32, #tpu.memory_space<vmem>>, vector<8x128xf32>,
    %88 = vector.extract_strided_slice %37 {offsets = [60, 0], sizes = [8, 128], strides = [1, 1]} : vector<192x128xf32> to vector<8x128xf32>
    %c40 = arith.constant 40 : index
    %c0_63 = arith.constant 0 : index
    %89 = vector.load %arg11[%c40, %c0_63] : memref<128x640xf32, #tpu.memory_space<vmem>>, vector<8x128xf32>
    tpu.vector_store %arg11[%c40, %c0_63], %88 {strides = array<i32>} : memref<128x640xf32, #tpu.memory_space<vmem>>, vector<8x128xf32>,
    %90 = vector.extract_strided_slice %37 {offsets = [61, 0], sizes = [8, 128], strides = [1, 1]} : vector<192x128xf32> to vector<8x128xf32>
    %c40_64 = arith.constant 40 : index
    %c128_65 = arith.constant 128 : index
    %91 = vector.load %arg11[%c40_64, %c128_65] : memref<128x640xf32, #tpu.memory_space<vmem>>, vector<8x128xf32>
    tpu.vector_store %arg11[%c40_64, %c128_65], %90 {strides = array<i32>} : memref<128x640xf32, #tpu.memory_space<vmem>>, vector<8x128xf32>,
    %92 = vector.extract_strided_slice %37 {offsets = [62, 0], sizes = [8, 128], strides = [1, 1]} : vector<192x128xf32> to vector<8x128xf32>
    %c40_66 = arith.constant 40 : index
    %c256_67 = arith.constant 256 : index
    %93 = vector.load %arg11[%c40_66, %c256_67] : memref<128x640xf32, #tpu.memory_space<vmem>>, vector<8x128xf32>
    tpu.vector_store %arg11[%c40_66, %c256_67], %92 {strides = array<i32>} : memref<128x640xf32, #tpu.memory_space<vmem>>, vector<8x128xf32>,
    %94 = vector.extract_strided_slice %37 {offsets = [63, 0], sizes = [8, 128], strides = [1, 1]} : vector<192x128xf32> to vector<8x128xf32>
    %c40_68 = arith.constant 40 : index
    %c384_69 = arith.constant 384 : index
    %95 = vector.load %arg11[%c40_68, %c384_69] : memref<128x640xf32, #tpu.memory_space<vmem>>, vector<8x128xf32>
    tpu.vector_store %arg11[%c40_68, %c384_69], %94 {strides = array<i32>} : memref<128x640xf32, #tpu.memory_space<vmem>>, vector<8x128xf32>,
    %96 = vector.extract_strided_slice %37 {offsets = [64, 0], sizes = [8, 128], strides = [1, 1]} : vector<192x128xf32> to vector<8x128xf32>
    %c40_70 = arith.constant 40 : index
    %c512_71 = arith.constant 512 : index
    %97 = vector.load %arg11[%c40_70, %c512_71] : memref<128x640xf32, #tpu.memory_space<vmem>>, vector<8x128xf32>
    tpu.vector_store %arg11[%c40_70, %c512_71], %96 {strides = array<i32>} : memref<128x640xf32, #tpu.memory_space<vmem>>, vector<8x128xf32>,
    %98 = vector.extract_strided_slice %37 {offsets = [72, 0], sizes = [8, 128], strides = [1, 1]} : vector<192x128xf32> to vector<8x128xf32>
    %c48 = arith.constant 48 : index
    %c0_72 = arith.constant 0 : index
    %99 = vector.load %arg11[%c48, %c0_72] : memref<128x640xf32, #tpu.memory_space<vmem>>, vector<8x128xf32>
    tpu.vector_store %arg11[%c48, %c0_72], %98 {strides = array<i32>} : memref<128x640xf32, #tpu.memory_space<vmem>>, vector<8x128xf32>,
    %100 = vector.extract_strided_slice %37 {offsets = [73, 0], sizes = [8, 128], strides = [1, 1]} : vector<192x128xf32> to vector<8x128xf32>
    %c48_73 = arith.constant 48 : index
    %c128_74 = arith.constant 128 : index
    %101 = vector.load %arg11[%c48_73, %c128_74] : memref<128x640xf32, #tpu.memory_space<vmem>>, vector<8x128xf32>
    tpu.vector_store %arg11[%c48_73, %c128_74], %100 {strides = array<i32>} : memref<128x640xf32, #tpu.memory_space<vmem>>, vector<8x128xf32>,
    %102 = vector.extract_strided_slice %37 {offsets = [74, 0], sizes = [8, 128], strides = [1, 1]} : vector<192x128xf32> to vector<8x128xf32>
    %c48_75 = arith.constant 48 : index
    %c256_76 = arith.constant 256 : index
    %103 = vector.load %arg11[%c48_75, %c256_76] : memref<128x640xf32, #tpu.memory_space<vmem>>, vector<8x128xf32>
    tpu.vector_store %arg11[%c48_75, %c256_76], %102 {strides = array<i32>} : memref<128x640xf32, #tpu.memory_space<vmem>>, vector<8x128xf32>,
    %104 = vector.extract_strided_slice %37 {offsets = [75, 0], sizes = [8, 128], strides = [1, 1]} : vector<192x128xf32> to vector<8x128xf32>
    %c48_77 = arith.constant 48 : index
    %c384_78 = arith.constant 384 : index
    %105 = vector.load %arg11[%c48_77, %c384_78] : memref<128x640xf32, #tpu.memory_space<vmem>>, vector<8x128xf32>
    tpu.vector_store %arg11[%c48_77, %c384_78], %104 {strides = array<i32>} : memref<128x640xf32, #tpu.memory_space<vmem>>, vector<8x128xf32>,
    %106 = vector.extract_strided_slice %37 {offsets = [76, 0], sizes = [8, 128], strides = [1, 1]} : vector<192x128xf32> to vector<8x128xf32>
    %c48_79 = arith.constant 48 : index
    %c512_80 = arith.constant 512 : index
    %107 = vector.load %arg11[%c48_79, %c512_80] : memref<128x640xf32, #tpu.memory_space<vmem>>, vector<8x128xf32>
    tpu.vector_store %arg11[%c48_79, %c512_80], %106 {strides = array<i32>} : memref<128x640xf32, #tpu.memory_space<vmem>>, vector<8x128xf32>,
    %108 = vector.extract_strided_slice %37 {offsets = [84, 0], sizes = [8, 128], strides = [1, 1]} : vector<192x128xf32> to vector<8x128xf32>
    %c56 = arith.constant 56 : index
    %c0_81 = arith.constant 0 : index
    %109 = vector.load %arg11[%c56, %c0_81] : memref<128x640xf32, #tpu.memory_space<vmem>>, vector<8x128xf32>
    tpu.vector_store %arg11[%c56, %c0_81], %108 {strides = array<i32>} : memref<128x640xf32, #tpu.memory_space<vmem>>, vector<8x128xf32>,
    %110 = vector.extract_strided_slice %37 {offsets = [85, 0], sizes = [8, 128], strides = [1, 1]} : vector<192x128xf32> to vector<8x128xf32>
    %c56_82 = arith.constant 56 : index
    %c128_83 = arith.constant 128 : index
    %111 = vector.load %arg11[%c56_82, %c128_83] : memref<128x640xf32, #tpu.memory_space<vmem>>, vector<8x128xf32>
    tpu.vector_store %arg11[%c56_82, %c128_83], %110 {strides = array<i32>} : memref<128x640xf32, #tpu.memory_space<vmem>>, vector<8x128xf32>,
    %112 = vector.extract_strided_slice %37 {offsets = [86, 0], sizes = [8, 128], strides = [1, 1]} : vector<192x128xf32> to vector<8x128xf32>
    %c56_84 = arith.constant 56 : index
    %c256_85 = arith.constant 256 : index
    %113 = vector.load %arg11[%c56_84, %c256_85] : memref<128x640xf32, #tpu.memory_space<vmem>>, vector<8x128xf32>
    tpu.vector_store %arg11[%c56_84, %c256_85], %112 {strides = array<i32>} : memref<128x640xf32, #tpu.memory_space<vmem>>, vector<8x128xf32>,
    %114 = vector.extract_strided_slice %37 {offsets = [87, 0], sizes = [8, 128], strides = [1, 1]} : vector<192x128xf32> to vector<8x128xf32>
    %c56_86 = arith.constant 56 : index
    %c384_87 = arith.constant 384 : index
    %115 = vector.load %arg11[%c56_86, %c384_87] : memref<128x640xf32, #tpu.memory_space<vmem>>, vector<8x128xf32>
    tpu.vector_store %arg11[%c56_86, %c384_87], %114 {strides = array<i32>} : memref<128x640xf32, #tpu.memory_space<vmem>>, vector<8x128xf32>,
    %116 = vector.extract_strided_slice %37 {offsets = [88, 0], sizes = [8, 128], strides = [1, 1]} : vector<192x128xf32> to vector<8x128xf32>
    %c56_88 = arith.constant 56 : index
    %c512_89 = arith.constant 512 : index
    %117 = vector.load %arg11[%c56_88, %c512_89] : memref<128x640xf32, #tpu.memory_space<vmem>>, vector<8x128xf32>
    tpu.vector_store %arg11[%c56_88, %c512_89], %116 {strides = array<i32>} : memref<128x640xf32, #tpu.memory_space<vmem>>, vector<8x128xf32>,
    %118 = vector.extract_strided_slice %37 {offsets = [96, 0], sizes = [8, 128], strides = [1, 1]} : vector<192x128xf32> to vector<8x128xf32>
    %c64 = arith.constant 64 : index
    %c0_90 = arith.constant 0 : index
    %119 = vector.load %arg11[%c64, %c0_90] : memref<128x640xf32, #tpu.memory_space<vmem>>, vector<8x128xf32>
    tpu.vector_store %arg11[%c64, %c0_90], %118 {strides = array<i32>} : memref<128x640xf32, #tpu.memory_space<vmem>>, vector<8x128xf32>,
    %120 = vector.extract_strided_slice %37 {offsets = [97, 0], sizes = [8, 128], strides = [1, 1]} : vector<192x128xf32> to vector<8x128xf32>
    %c64_91 = arith.constant 64 : index
    %c128_92 = arith.constant 128 : index
    %121 = vector.load %arg11[%c64_91, %c128_92] : memref<128x640xf32, #tpu.memory_space<vmem>>, vector<8x128xf32>
    tpu.vector_store %arg11[%c64_91, %c128_92], %120 {strides = array<i32>} : memref<128x640xf32, #tpu.memory_space<vmem>>, vector<8x128xf32>,
    %122 = vector.extract_strided_slice %37 {offsets = [98, 0], sizes = [8, 128], strides = [1, 1]} : vector<192x128xf32> to vector<8x128xf32>
    %c64_93 = arith.constant 64 : index
    %c256_94 = arith.constant 256 : index
    %123 = vector.load %arg11[%c64_93, %c256_94] : memref<128x640xf32, #tpu.memory_space<vmem>>, vector<8x128xf32>
    tpu.vector_store %arg11[%c64_93, %c256_94], %122 {strides = array<i32>} : memref<128x640xf32, #tpu.memory_space<vmem>>, vector<8x128xf32>,
    %124 = vector.extract_strided_slice %37 {offsets = [99, 0], sizes = [8, 128], strides = [1, 1]} : vector<192x128xf32> to vector<8x128xf32>
    %c64_95 = arith.constant 64 : index
    %c384_96 = arith.constant 384 : index
    %125 = vector.load %arg11[%c64_95, %c384_96] : memref<128x640xf32, #tpu.memory_space<vmem>>, vector<8x128xf32>
    tpu.vector_store %arg11[%c64_95, %c384_96], %124 {strides = array<i32>} : memref<128x640xf32, #tpu.memory_space<vmem>>, vector<8x128xf32>,
    %126 = vector.extract_strided_slice %37 {offsets = [100, 0], sizes = [8, 128], strides = [1, 1]} : vector<192x128xf32> to vector<8x128xf32>
    %c64_97 = arith.constant 64 : index
    %c512_98 = arith.constant 512 : index
    %127 = vector.load %arg11[%c64_97, %c512_98] : memref<128x640xf32, #tpu.memory_space<vmem>>, vector<8x128xf32>
    tpu.vector_store %arg11[%c64_97, %c512_98], %126 {strides = array<i32>} : memref<128x640xf32, #tpu.memory_space<vmem>>, vector<8x128xf32>,
    %128 = vector.extract_strided_slice %37 {offsets = [108, 0], sizes = [8, 128], strides = [1, 1]} : vector<192x128xf32> to vector<8x128xf32>
    %c72 = arith.constant 72 : index
    %c0_99 = arith.constant 0 : index
    %129 = vector.load %arg11[%c72, %c0_99] : memref<128x640xf32, #tpu.memory_space<vmem>>, vector<8x128xf32>
    tpu.vector_store %arg11[%c72, %c0_99], %128 {strides = array<i32>} : memref<128x640xf32, #tpu.memory_space<vmem>>, vector<8x128xf32>,
    %130 = vector.extract_strided_slice %37 {offsets = [109, 0], sizes = [8, 128], strides = [1, 1]} : vector<192x128xf32> to vector<8x128xf32>
    %c72_100 = arith.constant 72 : index
    %c128_101 = arith.constant 128 : index
    %131 = vector.load %arg11[%c72_100, %c128_101] : memref<128x640xf32, #tpu.memory_space<vmem>>, vector<8x128xf32>
    tpu.vector_store %arg11[%c72_100, %c128_101], %130 {strides = array<i32>} : memref<128x640xf32, #tpu.memory_space<vmem>>, vector<8x128xf32>,
    %132 = vector.extract_strided_slice %37 {offsets = [110, 0], sizes = [8, 128], strides = [1, 1]} : vector<192x128xf32> to vector<8x128xf32>
    %c72_102 = arith.constant 72 : index
    %c256_103 = arith.constant 256 : index
    %133 = vector.load %arg11[%c72_102, %c256_103] : memref<128x640xf32, #tpu.memory_space<vmem>>, vector<8x128xf32>
    tpu.vector_store %arg11[%c72_102, %c256_103], %132 {strides = array<i32>} : memref<128x640xf32, #tpu.memory_space<vmem>>, vector<8x128xf32>,
    %134 = vector.extract_strided_slice %37 {offsets = [111, 0], sizes = [8, 128], strides = [1, 1]} : vector<192x128xf32> to vector<8x128xf32>
    %c72_104 = arith.constant 72 : index
    %c384_105 = arith.constant 384 : index
    %135 = vector.load %arg11[%c72_104, %c384_105] : memref<128x640xf32, #tpu.memory_space<vmem>>, vector<8x128xf32>
    tpu.vector_store %arg11[%c72_104, %c384_105], %134 {strides = array<i32>} : memref<128x640xf32, #tpu.memory_space<vmem>>, vector<8x128xf32>,
    %136 = vector.extract_strided_slice %37 {offsets = [112, 0], sizes = [8, 128], strides = [1, 1]} : vector<192x128xf32> to vector<8x128xf32>
    %c72_106 = arith.constant 72 : index
    %c512_107 = arith.constant 512 : index
    %137 = vector.load %arg11[%c72_106, %c512_107] : memref<128x640xf32, #tpu.memory_space<vmem>>, vector<8x128xf32>
    tpu.vector_store %arg11[%c72_106, %c512_107], %136 {strides = array<i32>} : memref<128x640xf32, #tpu.memory_space<vmem>>, vector<8x128xf32>,
    %138 = vector.extract_strided_slice %37 {offsets = [120, 0], sizes = [8, 128], strides = [1, 1]} : vector<192x128xf32> to vector<8x128xf32>
    %c80 = arith.constant 80 : index
    %c0_108 = arith.constant 0 : index
    %139 = vector.load %arg11[%c80, %c0_108] : memref<128x640xf32, #tpu.memory_space<vmem>>, vector<8x128xf32>
    tpu.vector_store %arg11[%c80, %c0_108], %138 {strides = array<i32>} : memref<128x640xf32, #tpu.memory_space<vmem>>, vector<8x128xf32>,
    %140 = vector.extract_strided_slice %37 {offsets = [121, 0], sizes = [8, 128], strides = [1, 1]} : vector<192x128xf32> to vector<8x128xf32>
    %c80_109 = arith.constant 80 : index
    %c128_110 = arith.constant 128 : index
    %141 = vector.load %arg11[%c80_109, %c128_110] : memref<128x640xf32, #tpu.memory_space<vmem>>, vector<8x128xf32>
    tpu.vector_store %arg11[%c80_109, %c128_110], %140 {strides = array<i32>} : memref<128x640xf32, #tpu.memory_space<vmem>>, vector<8x128xf32>,
    %142 = vector.extract_strided_slice %37 {offsets = [122, 0], sizes = [8, 128], strides = [1, 1]} : vector<192x128xf32> to vector<8x128xf32>
    %c80_111 = arith.constant 80 : index
    %c256_112 = arith.constant 256 : index
    %143 = vector.load %arg11[%c80_111, %c256_112] : memref<128x640xf32, #tpu.memory_space<vmem>>, vector<8x128xf32>
    tpu.vector_store %arg11[%c80_111, %c256_112], %142 {strides = array<i32>} : memref<128x640xf32, #tpu.memory_space<vmem>>, vector<8x128xf32>,
    %144 = vector.extract_strided_slice %37 {offsets = [123, 0], sizes = [8, 128], strides = [1, 1]} : vector<192x128xf32> to vector<8x128xf32>
    %c80_113 = arith.constant 80 : index
    %c384_114 = arith.constant 384 : index
    %145 = vector.load %arg11[%c80_113, %c384_114] : memref<128x640xf32, #tpu.memory_space<vmem>>, vector<8x128xf32>
    tpu.vector_store %arg11[%c80_113, %c384_114], %144 {strides = array<i32>} : memref<128x640xf32, #tpu.memory_space<vmem>>, vector<8x128xf32>,
    %146 = vector.extract_strided_slice %37 {offsets = [124, 0], sizes = [8, 128], strides = [1, 1]} : vector<192x128xf32> to vector<8x128xf32>
    %c80_115 = arith.constant 80 : index
    %c512_116 = arith.constant 512 : index
    %147 = vector.load %arg11[%c80_115, %c512_116] : memref<128x640xf32, #tpu.memory_space<vmem>>, vector<8x128xf32>
    tpu.vector_store %arg11[%c80_115, %c512_116], %146 {strides = array<i32>} : memref<128x640xf32, #tpu.memory_space<vmem>>, vector<8x128xf32>,
    %148 = vector.extract_strided_slice %37 {offsets = [132, 0], sizes = [8, 128], strides = [1, 1]} : vector<192x128xf32> to vector<8x128xf32>
    %c88 = arith.constant 88 : index
    %c0_117 = arith.constant 0 : index
    %149 = vector.load %arg11[%c88, %c0_117] : memref<128x640xf32, #tpu.memory_space<vmem>>, vector<8x128xf32>
    tpu.vector_store %arg11[%c88, %c0_117], %148 {strides = array<i32>} : memref<128x640xf32, #tpu.memory_space<vmem>>, vector<8x128xf32>,
    %150 = vector.extract_strided_slice %37 {offsets = [133, 0], sizes = [8, 128], strides = [1, 1]} : vector<192x128xf32> to vector<8x128xf32>
    %c88_118 = arith.constant 88 : index
    %c128_119 = arith.constant 128 : index
    %151 = vector.load %arg11[%c88_118, %c128_119] : memref<128x640xf32, #tpu.memory_space<vmem>>, vector<8x128xf32>
    tpu.vector_store %arg11[%c88_118, %c128_119], %150 {strides = array<i32>} : memref<128x640xf32, #tpu.memory_space<vmem>>, vector<8x128xf32>,
    %152 = vector.extract_strided_slice %37 {offsets = [134, 0], sizes = [8, 128], strides = [1, 1]} : vector<192x128xf32> to vector<8x128xf32>
    %c88_120 = arith.constant 88 : index
    %c256_121 = arith.constant 256 : index
    %153 = vector.load %arg11[%c88_120, %c256_121] : memref<128x640xf32, #tpu.memory_space<vmem>>, vector<8x128xf32>
    tpu.vector_store %arg11[%c88_120, %c256_121], %152 {strides = array<i32>} : memref<128x640xf32, #tpu.memory_space<vmem>>, vector<8x128xf32>,
    %154 = vector.extract_strided_slice %37 {offsets = [135, 0], sizes = [8, 128], strides = [1, 1]} : vector<192x128xf32> to vector<8x128xf32>
    %c88_122 = arith.constant 88 : index
    %c384_123 = arith.constant 384 : index
    %155 = vector.load %arg11[%c88_122, %c384_123] : memref<128x640xf32, #tpu.memory_space<vmem>>, vector<8x128xf32>
    tpu.vector_store %arg11[%c88_122, %c384_123], %154 {strides = array<i32>} : memref<128x640xf32, #tpu.memory_space<vmem>>, vector<8x128xf32>,
    %156 = vector.extract_strided_slice %37 {offsets = [136, 0], sizes = [8, 128], strides = [1, 1]} : vector<192x128xf32> to vector<8x128xf32>
    %c88_124 = arith.constant 88 : index
    %c512_125 = arith.constant 512 : index
    %157 = vector.load %arg11[%c88_124, %c512_125] : memref<128x640xf32, #tpu.memory_space<vmem>>, vector<8x128xf32>
    tpu.vector_store %arg11[%c88_124, %c512_125], %156 {strides = array<i32>} : memref<128x640xf32, #tpu.memory_space<vmem>>, vector<8x128xf32>,
    %158 = vector.extract_strided_slice %37 {offsets = [144, 0], sizes = [8, 128], strides = [1, 1]} : vector<192x128xf32> to vector<8x128xf32>
    %c96 = arith.constant 96 : index
    %c0_126 = arith.constant 0 : index
    %159 = vector.load %arg11[%c96, %c0_126] : memref<128x640xf32, #tpu.memory_space<vmem>>, vector<8x128xf32>
    tpu.vector_store %arg11[%c96, %c0_126], %158 {strides = array<i32>} : memref<128x640xf32, #tpu.memory_space<vmem>>, vector<8x128xf32>,
    %160 = vector.extract_strided_slice %37 {offsets = [145, 0], sizes = [8, 128], strides = [1, 1]} : vector<192x128xf32> to vector<8x128xf32>
    %c96_127 = arith.constant 96 : index
    %c128_128 = arith.constant 128 : index
    %161 = vector.load %arg11[%c96_127, %c128_128] : memref<128x640xf32, #tpu.memory_space<vmem>>, vector<8x128xf32>
    tpu.vector_store %arg11[%c96_127, %c128_128], %160 {strides = array<i32>} : memref<128x640xf32, #tpu.memory_space<vmem>>, vector<8x128xf32>,
    %162 = vector.extract_strided_slice %37 {offsets = [146, 0], sizes = [8, 128], strides = [1, 1]} : vector<192x128xf32> to vector<8x128xf32>
    %c96_129 = arith.constant 96 : index
    %c256_130 = arith.constant 256 : index
    %163 = vector.load %arg11[%c96_129, %c256_130] : memref<128x640xf32, #tpu.memory_space<vmem>>, vector<8x128xf32>
    tpu.vector_store %arg11[%c96_129, %c256_130], %162 {strides = array<i32>} : memref<128x640xf32, #tpu.memory_space<vmem>>, vector<8x128xf32>,
    %164 = vector.extract_strided_slice %37 {offsets = [147, 0], sizes = [8, 128], strides = [1, 1]} : vector<192x128xf32> to vector<8x128xf32>
    %c96_131 = arith.constant 96 : index
    %c384_132 = arith.constant 384 : index
    %165 = vector.load %arg11[%c96_131, %c384_132] : memref<128x640xf32, #tpu.memory_space<vmem>>, vector<8x128xf32>
    tpu.vector_store %arg11[%c96_131, %c384_132], %164 {strides = array<i32>} : memref<128x640xf32, #tpu.memory_space<vmem>>, vector<8x128xf32>,
    %166 = vector.extract_strided_slice %37 {offsets = [148, 0], sizes = [8, 128], strides = [1, 1]} : vector<192x128xf32> to vector<8x128xf32>
    %c96_133 = arith.constant 96 : index
    %c512_134 = arith.constant 512 : index
    %167 = vector.load %arg11[%c96_133, %c512_134] : memref<128x640xf32, #tpu.memory_space<vmem>>, vector<8x128xf32>
    tpu.vector_store %arg11[%c96_133, %c512_134], %166 {strides = array<i32>} : memref<128x640xf32, #tpu.memory_space<vmem>>, vector<8x128xf32>,
    %168 = vector.extract_strided_slice %37 {offsets = [156, 0], sizes = [8, 128], strides = [1, 1]} : vector<192x128xf32> to vector<8x128xf32>
    %c104 = arith.constant 104 : index
    %c0_135 = arith.constant 0 : index
    %169 = vector.load %arg11[%c104, %c0_135] : memref<128x640xf32, #tpu.memory_space<vmem>>, vector<8x128xf32>
    tpu.vector_store %arg11[%c104, %c0_135], %168 {strides = array<i32>} : memref<128x640xf32, #tpu.memory_space<vmem>>, vector<8x128xf32>,
    %170 = vector.extract_strided_slice %37 {offsets = [157, 0], sizes = [8, 128], strides = [1, 1]} : vector<192x128xf32> to vector<8x128xf32>
    %c104_136 = arith.constant 104 : index
    %c128_137 = arith.constant 128 : index
    %171 = vector.load %arg11[%c104_136, %c128_137] : memref<128x640xf32, #tpu.memory_space<vmem>>, vector<8x128xf32>
    tpu.vector_store %arg11[%c104_136, %c128_137], %170 {strides = array<i32>} : memref<128x640xf32, #tpu.memory_space<vmem>>, vector<8x128xf32>,
    %172 = vector.extract_strided_slice %37 {offsets = [158, 0], sizes = [8, 128], strides = [1, 1]} : vector<192x128xf32> to vector<8x128xf32>
    %c104_138 = arith.constant 104 : index
    %c256_139 = arith.constant 256 : index
    %173 = vector.load %arg11[%c104_138, %c256_139] : memref<128x640xf32, #tpu.memory_space<vmem>>, vector<8x128xf32>
    tpu.vector_store %arg11[%c104_138, %c256_139], %172 {strides = array<i32>} : memref<128x640xf32, #tpu.memory_space<vmem>>, vector<8x128xf32>,
    %174 = vector.extract_strided_slice %37 {offsets = [159, 0], sizes = [8, 128], strides = [1, 1]} : vector<192x128xf32> to vector<8x128xf32>
    %c104_140 = arith.constant 104 : index
    %c384_141 = arith.constant 384 : index
    %175 = vector.load %arg11[%c104_140, %c384_141] : memref<128x640xf32, #tpu.memory_space<vmem>>, vector<8x128xf32>
    tpu.vector_store %arg11[%c104_140, %c384_141], %174 {strides = array<i32>} : memref<128x640xf32, #tpu.memory_space<vmem>>, vector<8x128xf32>,
    %176 = vector.extract_strided_slice %37 {offsets = [160, 0], sizes = [8, 128], strides = [1, 1]} : vector<192x128xf32> to vector<8x128xf32>
    %c104_142 = arith.constant 104 : index
    %c512_143 = arith.constant 512 : index
    %177 = vector.load %arg11[%c104_142, %c512_143] : memref<128x640xf32, #tpu.memory_space<vmem>>, vector<8x128xf32>
    tpu.vector_store %arg11[%c104_142, %c512_143], %176 {strides = array<i32>} : memref<128x640xf32, #tpu.memory_space<vmem>>, vector<8x128xf32>,
    %178 = vector.extract_strided_slice %37 {offsets = [168, 0], sizes = [8, 128], strides = [1, 1]} : vector<192x128xf32> to vector<8x128xf32>
    %c112 = arith.constant 112 : index
    %c0_144 = arith.constant 0 : index
    %179 = vector.load %arg11[%c112, %c0_144] : memref<128x640xf32, #tpu.memory_space<vmem>>, vector<8x128xf32>
    tpu.vector_store %arg11[%c112, %c0_144], %178 {strides = array<i32>} : memref<128x640xf32, #tpu.memory_space<vmem>>, vector<8x128xf32>,
    %180 = vector.extract_strided_slice %37 {offsets = [169, 0], sizes = [8, 128], strides = [1, 1]} : vector<192x128xf32> to vector<8x128xf32>
    %c112_145 = arith.constant 112 : index
    %c128_146 = arith.constant 128 : index
    %181 = vector.load %arg11[%c112_145, %c128_146] : memref<128x640xf32, #tpu.memory_space<vmem>>, vector<8x128xf32>
    tpu.vector_store %arg11[%c112_145, %c128_146], %180 {strides = array<i32>} : memref<128x640xf32, #tpu.memory_space<vmem>>, vector<8x128xf32>,
    %182 = vector.extract_strided_slice %37 {offsets = [170, 0], sizes = [8, 128], strides = [1, 1]} : vector<192x128xf32> to vector<8x128xf32>
    %c112_147 = arith.constant 112 : index
    %c256_148 = arith.constant 256 : index
    %183 = vector.load %arg11[%c112_147, %c256_148] : memref<128x640xf32, #tpu.memory_space<vmem>>, vector<8x128xf32>
    tpu.vector_store %arg11[%c112_147, %c256_148], %182 {strides = array<i32>} : memref<128x640xf32, #tpu.memory_space<vmem>>, vector<8x128xf32>,
    %184 = vector.extract_strided_slice %37 {offsets = [171, 0], sizes = [8, 128], strides = [1, 1]} : vector<192x128xf32> to vector<8x128xf32>
    %c112_149 = arith.constant 112 : index
    %c384_150 = arith.constant 384 : index
    %185 = vector.load %arg11[%c112_149, %c384_150] : memref<128x640xf32, #tpu.memory_space<vmem>>, vector<8x128xf32>
    tpu.vector_store %arg11[%c112_149, %c384_150], %184 {strides = array<i32>} : memref<128x640xf32, #tpu.memory_space<vmem>>, vector<8x128xf32>,
    %186 = vector.extract_strided_slice %37 {offsets = [172, 0], sizes = [8, 128], strides = [1, 1]} : vector<192x128xf32> to vector<8x128xf32>
    %c112_151 = arith.constant 112 : index
    %c512_152 = arith.constant 512 : index
    %187 = vector.load %arg11[%c112_151, %c512_152] : memref<128x640xf32, #tpu.memory_space<vmem>>, vector<8x128xf32>
    tpu.vector_store %arg11[%c112_151, %c512_152], %186 {strides = array<i32>} : memref<128x640xf32, #tpu.memory_space<vmem>>, vector<8x128xf32>,
    %188 = vector.extract_strided_slice %37 {offsets = [180, 0], sizes = [8, 128], strides = [1, 1]} : vector<192x128xf32> to vector<8x128xf32>
    %c120 = arith.constant 120 : index
    %c0_153 = arith.constant 0 : index
    %189 = vector.load %arg11[%c120, %c0_153] : memref<128x640xf32, #tpu.memory_space<vmem>>, vector<8x128xf32>
    tpu.vector_store %arg11[%c120, %c0_153], %188 {strides = array<i32>} : memref<128x640xf32, #tpu.memory_space<vmem>>, vector<8x128xf32>,
    %190 = vector.extract_strided_slice %37 {offsets = [181, 0], sizes = [8, 128], strides = [1, 1]} : vector<192x128xf32> to vector<8x128xf32>
    %c120_154 = arith.constant 120 : index
    %c128_155 = arith.constant 128 : index
    %191 = vector.load %arg11[%c120_154, %c128_155] : memref<128x640xf32, #tpu.memory_space<vmem>>, vector<8x128xf32>
    tpu.vector_store %arg11[%c120_154, %c128_155], %190 {strides = array<i32>} : memref<128x640xf32, #tpu.memory_space<vmem>>, vector<8x128xf32>,
    %192 = vector.extract_strided_slice %37 {offsets = [182, 0], sizes = [8, 128], strides = [1, 1]} : vector<192x128xf32> to vector<8x128xf32>
    %c120_156 = arith.constant 120 : index
    %c256_157 = arith.constant 256 : index
    %193 = vector.load %arg11[%c120_156, %c256_157] : memref<128x640xf32, #tpu.memory_space<vmem>>, vector<8x128xf32>
    tpu.vector_store %arg11[%c120_156, %c256_157], %192 {strides = array<i32>} : memref<128x640xf32, #tpu.memory_space<vmem>>, vector<8x128xf32>,
    %194 = vector.extract_strided_slice %37 {offsets = [183, 0], sizes = [8, 128], strides = [1, 1]} : vector<192x128xf32> to vector<8x128xf32>
    %c120_158 = arith.constant 120 : index
    %c384_159 = arith.constant 384 : index
    %195 = vector.load %arg11[%c120_158, %c384_159] : memref<128x640xf32, #tpu.memory_space<vmem>>, vector<8x128xf32>
    tpu.vector_store %arg11[%c120_158, %c384_159], %194 {strides = array<i32>} : memref<128x640xf32, #tpu.memory_space<vmem>>, vector<8x128xf32>,
    %196 = vector.extract_strided_slice %37 {offsets = [184, 0], sizes = [8, 128], strides = [1, 1]} : vector<192x128xf32> to vector<8x128xf32>
    %c120_160 = arith.constant 120 : index
    %c512_161 = arith.constant 512 : index
    %197 = vector.load %arg11[%c120_160, %c512_161] : memref<128x640xf32, #tpu.memory_space<vmem>>, vector<8x128xf32>
    tpu.vector_store %arg11[%c120_160, %c512_161], %196 {strides = array<i32>} : memref<128x640xf32, #tpu.memory_space<vmem>>, vector<8x128xf32>,
    %cst_162 = arith.constant 0.000000e+00 : f32
    %198 = vector.broadcast %cst_162 : f32 to vector<96x64xf32>
    %c0_163 = arith.constant 0 : index
    %c0_164 = arith.constant 0 : index
    %199 = vector.load %arg11[%c0_163, %c0_164] : memref<128x640xf32, #tpu.memory_space<vmem>>, vector<96x640xf32>
    %200 = arith.truncf %199 : vector<96x640xf32> to vector<96x640xbf16>
    %c0_165 = arith.constant 0 : index
    %c0_166 = arith.constant 0 : index
    %c0_167 = arith.constant 0 : index
    %201 = vector.load %arg4[%c0_165, %c0_166, %c0_167] : memref<5x640x64xbf16, #tpu.memory_space<vmem>>, vector<1x640x64xbf16>
    %202 = vector.shape_cast %201 : vector<1x640x64xbf16> to vector<640x64xbf16>
    %cst_168 = arith.constant dense<0.000000e+00> : vector<96x64xf32>
    %203 = tpu.matmul %200, %202, %cst_168 {dimension_numbers = #tpu.dot_dimension_numbers<[1], [0], [0], [1], [0, 0, 1, 1], [], []>} : vector<96x640xbf16>, vector<640x64xbf16>, vector<96x64xf32> -> vector<96x64xf32>
    %204 = arith.addf %198, %203 : vector<96x64xf32>
    %c8_169 = arith.constant 8 : index
    %c0_170 = arith.constant 0 : index
    %205 = vector.load %arg11[%c8_169, %c0_170] : memref<128x640xf32, #tpu.memory_space<vmem>>, vector<96x640xf32>
    %206 = arith.truncf %205 : vector<96x640xf32> to vector<96x640xbf16>
    %c1_171 = arith.constant 1 : index
    %c0_172 = arith.constant 0 : index
    %c0_173 = arith.constant 0 : index
    %207 = vector.load %arg4[%c1_171, %c0_172, %c0_173] : memref<5x640x64xbf16, #tpu.memory_space<vmem>>, vector<1x640x64xbf16>
    %208 = vector.shape_cast %207 : vector<1x640x64xbf16> to vector<640x64xbf16>
    %cst_174 = arith.constant dense<0.000000e+00> : vector<96x64xf32>
    %209 = tpu.matmul %206, %208, %cst_174 {dimension_numbers = #tpu.dot_dimension_numbers<[1], [0], [0], [1], [0, 0, 1, 1], [], []>} : vector<96x640xbf16>, vector<640x64xbf16>, vector<96x64xf32> -> vector<96x64xf32>
    %210 = arith.addf %204, %209 : vector<96x64xf32>
    %c16_175 = arith.constant 16 : index
    %c0_176 = arith.constant 0 : index
    %211 = vector.load %arg11[%c16_175, %c0_176] : memref<128x640xf32, #tpu.memory_space<vmem>>, vector<96x640xf32>
    %212 = arith.truncf %211 : vector<96x640xf32> to vector<96x640xbf16>
    %c2_177 = arith.constant 2 : index
    %c0_178 = arith.constant 0 : index
    %c0_179 = arith.constant 0 : index
    %213 = vector.load %arg4[%c2_177, %c0_178, %c0_179] : memref<5x640x64xbf16, #tpu.memory_space<vmem>>, vector<1x640x64xbf16>
    %214 = vector.shape_cast %213 : vector<1x640x64xbf16> to vector<640x64xbf16>
    %cst_180 = arith.constant dense<0.000000e+00> : vector<96x64xf32>
    %215 = tpu.matmul %212, %214, %cst_180 {dimension_numbers = #tpu.dot_dimension_numbers<[1], [0], [0], [1], [0, 0, 1, 1], [], []>} : vector<96x640xbf16>, vector<640x64xbf16>, vector<96x64xf32> -> vector<96x64xf32>
    %216 = arith.addf %210, %215 : vector<96x64xf32>
    %c24_181 = arith.constant 24 : index
    %c0_182 = arith.constant 0 : index
    %217 = vector.load %arg11[%c24_181, %c0_182] : memref<128x640xf32, #tpu.memory_space<vmem>>, vector<96x640xf32>
    %218 = arith.truncf %217 : vector<96x640xf32> to vector<96x640xbf16>
    %c3_183 = arith.constant 3 : index
    %c0_184 = arith.constant 0 : index
    %c0_185 = arith.constant 0 : index
    %219 = vector.load %arg4[%c3_183, %c0_184, %c0_185] : memref<5x640x64xbf16, #tpu.memory_space<vmem>>, vector<1x640x64xbf16>
    %220 = vector.shape_cast %219 : vector<1x640x64xbf16> to vector<640x64xbf16>
    %cst_186 = arith.constant dense<0.000000e+00> : vector<96x64xf32>
    %221 = tpu.matmul %218, %220, %cst_186 {dimension_numbers = #tpu.dot_dimension_numbers<[1], [0], [0], [1], [0, 0, 1, 1], [], []>} : vector<96x640xbf16>, vector<640x64xbf16>, vector<96x64xf32> -> vector<96x64xf32>
    %222 = arith.addf %216, %221 : vector<96x64xf32>
    %c32_187 = arith.constant 32 : index
    %c0_188 = arith.constant 0 : index
    %223 = vector.load %arg11[%c32_187, %c0_188] : memref<128x640xf32, #tpu.memory_space<vmem>>, vector<96x640xf32>
    %224 = arith.truncf %223 : vector<96x640xf32> to vector<96x640xbf16>
    %c4_189 = arith.constant 4 : index
    %c0_190 = arith.constant 0 : index
    %c0_191 = arith.constant 0 : index
    %225 = vector.load %arg4[%c4_189, %c0_190, %c0_191] : memref<5x640x64xbf16, #tpu.memory_space<vmem>>, vector<1x640x64xbf16>
    %226 = vector.shape_cast %225 : vector<1x640x64xbf16> to vector<640x64xbf16>
    %cst_192 = arith.constant dense<0.000000e+00> : vector<96x64xf32>
    %227 = tpu.matmul %224, %226, %cst_192 {dimension_numbers = #tpu.dot_dimension_numbers<[1], [0], [0], [1], [0, 0, 1, 1], [], []>} : vector<96x640xbf16>, vector<640x64xbf16>, vector<96x64xf32> -> vector<96x64xf32>
    %228 = arith.addf %222, %227 : vector<96x64xf32>
    %c0_193 = arith.constant 0 : index
    %c0_194 = arith.constant 0 : index
    %229 = vector.load %arg5[%c0_193, %c0_194] : memref<1x64xf32, #tpu.memory_space<vmem>>, vector<1x64xf32>
    %230 = vector.broadcast %229 : vector<1x64xf32> to vector<96x64xf32>
    %231 = arith.addf %228, %230 : vector<96x64xf32>
    %cst_195 = arith.constant 0.000000e+00 : f32
    %232 = vector.broadcast %cst_195 : f32 to vector<96x64xf32>
    %233 = arith.maximumf %231, %232 : vector<96x64xf32>
    %234 = vector.extract_strided_slice %233 {offsets = [0, 0], sizes = [4, 64], strides = [1, 1]} : vector<96x64xf32> to vector<4x64xf32>
    %c0_196 = arith.constant 0 : index
    %c0_197 = arith.constant 0 : index
    %235 = vector.load %arg12[%c0_196, %c0_197] : memref<48x320xf32, #tpu.memory_space<vmem>>, vector<4x64xf32>
    tpu.vector_store %arg12[%c0_196, %c0_197], %234 {strides = array<i32>} : memref<48x320xf32, #tpu.memory_space<vmem>>, vector<4x64xf32>,
    %236 = vector.extract_strided_slice %233 {offsets = [1, 0], sizes = [4, 64], strides = [1, 1]} : vector<96x64xf32> to vector<4x64xf32>
    %c0_198 = arith.constant 0 : index
    %c64_199 = arith.constant 64 : index
    %237 = vector.load %arg12[%c0_198, %c64_199] : memref<48x320xf32, #tpu.memory_space<vmem>>, vector<4x64xf32>
    tpu.vector_store %arg12[%c0_198, %c64_199], %236 {strides = array<i32>} : memref<48x320xf32, #tpu.memory_space<vmem>>, vector<4x64xf32>,
    %238 = vector.extract_strided_slice %233 {offsets = [2, 0], sizes = [4, 64], strides = [1, 1]} : vector<96x64xf32> to vector<4x64xf32>
    %c0_200 = arith.constant 0 : index
    %c128_201 = arith.constant 128 : index
    %239 = vector.load %arg12[%c0_200, %c128_201] : memref<48x320xf32, #tpu.memory_space<vmem>>, vector<4x64xf32>
    tpu.vector_store %arg12[%c0_200, %c128_201], %238 {strides = array<i32>} : memref<48x320xf32, #tpu.memory_space<vmem>>, vector<4x64xf32>,
    %240 = vector.extract_strided_slice %233 {offsets = [3, 0], sizes = [4, 64], strides = [1, 1]} : vector<96x64xf32> to vector<4x64xf32>
    %c0_202 = arith.constant 0 : index
    %c192 = arith.constant 192 : index
    %241 = vector.load %arg12[%c0_202, %c192] : memref<48x320xf32, #tpu.memory_space<vmem>>, vector<4x64xf32>
    tpu.vector_store %arg12[%c0_202, %c192], %240 {strides = array<i32>} : memref<48x320xf32, #tpu.memory_space<vmem>>, vector<4x64xf32>,
    %242 = vector.extract_strided_slice %233 {offsets = [4, 0], sizes = [4, 64], strides = [1, 1]} : vector<96x64xf32> to vector<4x64xf32>
    %c0_203 = arith.constant 0 : index
    %c256_204 = arith.constant 256 : index
    %243 = vector.load %arg12[%c0_203, %c256_204] : memref<48x320xf32, #tpu.memory_space<vmem>>, vector<4x64xf32>
    tpu.vector_store %arg12[%c0_203, %c256_204], %242 {strides = array<i32>} : memref<48x320xf32, #tpu.memory_space<vmem>>, vector<4x64xf32>,
    %244 = vector.extract_strided_slice %233 {offsets = [8, 0], sizes = [4, 64], strides = [1, 1]} : vector<96x64xf32> to vector<4x64xf32>
    %c4_205 = arith.constant 4 : index
    %c0_206 = arith.constant 0 : index
    %245 = vector.load %arg12[%c4_205, %c0_206] : memref<48x320xf32, #tpu.memory_space<vmem>>, vector<4x64xf32>
    tpu.vector_store %arg12[%c4_205, %c0_206], %244 {strides = array<i32>} : memref<48x320xf32, #tpu.memory_space<vmem>>, vector<4x64xf32>,
    %246 = vector.extract_strided_slice %233 {offsets = [9, 0], sizes = [4, 64], strides = [1, 1]} : vector<96x64xf32> to vector<4x64xf32>
    %c4_207 = arith.constant 4 : index
    %c64_208 = arith.constant 64 : index
    %247 = vector.load %arg12[%c4_207, %c64_208] : memref<48x320xf32, #tpu.memory_space<vmem>>, vector<4x64xf32>
    tpu.vector_store %arg12[%c4_207, %c64_208], %246 {strides = array<i32>} : memref<48x320xf32, #tpu.memory_space<vmem>>, vector<4x64xf32>,
    %248 = vector.extract_strided_slice %233 {offsets = [10, 0], sizes = [4, 64], strides = [1, 1]} : vector<96x64xf32> to vector<4x64xf32>
    %c4_209 = arith.constant 4 : index
    %c128_210 = arith.constant 128 : index
    %249 = vector.load %arg12[%c4_209, %c128_210] : memref<48x320xf32, #tpu.memory_space<vmem>>, vector<4x64xf32>
    tpu.vector_store %arg12[%c4_209, %c128_210], %248 {strides = array<i32>} : memref<48x320xf32, #tpu.memory_space<vmem>>, vector<4x64xf32>,
    %250 = vector.extract_strided_slice %233 {offsets = [11, 0], sizes = [4, 64], strides = [1, 1]} : vector<96x64xf32> to vector<4x64xf32>
    %c4_211 = arith.constant 4 : index
    %c192_212 = arith.constant 192 : index
    %251 = vector.load %arg12[%c4_211, %c192_212] : memref<48x320xf32, #tpu.memory_space<vmem>>, vector<4x64xf32>
    tpu.vector_store %arg12[%c4_211, %c192_212], %250 {strides = array<i32>} : memref<48x320xf32, #tpu.memory_space<vmem>>, vector<4x64xf32>,
    %252 = vector.extract_strided_slice %233 {offsets = [12, 0], sizes = [4, 64], strides = [1, 1]} : vector<96x64xf32> to vector<4x64xf32>
    %c4_213 = arith.constant 4 : index
    %c256_214 = arith.constant 256 : index
    %253 = vector.load %arg12[%c4_213, %c256_214] : memref<48x320xf32, #tpu.memory_space<vmem>>, vector<4x64xf32>
    tpu.vector_store %arg12[%c4_213, %c256_214], %252 {strides = array<i32>} : memref<48x320xf32, #tpu.memory_space<vmem>>, vector<4x64xf32>,
    %254 = vector.extract_strided_slice %233 {offsets = [16, 0], sizes = [4, 64], strides = [1, 1]} : vector<96x64xf32> to vector<4x64xf32>
    %c8_215 = arith.constant 8 : index
    %c0_216 = arith.constant 0 : index
    %255 = vector.load %arg12[%c8_215, %c0_216] : memref<48x320xf32, #tpu.memory_space<vmem>>, vector<4x64xf32>
    tpu.vector_store %arg12[%c8_215, %c0_216], %254 {strides = array<i32>} : memref<48x320xf32, #tpu.memory_space<vmem>>, vector<4x64xf32>,
    %256 = vector.extract_strided_slice %233 {offsets = [17, 0], sizes = [4, 64], strides = [1, 1]} : vector<96x64xf32> to vector<4x64xf32>
    %c8_217 = arith.constant 8 : index
    %c64_218 = arith.constant 64 : index
    %257 = vector.load %arg12[%c8_217, %c64_218] : memref<48x320xf32, #tpu.memory_space<vmem>>, vector<4x64xf32>
    tpu.vector_store %arg12[%c8_217, %c64_218], %256 {strides = array<i32>} : memref<48x320xf32, #tpu.memory_space<vmem>>, vector<4x64xf32>,
    %258 = vector.extract_strided_slice %233 {offsets = [18, 0], sizes = [4, 64], strides = [1, 1]} : vector<96x64xf32> to vector<4x64xf32>
    %c8_219 = arith.constant 8 : index
    %c128_220 = arith.constant 128 : index
    %259 = vector.load %arg12[%c8_219, %c128_220] : memref<48x320xf32, #tpu.memory_space<vmem>>, vector<4x64xf32>
    tpu.vector_store %arg12[%c8_219, %c128_220], %258 {strides = array<i32>} : memref<48x320xf32, #tpu.memory_space<vmem>>, vector<4x64xf32>,
    %260 = vector.extract_strided_slice %233 {offsets = [19, 0], sizes = [4, 64], strides = [1, 1]} : vector<96x64xf32> to vector<4x64xf32>
    %c8_221 = arith.constant 8 : index
    %c192_222 = arith.constant 192 : index
    %261 = vector.load %arg12[%c8_221, %c192_222] : memref<48x320xf32, #tpu.memory_space<vmem>>, vector<4x64xf32>
    tpu.vector_store %arg12[%c8_221, %c192_222], %260 {strides = array<i32>} : memref<48x320xf32, #tpu.memory_space<vmem>>, vector<4x64xf32>,
    %262 = vector.extract_strided_slice %233 {offsets = [20, 0], sizes = [4, 64], strides = [1, 1]} : vector<96x64xf32> to vector<4x64xf32>
    %c8_223 = arith.constant 8 : index
    %c256_224 = arith.constant 256 : index
    %263 = vector.load %arg12[%c8_223, %c256_224] : memref<48x320xf32, #tpu.memory_space<vmem>>, vector<4x64xf32>
    tpu.vector_store %arg12[%c8_223, %c256_224], %262 {strides = array<i32>} : memref<48x320xf32, #tpu.memory_space<vmem>>, vector<4x64xf32>,
    %264 = vector.extract_strided_slice %233 {offsets = [24, 0], sizes = [4, 64], strides = [1, 1]} : vector<96x64xf32> to vector<4x64xf32>
    %c12 = arith.constant 12 : index
    %c0_225 = arith.constant 0 : index
    %265 = vector.load %arg12[%c12, %c0_225] : memref<48x320xf32, #tpu.memory_space<vmem>>, vector<4x64xf32>
    tpu.vector_store %arg12[%c12, %c0_225], %264 {strides = array<i32>} : memref<48x320xf32, #tpu.memory_space<vmem>>, vector<4x64xf32>,
    %266 = vector.extract_strided_slice %233 {offsets = [25, 0], sizes = [4, 64], strides = [1, 1]} : vector<96x64xf32> to vector<4x64xf32>
    %c12_226 = arith.constant 12 : index
    %c64_227 = arith.constant 64 : index
    %267 = vector.load %arg12[%c12_226, %c64_227] : memref<48x320xf32, #tpu.memory_space<vmem>>, vector<4x64xf32>
    tpu.vector_store %arg12[%c12_226, %c64_227], %266 {strides = array<i32>} : memref<48x320xf32, #tpu.memory_space<vmem>>, vector<4x64xf32>,
    %268 = vector.extract_strided_slice %233 {offsets = [26, 0], sizes = [4, 64], strides = [1, 1]} : vector<96x64xf32> to vector<4x64xf32>
    %c12_228 = arith.constant 12 : index
    %c128_229 = arith.constant 128 : index
    %269 = vector.load %arg12[%c12_228, %c128_229] : memref<48x320xf32, #tpu.memory_space<vmem>>, vector<4x64xf32>
    tpu.vector_store %arg12[%c12_228, %c128_229], %268 {strides = array<i32>} : memref<48x320xf32, #tpu.memory_space<vmem>>, vector<4x64xf32>,
    %270 = vector.extract_strided_slice %233 {offsets = [27, 0], sizes = [4, 64], strides = [1, 1]} : vector<96x64xf32> to vector<4x64xf32>
    %c12_230 = arith.constant 12 : index
    %c192_231 = arith.constant 192 : index
    %271 = vector.load %arg12[%c12_230, %c192_231] : memref<48x320xf32, #tpu.memory_space<vmem>>, vector<4x64xf32>
    tpu.vector_store %arg12[%c12_230, %c192_231], %270 {strides = array<i32>} : memref<48x320xf32, #tpu.memory_space<vmem>>, vector<4x64xf32>,
    %272 = vector.extract_strided_slice %233 {offsets = [28, 0], sizes = [4, 64], strides = [1, 1]} : vector<96x64xf32> to vector<4x64xf32>
    %c12_232 = arith.constant 12 : index
    %c256_233 = arith.constant 256 : index
    %273 = vector.load %arg12[%c12_232, %c256_233] : memref<48x320xf32, #tpu.memory_space<vmem>>, vector<4x64xf32>
    tpu.vector_store %arg12[%c12_232, %c256_233], %272 {strides = array<i32>} : memref<48x320xf32, #tpu.memory_space<vmem>>, vector<4x64xf32>,
    %274 = vector.extract_strided_slice %233 {offsets = [32, 0], sizes = [4, 64], strides = [1, 1]} : vector<96x64xf32> to vector<4x64xf32>
    %c16_234 = arith.constant 16 : index
    %c0_235 = arith.constant 0 : index
    %275 = vector.load %arg12[%c16_234, %c0_235] : memref<48x320xf32, #tpu.memory_space<vmem>>, vector<4x64xf32>
    tpu.vector_store %arg12[%c16_234, %c0_235], %274 {strides = array<i32>} : memref<48x320xf32, #tpu.memory_space<vmem>>, vector<4x64xf32>,
    %276 = vector.extract_strided_slice %233 {offsets = [33, 0], sizes = [4, 64], strides = [1, 1]} : vector<96x64xf32> to vector<4x64xf32>
    %c16_236 = arith.constant 16 : index
    %c64_237 = arith.constant 64 : index
    %277 = vector.load %arg12[%c16_236, %c64_237] : memref<48x320xf32, #tpu.memory_space<vmem>>, vector<4x64xf32>
    tpu.vector_store %arg12[%c16_236, %c64_237], %276 {strides = array<i32>} : memref<48x320xf32, #tpu.memory_space<vmem>>, vector<4x64xf32>,
    %278 = vector.extract_strided_slice %233 {offsets = [34, 0], sizes = [4, 64], strides = [1, 1]} : vector<96x64xf32> to vector<4x64xf32>
    %c16_238 = arith.constant 16 : index
    %c128_239 = arith.constant 128 : index
    %279 = vector.load %arg12[%c16_238, %c128_239] : memref<48x320xf32, #tpu.memory_space<vmem>>, vector<4x64xf32>
    tpu.vector_store %arg12[%c16_238, %c128_239], %278 {strides = array<i32>} : memref<48x320xf32, #tpu.memory_space<vmem>>, vector<4x64xf32>,
    %280 = vector.extract_strided_slice %233 {offsets = [35, 0], sizes = [4, 64], strides = [1, 1]} : vector<96x64xf32> to vector<4x64xf32>
    %c16_240 = arith.constant 16 : index
    %c192_241 = arith.constant 192 : index
    %281 = vector.load %arg12[%c16_240, %c192_241] : memref<48x320xf32, #tpu.memory_space<vmem>>, vector<4x64xf32>
    tpu.vector_store %arg12[%c16_240, %c192_241], %280 {strides = array<i32>} : memref<48x320xf32, #tpu.memory_space<vmem>>, vector<4x64xf32>,
    %282 = vector.extract_strided_slice %233 {offsets = [36, 0], sizes = [4, 64], strides = [1, 1]} : vector<96x64xf32> to vector<4x64xf32>
    %c16_242 = arith.constant 16 : index
    %c256_243 = arith.constant 256 : index
    %283 = vector.load %arg12[%c16_242, %c256_243] : memref<48x320xf32, #tpu.memory_space<vmem>>, vector<4x64xf32>
    tpu.vector_store %arg12[%c16_242, %c256_243], %282 {strides = array<i32>} : memref<48x320xf32, #tpu.memory_space<vmem>>, vector<4x64xf32>,
    %284 = vector.extract_strided_slice %233 {offsets = [40, 0], sizes = [4, 64], strides = [1, 1]} : vector<96x64xf32> to vector<4x64xf32>
    %c20 = arith.constant 20 : index
    %c0_244 = arith.constant 0 : index
    %285 = vector.load %arg12[%c20, %c0_244] : memref<48x320xf32, #tpu.memory_space<vmem>>, vector<4x64xf32>
    tpu.vector_store %arg12[%c20, %c0_244], %284 {strides = array<i32>} : memref<48x320xf32, #tpu.memory_space<vmem>>, vector<4x64xf32>,
    %286 = vector.extract_strided_slice %233 {offsets = [41, 0], sizes = [4, 64], strides = [1, 1]} : vector<96x64xf32> to vector<4x64xf32>
    %c20_245 = arith.constant 20 : index
    %c64_246 = arith.constant 64 : index
    %287 = vector.load %arg12[%c20_245, %c64_246] : memref<48x320xf32, #tpu.memory_space<vmem>>, vector<4x64xf32>
    tpu.vector_store %arg12[%c20_245, %c64_246], %286 {strides = array<i32>} : memref<48x320xf32, #tpu.memory_space<vmem>>, vector<4x64xf32>,
    %288 = vector.extract_strided_slice %233 {offsets = [42, 0], sizes = [4, 64], strides = [1, 1]} : vector<96x64xf32> to vector<4x64xf32>
    %c20_247 = arith.constant 20 : index
    %c128_248 = arith.constant 128 : index
    %289 = vector.load %arg12[%c20_247, %c128_248] : memref<48x320xf32, #tpu.memory_space<vmem>>, vector<4x64xf32>
    tpu.vector_store %arg12[%c20_247, %c128_248], %288 {strides = array<i32>} : memref<48x320xf32, #tpu.memory_space<vmem>>, vector<4x64xf32>,
    %290 = vector.extract_strided_slice %233 {offsets = [43, 0], sizes = [4, 64], strides = [1, 1]} : vector<96x64xf32> to vector<4x64xf32>
    %c20_249 = arith.constant 20 : index
    %c192_250 = arith.constant 192 : index
    %291 = vector.load %arg12[%c20_249, %c192_250] : memref<48x320xf32, #tpu.memory_space<vmem>>, vector<4x64xf32>
    tpu.vector_store %arg12[%c20_249, %c192_250], %290 {strides = array<i32>} : memref<48x320xf32, #tpu.memory_space<vmem>>, vector<4x64xf32>,
    %292 = vector.extract_strided_slice %233 {offsets = [44, 0], sizes = [4, 64], strides = [1, 1]} : vector<96x64xf32> to vector<4x64xf32>
    %c20_251 = arith.constant 20 : index
    %c256_252 = arith.constant 256 : index
    %293 = vector.load %arg12[%c20_251, %c256_252] : memref<48x320xf32, #tpu.memory_space<vmem>>, vector<4x64xf32>
    tpu.vector_store %arg12[%c20_251, %c256_252], %292 {strides = array<i32>} : memref<48x320xf32, #tpu.memory_space<vmem>>, vector<4x64xf32>,
    %294 = vector.extract_strided_slice %233 {offsets = [48, 0], sizes = [4, 64], strides = [1, 1]} : vector<96x64xf32> to vector<4x64xf32>
    %c24_253 = arith.constant 24 : index
    %c0_254 = arith.constant 0 : index
    %295 = vector.load %arg12[%c24_253, %c0_254] : memref<48x320xf32, #tpu.memory_space<vmem>>, vector<4x64xf32>
    tpu.vector_store %arg12[%c24_253, %c0_254], %294 {strides = array<i32>} : memref<48x320xf32, #tpu.memory_space<vmem>>, vector<4x64xf32>,
    %296 = vector.extract_strided_slice %233 {offsets = [49, 0], sizes = [4, 64], strides = [1, 1]} : vector<96x64xf32> to vector<4x64xf32>
    %c24_255 = arith.constant 24 : index
    %c64_256 = arith.constant 64 : index
    %297 = vector.load %arg12[%c24_255, %c64_256] : memref<48x320xf32, #tpu.memory_space<vmem>>, vector<4x64xf32>
    tpu.vector_store %arg12[%c24_255, %c64_256], %296 {strides = array<i32>} : memref<48x320xf32, #tpu.memory_space<vmem>>, vector<4x64xf32>,
    %298 = vector.extract_strided_slice %233 {offsets = [50, 0], sizes = [4, 64], strides = [1, 1]} : vector<96x64xf32> to vector<4x64xf32>
    %c24_257 = arith.constant 24 : index
    %c128_258 = arith.constant 128 : index
    %299 = vector.load %arg12[%c24_257, %c128_258] : memref<48x320xf32, #tpu.memory_space<vmem>>, vector<4x64xf32>
    tpu.vector_store %arg12[%c24_257, %c128_258], %298 {strides = array<i32>} : memref<48x320xf32, #tpu.memory_space<vmem>>, vector<4x64xf32>,
    %300 = vector.extract_strided_slice %233 {offsets = [51, 0], sizes = [4, 64], strides = [1, 1]} : vector<96x64xf32> to vector<4x64xf32>
    %c24_259 = arith.constant 24 : index
    %c192_260 = arith.constant 192 : index
    %301 = vector.load %arg12[%c24_259, %c192_260] : memref<48x320xf32, #tpu.memory_space<vmem>>, vector<4x64xf32>
    tpu.vector_store %arg12[%c24_259, %c192_260], %300 {strides = array<i32>} : memref<48x320xf32, #tpu.memory_space<vmem>>, vector<4x64xf32>,
    %302 = vector.extract_strided_slice %233 {offsets = [52, 0], sizes = [4, 64], strides = [1, 1]} : vector<96x64xf32> to vector<4x64xf32>
    %c24_261 = arith.constant 24 : index
    %c256_262 = arith.constant 256 : index
    %303 = vector.load %arg12[%c24_261, %c256_262] : memref<48x320xf32, #tpu.memory_space<vmem>>, vector<4x64xf32>
    tpu.vector_store %arg12[%c24_261, %c256_262], %302 {strides = array<i32>} : memref<48x320xf32, #tpu.memory_space<vmem>>, vector<4x64xf32>,
    %304 = vector.extract_strided_slice %233 {offsets = [56, 0], sizes = [4, 64], strides = [1, 1]} : vector<96x64xf32> to vector<4x64xf32>
    %c28 = arith.constant 28 : index
    %c0_263 = arith.constant 0 : index
    %305 = vector.load %arg12[%c28, %c0_263] : memref<48x320xf32, #tpu.memory_space<vmem>>, vector<4x64xf32>
    tpu.vector_store %arg12[%c28, %c0_263], %304 {strides = array<i32>} : memref<48x320xf32, #tpu.memory_space<vmem>>, vector<4x64xf32>,
    %306 = vector.extract_strided_slice %233 {offsets = [57, 0], sizes = [4, 64], strides = [1, 1]} : vector<96x64xf32> to vector<4x64xf32>
    %c28_264 = arith.constant 28 : index
    %c64_265 = arith.constant 64 : index
    %307 = vector.load %arg12[%c28_264, %c64_265] : memref<48x320xf32, #tpu.memory_space<vmem>>, vector<4x64xf32>
    tpu.vector_store %arg12[%c28_264, %c64_265], %306 {strides = array<i32>} : memref<48x320xf32, #tpu.memory_space<vmem>>, vector<4x64xf32>,
    %308 = vector.extract_strided_slice %233 {offsets = [58, 0], sizes = [4, 64], strides = [1, 1]} : vector<96x64xf32> to vector<4x64xf32>
    %c28_266 = arith.constant 28 : index
    %c128_267 = arith.constant 128 : index
    %309 = vector.load %arg12[%c28_266, %c128_267] : memref<48x320xf32, #tpu.memory_space<vmem>>, vector<4x64xf32>
    tpu.vector_store %arg12[%c28_266, %c128_267], %308 {strides = array<i32>} : memref<48x320xf32, #tpu.memory_space<vmem>>, vector<4x64xf32>,
    %310 = vector.extract_strided_slice %233 {offsets = [59, 0], sizes = [4, 64], strides = [1, 1]} : vector<96x64xf32> to vector<4x64xf32>
    %c28_268 = arith.constant 28 : index
    %c192_269 = arith.constant 192 : index
    %311 = vector.load %arg12[%c28_268, %c192_269] : memref<48x320xf32, #tpu.memory_space<vmem>>, vector<4x64xf32>
    tpu.vector_store %arg12[%c28_268, %c192_269], %310 {strides = array<i32>} : memref<48x320xf32, #tpu.memory_space<vmem>>, vector<4x64xf32>,
    %312 = vector.extract_strided_slice %233 {offsets = [60, 0], sizes = [4, 64], strides = [1, 1]} : vector<96x64xf32> to vector<4x64xf32>
    %c28_270 = arith.constant 28 : index
    %c256_271 = arith.constant 256 : index
    %313 = vector.load %arg12[%c28_270, %c256_271] : memref<48x320xf32, #tpu.memory_space<vmem>>, vector<4x64xf32>
    tpu.vector_store %arg12[%c28_270, %c256_271], %312 {strides = array<i32>} : memref<48x320xf32, #tpu.memory_space<vmem>>, vector<4x64xf32>,
    %314 = vector.extract_strided_slice %233 {offsets = [64, 0], sizes = [4, 64], strides = [1, 1]} : vector<96x64xf32> to vector<4x64xf32>
    %c32_272 = arith.constant 32 : index
    %c0_273 = arith.constant 0 : index
    %315 = vector.load %arg12[%c32_272, %c0_273] : memref<48x320xf32, #tpu.memory_space<vmem>>, vector<4x64xf32>
    tpu.vector_store %arg12[%c32_272, %c0_273], %314 {strides = array<i32>} : memref<48x320xf32, #tpu.memory_space<vmem>>, vector<4x64xf32>,
    %316 = vector.extract_strided_slice %233 {offsets = [65, 0], sizes = [4, 64], strides = [1, 1]} : vector<96x64xf32> to vector<4x64xf32>
    %c32_274 = arith.constant 32 : index
    %c64_275 = arith.constant 64 : index
    %317 = vector.load %arg12[%c32_274, %c64_275] : memref<48x320xf32, #tpu.memory_space<vmem>>, vector<4x64xf32>
    tpu.vector_store %arg12[%c32_274, %c64_275], %316 {strides = array<i32>} : memref<48x320xf32, #tpu.memory_space<vmem>>, vector<4x64xf32>,
    %318 = vector.extract_strided_slice %233 {offsets = [66, 0], sizes = [4, 64], strides = [1, 1]} : vector<96x64xf32> to vector<4x64xf32>
    %c32_276 = arith.constant 32 : index
    %c128_277 = arith.constant 128 : index
    %319 = vector.load %arg12[%c32_276, %c128_277] : memref<48x320xf32, #tpu.memory_space<vmem>>, vector<4x64xf32>
    tpu.vector_store %arg12[%c32_276, %c128_277], %318 {strides = array<i32>} : memref<48x320xf32, #tpu.memory_space<vmem>>, vector<4x64xf32>,
    %320 = vector.extract_strided_slice %233 {offsets = [67, 0], sizes = [4, 64], strides = [1, 1]} : vector<96x64xf32> to vector<4x64xf32>
    %c32_278 = arith.constant 32 : index
    %c192_279 = arith.constant 192 : index
    %321 = vector.load %arg12[%c32_278, %c192_279] : memref<48x320xf32, #tpu.memory_space<vmem>>, vector<4x64xf32>
    tpu.vector_store %arg12[%c32_278, %c192_279], %320 {strides = array<i32>} : memref<48x320xf32, #tpu.memory_space<vmem>>, vector<4x64xf32>,
    %322 = vector.extract_strided_slice %233 {offsets = [68, 0], sizes = [4, 64], strides = [1, 1]} : vector<96x64xf32> to vector<4x64xf32>
    %c32_280 = arith.constant 32 : index
    %c256_281 = arith.constant 256 : index
    %323 = vector.load %arg12[%c32_280, %c256_281] : memref<48x320xf32, #tpu.memory_space<vmem>>, vector<4x64xf32>
    tpu.vector_store %arg12[%c32_280, %c256_281], %322 {strides = array<i32>} : memref<48x320xf32, #tpu.memory_space<vmem>>, vector<4x64xf32>,
    %324 = vector.extract_strided_slice %233 {offsets = [72, 0], sizes = [4, 64], strides = [1, 1]} : vector<96x64xf32> to vector<4x64xf32>
    %c36 = arith.constant 36 : index
    %c0_282 = arith.constant 0 : index
    %325 = vector.load %arg12[%c36, %c0_282] : memref<48x320xf32, #tpu.memory_space<vmem>>, vector<4x64xf32>
    tpu.vector_store %arg12[%c36, %c0_282], %324 {strides = array<i32>} : memref<48x320xf32, #tpu.memory_space<vmem>>, vector<4x64xf32>,
    %326 = vector.extract_strided_slice %233 {offsets = [73, 0], sizes = [4, 64], strides = [1, 1]} : vector<96x64xf32> to vector<4x64xf32>
    %c36_283 = arith.constant 36 : index
    %c64_284 = arith.constant 64 : index
    %327 = vector.load %arg12[%c36_283, %c64_284] : memref<48x320xf32, #tpu.memory_space<vmem>>, vector<4x64xf32>
    tpu.vector_store %arg12[%c36_283, %c64_284], %326 {strides = array<i32>} : memref<48x320xf32, #tpu.memory_space<vmem>>, vector<4x64xf32>,
    %328 = vector.extract_strided_slice %233 {offsets = [74, 0], sizes = [4, 64], strides = [1, 1]} : vector<96x64xf32> to vector<4x64xf32>
    %c36_285 = arith.constant 36 : index
    %c128_286 = arith.constant 128 : index
    %329 = vector.load %arg12[%c36_285, %c128_286] : memref<48x320xf32, #tpu.memory_space<vmem>>, vector<4x64xf32>
    tpu.vector_store %arg12[%c36_285, %c128_286], %328 {strides = array<i32>} : memref<48x320xf32, #tpu.memory_space<vmem>>, vector<4x64xf32>,
    %330 = vector.extract_strided_slice %233 {offsets = [75, 0], sizes = [4, 64], strides = [1, 1]} : vector<96x64xf32> to vector<4x64xf32>
    %c36_287 = arith.constant 36 : index
    %c192_288 = arith.constant 192 : index
    %331 = vector.load %arg12[%c36_287, %c192_288] : memref<48x320xf32, #tpu.memory_space<vmem>>, vector<4x64xf32>
    tpu.vector_store %arg12[%c36_287, %c192_288], %330 {strides = array<i32>} : memref<48x320xf32, #tpu.memory_space<vmem>>, vector<4x64xf32>,
    %332 = vector.extract_strided_slice %233 {offsets = [76, 0], sizes = [4, 64], strides = [1, 1]} : vector<96x64xf32> to vector<4x64xf32>
    %c36_289 = arith.constant 36 : index
    %c256_290 = arith.constant 256 : index
    %333 = vector.load %arg12[%c36_289, %c256_290] : memref<48x320xf32, #tpu.memory_space<vmem>>, vector<4x64xf32>
    tpu.vector_store %arg12[%c36_289, %c256_290], %332 {strides = array<i32>} : memref<48x320xf32, #tpu.memory_space<vmem>>, vector<4x64xf32>,
    %334 = vector.extract_strided_slice %233 {offsets = [80, 0], sizes = [4, 64], strides = [1, 1]} : vector<96x64xf32> to vector<4x64xf32>
    %c40_291 = arith.constant 40 : index
    %c0_292 = arith.constant 0 : index
    %335 = vector.load %arg12[%c40_291, %c0_292] : memref<48x320xf32, #tpu.memory_space<vmem>>, vector<4x64xf32>
    tpu.vector_store %arg12[%c40_291, %c0_292], %334 {strides = array<i32>} : memref<48x320xf32, #tpu.memory_space<vmem>>, vector<4x64xf32>,
    %336 = vector.extract_strided_slice %233 {offsets = [81, 0], sizes = [4, 64], strides = [1, 1]} : vector<96x64xf32> to vector<4x64xf32>
    %c40_293 = arith.constant 40 : index
    %c64_294 = arith.constant 64 : index
    %337 = vector.load %arg12[%c40_293, %c64_294] : memref<48x320xf32, #tpu.memory_space<vmem>>, vector<4x64xf32>
    tpu.vector_store %arg12[%c40_293, %c64_294], %336 {strides = array<i32>} : memref<48x320xf32, #tpu.memory_space<vmem>>, vector<4x64xf32>,
    %338 = vector.extract_strided_slice %233 {offsets = [82, 0], sizes = [4, 64], strides = [1, 1]} : vector<96x64xf32> to vector<4x64xf32>
    %c40_295 = arith.constant 40 : index
    %c128_296 = arith.constant 128 : index
    %339 = vector.load %arg12[%c40_295, %c128_296] : memref<48x320xf32, #tpu.memory_space<vmem>>, vector<4x64xf32>
    tpu.vector_store %arg12[%c40_295, %c128_296], %338 {strides = array<i32>} : memref<48x320xf32, #tpu.memory_space<vmem>>, vector<4x64xf32>,
    %340 = vector.extract_strided_slice %233 {offsets = [83, 0], sizes = [4, 64], strides = [1, 1]} : vector<96x64xf32> to vector<4x64xf32>
    %c40_297 = arith.constant 40 : index
    %c192_298 = arith.constant 192 : index
    %341 = vector.load %arg12[%c40_297, %c192_298] : memref<48x320xf32, #tpu.memory_space<vmem>>, vector<4x64xf32>
    tpu.vector_store %arg12[%c40_297, %c192_298], %340 {strides = array<i32>} : memref<48x320xf32, #tpu.memory_space<vmem>>, vector<4x64xf32>,
    %342 = vector.extract_strided_slice %233 {offsets = [84, 0], sizes = [4, 64], strides = [1, 1]} : vector<96x64xf32> to vector<4x64xf32>
    %c40_299 = arith.constant 40 : index
    %c256_300 = arith.constant 256 : index
    %343 = vector.load %arg12[%c40_299, %c256_300] : memref<48x320xf32, #tpu.memory_space<vmem>>, vector<4x64xf32>
    tpu.vector_store %arg12[%c40_299, %c256_300], %342 {strides = array<i32>} : memref<48x320xf32, #tpu.memory_space<vmem>>, vector<4x64xf32>,
    %344 = vector.extract_strided_slice %233 {offsets = [88, 0], sizes = [4, 64], strides = [1, 1]} : vector<96x64xf32> to vector<4x64xf32>
    %c44 = arith.constant 44 : index
    %c0_301 = arith.constant 0 : index
    %345 = vector.load %arg12[%c44, %c0_301] : memref<48x320xf32, #tpu.memory_space<vmem>>, vector<4x64xf32>
    tpu.vector_store %arg12[%c44, %c0_301], %344 {strides = array<i32>} : memref<48x320xf32, #tpu.memory_space<vmem>>, vector<4x64xf32>,
    %346 = vector.extract_strided_slice %233 {offsets = [89, 0], sizes = [4, 64], strides = [1, 1]} : vector<96x64xf32> to vector<4x64xf32>
    %c44_302 = arith.constant 44 : index
    %c64_303 = arith.constant 64 : index
    %347 = vector.load %arg12[%c44_302, %c64_303] : memref<48x320xf32, #tpu.memory_space<vmem>>, vector<4x64xf32>
    tpu.vector_store %arg12[%c44_302, %c64_303], %346 {strides = array<i32>} : memref<48x320xf32, #tpu.memory_space<vmem>>, vector<4x64xf32>,
    %348 = vector.extract_strided_slice %233 {offsets = [90, 0], sizes = [4, 64], strides = [1, 1]} : vector<96x64xf32> to vector<4x64xf32>
    %c44_304 = arith.constant 44 : index
    %c128_305 = arith.constant 128 : index
    %349 = vector.load %arg12[%c44_304, %c128_305] : memref<48x320xf32, #tpu.memory_space<vmem>>, vector<4x64xf32>
    tpu.vector_store %arg12[%c44_304, %c128_305], %348 {strides = array<i32>} : memref<48x320xf32, #tpu.memory_space<vmem>>, vector<4x64xf32>,
    %350 = vector.extract_strided_slice %233 {offsets = [91, 0], sizes = [4, 64], strides = [1, 1]} : vector<96x64xf32> to vector<4x64xf32>
    %c44_306 = arith.constant 44 : index
    %c192_307 = arith.constant 192 : index
    %351 = vector.load %arg12[%c44_306, %c192_307] : memref<48x320xf32, #tpu.memory_space<vmem>>, vector<4x64xf32>
    tpu.vector_store %arg12[%c44_306, %c192_307], %350 {strides = array<i32>} : memref<48x320xf32, #tpu.memory_space<vmem>>, vector<4x64xf32>,
    %352 = vector.extract_strided_slice %233 {offsets = [92, 0], sizes = [4, 64], strides = [1, 1]} : vector<96x64xf32> to vector<4x64xf32>
    %c44_308 = arith.constant 44 : index
    %c256_309 = arith.constant 256 : index
    %353 = vector.load %arg12[%c44_308, %c256_309] : memref<48x320xf32, #tpu.memory_space<vmem>>, vector<4x64xf32>
    tpu.vector_store %arg12[%c44_308, %c256_309], %352 {strides = array<i32>} : memref<48x320xf32, #tpu.memory_space<vmem>>, vector<4x64xf32>,
    %cst_310 = arith.constant 0.000000e+00 : f32
    %354 = vector.broadcast %cst_310 : f32 to vector<32x32xf32>
    %c0_311 = arith.constant 0 : index
    %c0_312 = arith.constant 0 : index
    %355 = vector.load %arg12[%c0_311, %c0_312] : memref<48x320xf32, #tpu.memory_space<vmem>>, vector<32x320xf32>
    %356 = arith.truncf %355 : vector<32x320xf32> to vector<32x320xbf16>
    %c0_313 = arith.constant 0 : index
    %c0_314 = arith.constant 0 : index
    %c0_315 = arith.constant 0 : index
    %357 = vector.load %arg6[%c0_313, %c0_314, %c0_315] : memref<5x320x32xbf16, #tpu.memory_space<vmem>>, vector<1x320x32xbf16>
    %358 = vector.shape_cast %357 : vector<1x320x32xbf16> to vector<320x32xbf16>
    %cst_316 = arith.constant dense<0.000000e+00> : vector<32x32xf32>
    %359 = tpu.matmul %356, %358, %cst_316 {dimension_numbers = #tpu.dot_dimension_numbers<[1], [0], [0], [1], [0, 0, 1, 1], [], []>} : vector<32x320xbf16>, vector<320x32xbf16>, vector<32x32xf32> -> vector<32x32xf32>
    %360 = arith.addf %354, %359 : vector<32x32xf32>
    %c4_317 = arith.constant 4 : index
    %c0_318 = arith.constant 0 : index
    %361 = vector.load %arg12[%c4_317, %c0_318] : memref<48x320xf32, #tpu.memory_space<vmem>>, vector<32x320xf32>
    %362 = arith.truncf %361 : vector<32x320xf32> to vector<32x320xbf16>
    %c1_319 = arith.constant 1 : index
    %c0_320 = arith.constant 0 : index
    %c0_321 = arith.constant 0 : index
    %363 = vector.load %arg6[%c1_319, %c0_320, %c0_321] : memref<5x320x32xbf16, #tpu.memory_space<vmem>>, vector<1x320x32xbf16>
    %364 = vector.shape_cast %363 : vector<1x320x32xbf16> to vector<320x32xbf16>
    %cst_322 = arith.constant dense<0.000000e+00> : vector<32x32xf32>
    %365 = tpu.matmul %362, %364, %cst_322 {dimension_numbers = #tpu.dot_dimension_numbers<[1], [0], [0], [1], [0, 0, 1, 1], [], []>} : vector<32x320xbf16>, vector<320x32xbf16>, vector<32x32xf32> -> vector<32x32xf32>
    %366 = arith.addf %360, %365 : vector<32x32xf32>
    %c8_323 = arith.constant 8 : index
    %c0_324 = arith.constant 0 : index
    %367 = vector.load %arg12[%c8_323, %c0_324] : memref<48x320xf32, #tpu.memory_space<vmem>>, vector<32x320xf32>
    %368 = arith.truncf %367 : vector<32x320xf32> to vector<32x320xbf16>
    %c2_325 = arith.constant 2 : index
    %c0_326 = arith.constant 0 : index
    %c0_327 = arith.constant 0 : index
    %369 = vector.load %arg6[%c2_325, %c0_326, %c0_327] : memref<5x320x32xbf16, #tpu.memory_space<vmem>>, vector<1x320x32xbf16>
    %370 = vector.shape_cast %369 : vector<1x320x32xbf16> to vector<320x32xbf16>
    %cst_328 = arith.constant dense<0.000000e+00> : vector<32x32xf32>
    %371 = tpu.matmul %368, %370, %cst_328 {dimension_numbers = #tpu.dot_dimension_numbers<[1], [0], [0], [1], [0, 0, 1, 1], [], []>} : vector<32x320xbf16>, vector<320x32xbf16>, vector<32x32xf32> -> vector<32x32xf32>
    %372 = arith.addf %366, %371 : vector<32x32xf32>
    %c12_329 = arith.constant 12 : index
    %c0_330 = arith.constant 0 : index
    %373 = vector.load %arg12[%c12_329, %c0_330] : memref<48x320xf32, #tpu.memory_space<vmem>>, vector<32x320xf32>
    %374 = arith.truncf %373 : vector<32x320xf32> to vector<32x320xbf16>
    %c3_331 = arith.constant 3 : index
    %c0_332 = arith.constant 0 : index
    %c0_333 = arith.constant 0 : index
    %375 = vector.load %arg6[%c3_331, %c0_332, %c0_333] : memref<5x320x32xbf16, #tpu.memory_space<vmem>>, vector<1x320x32xbf16>
    %376 = vector.shape_cast %375 : vector<1x320x32xbf16> to vector<320x32xbf16>
    %cst_334 = arith.constant dense<0.000000e+00> : vector<32x32xf32>
    %377 = tpu.matmul %374, %376, %cst_334 {dimension_numbers = #tpu.dot_dimension_numbers<[1], [0], [0], [1], [0, 0, 1, 1], [], []>} : vector<32x320xbf16>, vector<320x32xbf16>, vector<32x32xf32> -> vector<32x32xf32>
    %378 = arith.addf %372, %377 : vector<32x32xf32>
    %c16_335 = arith.constant 16 : index
    %c0_336 = arith.constant 0 : index
    %379 = vector.load %arg12[%c16_335, %c0_336] : memref<48x320xf32, #tpu.memory_space<vmem>>, vector<32x320xf32>
    %380 = arith.truncf %379 : vector<32x320xf32> to vector<32x320xbf16>
    %c4_337 = arith.constant 4 : index
    %c0_338 = arith.constant 0 : index
    %c0_339 = arith.constant 0 : index
    %381 = vector.load %arg6[%c4_337, %c0_338, %c0_339] : memref<5x320x32xbf16, #tpu.memory_space<vmem>>, vector<1x320x32xbf16>
    %382 = vector.shape_cast %381 : vector<1x320x32xbf16> to vector<320x32xbf16>
    %cst_340 = arith.constant dense<0.000000e+00> : vector<32x32xf32>
    %383 = tpu.matmul %380, %382, %cst_340 {dimension_numbers = #tpu.dot_dimension_numbers<[1], [0], [0], [1], [0, 0, 1, 1], [], []>} : vector<32x320xbf16>, vector<320x32xbf16>, vector<32x32xf32> -> vector<32x32xf32>
    %384 = arith.addf %378, %383 : vector<32x32xf32>
    %c0_341 = arith.constant 0 : index
    %c0_342 = arith.constant 0 : index
    %385 = vector.load %arg7[%c0_341, %c0_342] : memref<1x32xf32, #tpu.memory_space<vmem>>, vector<1x32xf32>
    %386 = vector.broadcast %385 : vector<1x32xf32> to vector<32x32xf32>
    %387 = arith.addf %384, %386 : vector<32x32xf32>
    %cst_343 = arith.constant 0.000000e+00 : f32
    %388 = vector.broadcast %cst_343 : f32 to vector<32x32xf32>
    %389 = arith.maximumf %387, %388 : vector<32x32xf32>
    %390 = vector.extract_strided_slice %389 {offsets = [0, 0], sizes = [3, 32], strides = [1, 1]} : vector<32x32xf32> to vector<3x32xf32>
    %c0_344 = arith.constant 0 : index
    %c0_345 = arith.constant 0 : index
    %391 = vector.load %arg13[%c0_344, %c0_345] : memref<24x64xf32, #tpu.memory_space<vmem>>, vector<3x32xf32>
    tpu.vector_store %arg13[%c0_344, %c0_345], %390 {strides = array<i32>} : memref<24x64xf32, #tpu.memory_space<vmem>>, vector<3x32xf32>,
    %392 = vector.extract_strided_slice %389 {offsets = [1, 0], sizes = [3, 32], strides = [1, 1]} : vector<32x32xf32> to vector<3x32xf32>
    %c0_346 = arith.constant 0 : index
    %c32_347 = arith.constant 32 : index
    %393 = vector.load %arg13[%c0_346, %c32_347] : memref<24x64xf32, #tpu.memory_space<vmem>>, vector<3x32xf32>
    tpu.vector_store %arg13[%c0_346, %c32_347], %392 {strides = array<i32>} : memref<24x64xf32, #tpu.memory_space<vmem>>, vector<3x32xf32>,
    %394 = vector.extract_strided_slice %389 {offsets = [4, 0], sizes = [3, 32], strides = [1, 1]} : vector<32x32xf32> to vector<3x32xf32>
    %c3_348 = arith.constant 3 : index
    %c0_349 = arith.constant 0 : index
    %395 = vector.load %arg13[%c3_348, %c0_349] : memref<24x64xf32, #tpu.memory_space<vmem>>, vector<3x32xf32>
    tpu.vector_store %arg13[%c3_348, %c0_349], %394 {strides = array<i32>} : memref<24x64xf32, #tpu.memory_space<vmem>>, vector<3x32xf32>,
    %396 = vector.extract_strided_slice %389 {offsets = [5, 0], sizes = [3, 32], strides = [1, 1]} : vector<32x32xf32> to vector<3x32xf32>
    %c3_350 = arith.constant 3 : index
    %c32_351 = arith.constant 32 : index
    %397 = vector.load %arg13[%c3_350, %c32_351] : memref<24x64xf32, #tpu.memory_space<vmem>>, vector<3x32xf32>
    tpu.vector_store %arg13[%c3_350, %c32_351], %396 {strides = array<i32>} : memref<24x64xf32, #tpu.memory_space<vmem>>, vector<3x32xf32>,
    %398 = vector.extract_strided_slice %389 {offsets = [8, 0], sizes = [3, 32], strides = [1, 1]} : vector<32x32xf32> to vector<3x32xf32>
    %c6 = arith.constant 6 : index
    %c0_352 = arith.constant 0 : index
    %399 = vector.load %arg13[%c6, %c0_352] : memref<24x64xf32, #tpu.memory_space<vmem>>, vector<3x32xf32>
    tpu.vector_store %arg13[%c6, %c0_352], %398 {strides = array<i32>} : memref<24x64xf32, #tpu.memory_space<vmem>>, vector<3x32xf32>,
    %400 = vector.extract_strided_slice %389 {offsets = [9, 0], sizes = [3, 32], strides = [1, 1]} : vector<32x32xf32> to vector<3x32xf32>
    %c6_353 = arith.constant 6 : index
    %c32_354 = arith.constant 32 : index
    %401 = vector.load %arg13[%c6_353, %c32_354] : memref<24x64xf32, #tpu.memory_space<vmem>>, vector<3x32xf32>
    tpu.vector_store %arg13[%c6_353, %c32_354], %400 {strides = array<i32>} : memref<24x64xf32, #tpu.memory_space<vmem>>, vector<3x32xf32>,
    %402 = vector.extract_strided_slice %389 {offsets = [12, 0], sizes = [3, 32], strides = [1, 1]} : vector<32x32xf32> to vector<3x32xf32>
    %c9 = arith.constant 9 : index
    %c0_355 = arith.constant 0 : index
    %403 = vector.load %arg13[%c9, %c0_355] : memref<24x64xf32, #tpu.memory_space<vmem>>, vector<3x32xf32>
    tpu.vector_store %arg13[%c9, %c0_355], %402 {strides = array<i32>} : memref<24x64xf32, #tpu.memory_space<vmem>>, vector<3x32xf32>,
    %404 = vector.extract_strided_slice %389 {offsets = [13, 0], sizes = [3, 32], strides = [1, 1]} : vector<32x32xf32> to vector<3x32xf32>
    %c9_356 = arith.constant 9 : index
    %c32_357 = arith.constant 32 : index
    %405 = vector.load %arg13[%c9_356, %c32_357] : memref<24x64xf32, #tpu.memory_space<vmem>>, vector<3x32xf32>
    tpu.vector_store %arg13[%c9_356, %c32_357], %404 {strides = array<i32>} : memref<24x64xf32, #tpu.memory_space<vmem>>, vector<3x32xf32>,
    %406 = vector.extract_strided_slice %389 {offsets = [16, 0], sizes = [3, 32], strides = [1, 1]} : vector<32x32xf32> to vector<3x32xf32>
    %c12_358 = arith.constant 12 : index
    %c0_359 = arith.constant 0 : index
    %407 = vector.load %arg13[%c12_358, %c0_359] : memref<24x64xf32, #tpu.memory_space<vmem>>, vector<3x32xf32>
    tpu.vector_store %arg13[%c12_358, %c0_359], %406 {strides = array<i32>} : memref<24x64xf32, #tpu.memory_space<vmem>>, vector<3x32xf32>,
    %408 = vector.extract_strided_slice %389 {offsets = [17, 0], sizes = [3, 32], strides = [1, 1]} : vector<32x32xf32> to vector<3x32xf32>
    %c12_360 = arith.constant 12 : index
    %c32_361 = arith.constant 32 : index
    %409 = vector.load %arg13[%c12_360, %c32_361] : memref<24x64xf32, #tpu.memory_space<vmem>>, vector<3x32xf32>
    tpu.vector_store %arg13[%c12_360, %c32_361], %408 {strides = array<i32>} : memref<24x64xf32, #tpu.memory_space<vmem>>, vector<3x32xf32>,
    %410 = vector.extract_strided_slice %389 {offsets = [20, 0], sizes = [3, 32], strides = [1, 1]} : vector<32x32xf32> to vector<3x32xf32>
    %c15 = arith.constant 15 : index
    %c0_362 = arith.constant 0 : index
    %411 = vector.load %arg13[%c15, %c0_362] : memref<24x64xf32, #tpu.memory_space<vmem>>, vector<3x32xf32>
    tpu.vector_store %arg13[%c15, %c0_362], %410 {strides = array<i32>} : memref<24x64xf32, #tpu.memory_space<vmem>>, vector<3x32xf32>,
    %412 = vector.extract_strided_slice %389 {offsets = [21, 0], sizes = [3, 32], strides = [1, 1]} : vector<32x32xf32> to vector<3x32xf32>
    %c15_363 = arith.constant 15 : index
    %c32_364 = arith.constant 32 : index
    %413 = vector.load %arg13[%c15_363, %c32_364] : memref<24x64xf32, #tpu.memory_space<vmem>>, vector<3x32xf32>
    tpu.vector_store %arg13[%c15_363, %c32_364], %412 {strides = array<i32>} : memref<24x64xf32, #tpu.memory_space<vmem>>, vector<3x32xf32>,
    %414 = vector.extract_strided_slice %389 {offsets = [24, 0], sizes = [3, 32], strides = [1, 1]} : vector<32x32xf32> to vector<3x32xf32>
    %c18 = arith.constant 18 : index
    %c0_365 = arith.constant 0 : index
    %415 = vector.load %arg13[%c18, %c0_365] : memref<24x64xf32, #tpu.memory_space<vmem>>, vector<3x32xf32>
    tpu.vector_store %arg13[%c18, %c0_365], %414 {strides = array<i32>} : memref<24x64xf32, #tpu.memory_space<vmem>>, vector<3x32xf32>,
    %416 = vector.extract_strided_slice %389 {offsets = [25, 0], sizes = [3, 32], strides = [1, 1]} : vector<32x32xf32> to vector<3x32xf32>
    %c18_366 = arith.constant 18 : index
    %c32_367 = arith.constant 32 : index
    %417 = vector.load %arg13[%c18_366, %c32_367] : memref<24x64xf32, #tpu.memory_space<vmem>>, vector<3x32xf32>
    tpu.vector_store %arg13[%c18_366, %c32_367], %416 {strides = array<i32>} : memref<24x64xf32, #tpu.memory_space<vmem>>, vector<3x32xf32>,
    %418 = vector.extract_strided_slice %389 {offsets = [28, 0], sizes = [3, 32], strides = [1, 1]} : vector<32x32xf32> to vector<3x32xf32>
    %c21 = arith.constant 21 : index
    %c0_368 = arith.constant 0 : index
    %419 = vector.load %arg13[%c21, %c0_368] : memref<24x64xf32, #tpu.memory_space<vmem>>, vector<3x32xf32>
    tpu.vector_store %arg13[%c21, %c0_368], %418 {strides = array<i32>} : memref<24x64xf32, #tpu.memory_space<vmem>>, vector<3x32xf32>,
    %420 = vector.extract_strided_slice %389 {offsets = [29, 0], sizes = [3, 32], strides = [1, 1]} : vector<32x32xf32> to vector<3x32xf32>
    %c21_369 = arith.constant 21 : index
    %c32_370 = arith.constant 32 : index
    %421 = vector.load %arg13[%c21_369, %c32_370] : memref<24x64xf32, #tpu.memory_space<vmem>>, vector<3x32xf32>
    tpu.vector_store %arg13[%c21_369, %c32_370], %420 {strides = array<i32>} : memref<24x64xf32, #tpu.memory_space<vmem>>, vector<3x32xf32>,
    %cst_371 = arith.constant 0.000000e+00 : f32
    %422 = vector.broadcast %cst_371 : f32 to vector<12x16xf32>
    %c0_372 = arith.constant 0 : index
    %c0_373 = arith.constant 0 : index
    %423 = vector.load %arg13[%c0_372, %c0_373] : memref<24x64xf32, #tpu.memory_space<vmem>>, vector<12x64xf32>
    %424 = arith.truncf %423 : vector<12x64xf32> to vector<12x64xbf16>
    %c0_374 = arith.constant 0 : index
    %c0_375 = arith.constant 0 : index
    %c0_376 = arith.constant 0 : index
    %425 = vector.load %arg8[%c0_374, %c0_375, %c0_376] : memref<5x64x16xbf16, #tpu.memory_space<vmem>>, vector<1x64x16xbf16>
    %426 = vector.shape_cast %425 : vector<1x64x16xbf16> to vector<64x16xbf16>
    %cst_377 = arith.constant dense<0.000000e+00> : vector<12x16xf32>
    %427 = tpu.matmul %424, %426, %cst_377 {dimension_numbers = #tpu.dot_dimension_numbers<[1], [0], [0], [1], [0, 0, 1, 1], [], []>} : vector<12x64xbf16>, vector<64x16xbf16>, vector<12x16xf32> -> vector<12x16xf32>
    %428 = arith.addf %422, %427 : vector<12x16xf32>
    %c3_378 = arith.constant 3 : index
    %c0_379 = arith.constant 0 : index
    %429 = vector.load %arg13[%c3_378, %c0_379] : memref<24x64xf32, #tpu.memory_space<vmem>>, vector<12x64xf32>
    %430 = arith.truncf %429 : vector<12x64xf32> to vector<12x64xbf16>
    %c1_380 = arith.constant 1 : index
    %c0_381 = arith.constant 0 : index
    %c0_382 = arith.constant 0 : index
    %431 = vector.load %arg8[%c1_380, %c0_381, %c0_382] : memref<5x64x16xbf16, #tpu.memory_space<vmem>>, vector<1x64x16xbf16>
    %432 = vector.shape_cast %431 : vector<1x64x16xbf16> to vector<64x16xbf16>
    %cst_383 = arith.constant dense<0.000000e+00> : vector<12x16xf32>
    %433 = tpu.matmul %430, %432, %cst_383 {dimension_numbers = #tpu.dot_dimension_numbers<[1], [0], [0], [1], [0, 0, 1, 1], [], []>} : vector<12x64xbf16>, vector<64x16xbf16>, vector<12x16xf32> -> vector<12x16xf32>
    %434 = arith.addf %428, %433 : vector<12x16xf32>
    %c6_384 = arith.constant 6 : index
    %c0_385 = arith.constant 0 : index
    %435 = vector.load %arg13[%c6_384, %c0_385] : memref<24x64xf32, #tpu.memory_space<vmem>>, vector<12x64xf32>
    %436 = arith.truncf %435 : vector<12x64xf32> to vector<12x64xbf16>
    %c2_386 = arith.constant 2 : index
    %c0_387 = arith.constant 0 : index
    %c0_388 = arith.constant 0 : index
    %437 = vector.load %arg8[%c2_386, %c0_387, %c0_388] : memref<5x64x16xbf16, #tpu.memory_space<vmem>>, vector<1x64x16xbf16>
    %438 = vector.shape_cast %437 : vector<1x64x16xbf16> to vector<64x16xbf16>
    %cst_389 = arith.constant dense<0.000000e+00> : vector<12x16xf32>
    %439 = tpu.matmul %436, %438, %cst_389 {dimension_numbers = #tpu.dot_dimension_numbers<[1], [0], [0], [1], [0, 0, 1, 1], [], []>} : vector<12x64xbf16>, vector<64x16xbf16>, vector<12x16xf32> -> vector<12x16xf32>
    %440 = arith.addf %434, %439 : vector<12x16xf32>
    %c9_390 = arith.constant 9 : index
    %c0_391 = arith.constant 0 : index
    %441 = vector.load %arg13[%c9_390, %c0_391] : memref<24x64xf32, #tpu.memory_space<vmem>>, vector<12x64xf32>
    %442 = arith.truncf %441 : vector<12x64xf32> to vector<12x64xbf16>
    %c3_392 = arith.constant 3 : index
    %c0_393 = arith.constant 0 : index
    %c0_394 = arith.constant 0 : index
    %443 = vector.load %arg8[%c3_392, %c0_393, %c0_394] : memref<5x64x16xbf16, #tpu.memory_space<vmem>>, vector<1x64x16xbf16>
    %444 = vector.shape_cast %443 : vector<1x64x16xbf16> to vector<64x16xbf16>
    %cst_395 = arith.constant dense<0.000000e+00> : vector<12x16xf32>
    %445 = tpu.matmul %442, %444, %cst_395 {dimension_numbers = #tpu.dot_dimension_numbers<[1], [0], [0], [1], [0, 0, 1, 1], [], []>} : vector<12x64xbf16>, vector<64x16xbf16>, vector<12x16xf32> -> vector<12x16xf32>
    %446 = arith.addf %440, %445 : vector<12x16xf32>
    %c12_396 = arith.constant 12 : index
    %c0_397 = arith.constant 0 : index
    %447 = vector.load %arg13[%c12_396, %c0_397] : memref<24x64xf32, #tpu.memory_space<vmem>>, vector<12x64xf32>
    %448 = arith.truncf %447 : vector<12x64xf32> to vector<12x64xbf16>
    %c4_398 = arith.constant 4 : index
    %c0_399 = arith.constant 0 : index
    %c0_400 = arith.constant 0 : index
    %449 = vector.load %arg8[%c4_398, %c0_399, %c0_400] : memref<5x64x16xbf16, #tpu.memory_space<vmem>>, vector<1x64x16xbf16>
    %450 = vector.shape_cast %449 : vector<1x64x16xbf16> to vector<64x16xbf16>
    %cst_401 = arith.constant dense<0.000000e+00> : vector<12x16xf32>
    %451 = tpu.matmul %448, %450, %cst_401 {dimension_numbers = #tpu.dot_dimension_numbers<[1], [0], [0], [1], [0, 0, 1, 1], [], []>} : vector<12x64xbf16>, vector<64x16xbf16>, vector<12x16xf32> -> vector<12x16xf32>
    %452 = arith.addf %446, %451 : vector<12x16xf32>
    %c0_402 = arith.constant 0 : index
    %c0_403 = arith.constant 0 : index
    %453 = vector.load %arg9[%c0_402, %c0_403] : memref<1x16xf32, #tpu.memory_space<vmem>>, vector<1x16xf32>
    %454 = vector.broadcast %453 : vector<1x16xf32> to vector<12x16xf32>
    %455 = arith.addf %452, %454 : vector<12x16xf32>
    %cst_404 = arith.constant 0.000000e+00 : f32
    %456 = vector.broadcast %cst_404 : f32 to vector<12x16xf32>
    %457 = arith.maximumf %455, %456 : vector<12x16xf32>
    %c0_405 = arith.constant 0 : index
    %c0_406 = arith.constant 0 : index
    %c0_407 = arith.constant 0 : index
    %458 = vector.load %arg10[%c0_405, %c0_406, %c0_407] : memref<1x12x16xf32, #tpu.memory_space<vmem>>, vector<1x12x16xf32>
    %459 = vector.shape_cast %458 : vector<1x12x16xf32> to vector<12x16xf32>
    %460 = vector.shape_cast %457 : vector<12x16xf32> to vector<1x12x16xf32>
    tpu.vector_store %arg10[%c0_405, %c0_406, %c0_407], %460 {strides = array<i32>} : memref<1x12x16xf32, #tpu.memory_space<vmem>>, vector<1x12x16xf32>,
    return
  }
  func.func @transform_0(%arg0: i32) -> (i32, i32, i32) {
    %c0_i32 = arith.constant 0 : i32
    %c0_i32_0 = arith.constant 0 : i32
    %c0_i32_1 = arith.constant 0 : i32
    return %arg0, %c0_i32, %c0_i32_0 : i32, i32, i32
  }
  func.func @transform_1(%arg0: i32) -> (i32, i32, i32) {
    %c0_i32 = arith.constant 0 : i32
    %c0_i32_0 = arith.constant 0 : i32
    %c0_i32_1 = arith.constant 0 : i32
    %c0_i32_2 = arith.constant 0 : i32
    return %c0_i32, %c0_i32_0, %c0_i32_1 : i32, i32, i32
  }
  func.func @transform_2(%arg0: i32) -> (i32, i32) {
    %c0_i32 = arith.constant 0 : i32
    %c0_i32_0 = arith.constant 0 : i32
    %c0_i32_1 = arith.constant 0 : i32
    return %c0_i32, %c0_i32_0 : i32, i32
  }
  func.func @transform_3(%arg0: i32) -> (i32, i32, i32) {
    %c0_i32 = arith.constant 0 : i32
    %c0_i32_0 = arith.constant 0 : i32
    %c0_i32_1 = arith.constant 0 : i32
    %c0_i32_2 = arith.constant 0 : i32
    return %c0_i32, %c0_i32_0, %c0_i32_1 : i32, i32, i32
  }
  func.func @transform_4(%arg0: i32) -> (i32, i32) {
    %c0_i32 = arith.constant 0 : i32
    %c0_i32_0 = arith.constant 0 : i32
    %c0_i32_1 = arith.constant 0 : i32
    return %c0_i32, %c0_i32_0 : i32, i32
  }
  func.func @transform_5(%arg0: i32) -> (i32, i32, i32) {
    %c0_i32 = arith.constant 0 : i32
    %c0_i32_0 = arith.constant 0 : i32
    %c0_i32_1 = arith.constant 0 : i32
    %c0_i32_2 = arith.constant 0 : i32
    return %c0_i32, %c0_i32_0, %c0_i32_1 : i32, i32, i32
  }
  func.func @transform_6(%arg0: i32) -> (i32, i32) {
    %c0_i32 = arith.constant 0 : i32
    %c0_i32_0 = arith.constant 0 : i32
    %c0_i32_1 = arith.constant 0 : i32
    return %c0_i32, %c0_i32_0 : i32, i32
  }
  func.func @transform_7(%arg0: i32) -> (i32, i32, i32) {
    %c0_i32 = arith.constant 0 : i32
    %c0_i32_0 = arith.constant 0 : i32
    %c0_i32_1 = arith.constant 0 : i32
    %c0_i32_2 = arith.constant 0 : i32
    return %c0_i32, %c0_i32_0, %c0_i32_1 : i32, i32, i32
  }
  func.func @transform_8(%arg0: i32) -> (i32, i32) {
    %c0_i32 = arith.constant 0 : i32
    %c0_i32_0 = arith.constant 0 : i32
    %c0_i32_1 = arith.constant 0 : i32
    return %c0_i32, %c0_i32_0 : i32, i32
  }
  func.func @transform_9(%arg0: i32) -> (i32, i32, i32) {
    %c0_i32 = arith.constant 0 : i32
    %c0_i32_0 = arith.constant 0 : i32
    %c0_i32_1 = arith.constant 0 : i32
    return %arg0, %c0_i32, %c0_i32_0 : i32, i32, i32
  }
}

</mosaic_0001>

<bundles_post_ra>
// kernel: tile.11
= control target key start
LH: loop header
LB: loop body
LE: loop exit
PB: predicated region body
PF: predicated region fallthrough
CT: control target
= control target key end

     0   :  { %s22_s0 = inlined_call_operand.vmem [shape: f32[64], index: 0, kind: input, shape index: {}]   ;;  %s23_s1 = inlined_call_operand.vmem [shape: f32[2,64], index: 1, kind: output, shape index: {}]  }
   0x1   :  { %v4_v0 = vld [vmem:[%s22_s0] ss:$0 sm:$0xff] }
   0x2   :  { %5 = vst [vmem:[%s23_s1] sm:$0x3] %v4_v0 }

// kernel: tile.12
= control target key start
LH: loop header
LB: loop body
LE: loop exit
PB: predicated region body
PF: predicated region fallthrough
CT: control target
= control target key end

     0   :  { %vm7_vm0 = vcmask 523264   ;;  %vm13_vm1 = vcmask 1048064   ;;  %s39_s0 = inlined_call_operand.vmem [shape: f32[2,64], index: 0, kind: input, shape index: {}]   ;;  %s40_s1 = inlined_call_operand.vmem [shape: f32[1,128], index: 1, kind: output, shape index: {}]  }
   0x1   :  { %v4_v0 = vld [vmem:[%s39_s0] sm:$0x3]  ;;  %s22_s0 = smov 64  }
   0x2   :  { %5 = vst [vmem:[#allocation1] sm:$0x3] %v4_v0 }
   0x9   :  { %v10_v1 = vld [vmem:[#allocation1 + $0x1] sm:$0x1]   ;;  %v6_v2 = vld [vmem:[#allocation1] sm:$0x1]  }
   0xa   :  { %11 = vrot.lane.b32.xlu0 %v10_v1, %s22_s0  ;;  %8 = vst.msk [vmem:[#allocation0] sm:$0x1] %vm7_vm0, %v6_v2  }
  0x7c   :  { %v12_v3 = vpop.permute.xlu0 %11  }
  0x7d   :  { %14 = vst.msk [vmem:[#allocation0] sm:$0x1] %vm13_vm1, %v12_v3  }
  0x84   :  { %v18_v4 = vld [vmem:[#allocation0] sm:$0x1] }
  0x85   :  { %20 = vst [vmem:[%s40_s1] sm:$0x1] %v18_v4 }

// kernel: cnn_layers_2_forward.1
= control target key start
LH: loop header
LB: loop body
LE: loop exit
PB: predicated region body
PF: predicated region fallthrough
CT: control target
= control target key end

     0   :  { %s10134_s30 = smov 0   ;;  %s12928_s0 = inlined_call_operand.vmem [shape: f32[2,240,15], index: 0, kind: input, shape index: {}]   ;;  %s12929_s1 = inlined_call_operand.vmem [shape: bf16[5,15,128], index: 1, kind: input, shape index: {}]   ;;  %s12930_s2 = inlined_call_operand.vmem [shape: f32[1,128], index: 2, kind: input, shape index: {}]   ;;  %s12931_s3 = inlined_call_operand.vmem [shape: bf16[5,640,64], index: 3, kind: input, shape index: {}]   ;;  %s12932_s4 = inlined_call_operand.vmem [shape: f32[1,64], index: 4, kind: input, shape index: {}]   ;;  %s12933_s5 = inlined_call_operand.vmem [shape: bf16[5,320,32], index: 5, kind: input, shape index: {}]   ;;  %s12934_s6 = inlined_call_operand.vmem [shape: f32[1,32], index: 6, kind: input, shape index: {}]   ;;  %s12935_s7 = inlined_call_operand.vmem [shape: bf16[5,64,16], index: 7, kind: input, shape index: {}]   ;;  %s12936_s8 = inlined_call_operand.vmem [shape: f32[1,16], index: 8, kind: input, shape index: {}]   ;;  %s12937_s9 = inlined_call_operand.vmem [shape: f32[2,12,16], index: 9, kind: output, shape index: {}]  }
   0x1 LB: > { %s7305_s10 = sadd.s32 4294967295, %s10077_s30   ;;  %p7309_p0 = scmp.ge.s32.totalorder %s10077_s30, 1  ;;  %s10077_s30 = sphi %s10134_s30, %s19_s30  }
   0x2   : > { %p287_p1 = scmp.lt.s32.totalorder %s10077_s30, 3 }
   0x4   : > { %p288_p2 = pnand %p7309_p0, %p287_p1 }
   0x6   : > { %291 = sbr.rel (%p288_p2) target bundleno = 1955 (0x7a3), region = 56 }
   0xd   : > { %v9746_v0 = vld [vmem:[%s12929_s1 + $0x8] sm:$0xff]   ;;  %vm475_vm0 = vcmask 1046528   ;;  %vm476_vm1 = vcmask 1047552   ;;  %p323_p3 = scmp.lt.s32.totalorder %s7305_s10, 1  ;;  %v9747_v1 = vld [vmem:[%s12929_s1] sm:$0xff]   ;;  %v10079_v2 = vmov 65535  }
   0xe   : > { %v477_v3 = vsel %vm475_vm0, 4294967295, %v10079_v2  ;;  %v9748_v10 = vld [vmem:[%s12929_s1 + $0x10] sm:$0xff]   ;;  %vm407_vm2 = vcmask 1045504   ;;  %vm438_vm3 = vcmask 121856   ;;  %vm1486_vm4 = vcmask 1042432   ;;  %s10080_s13 = smov 64  }
   0xf   : > { %v10149_v4 = vsel %vm476_vm1, %v477_v3, 0  ;;  %s13115_s10 = smov (!%p323_p3, %s7305_s10), 1  ;;  %vm1475_vm5 = vcmask 1043456   ;;  %vm1498_vm6 = vcmask 1040384   ;;  %vm1492_vm7 = vcmask 1041408   ;;  %s10083_s24 = smov 32  }
  0x10   : > { %v480_v5 = vand.u32 %v9746_v0, %v10149_v4  ;;  %v653_v6 = vand.u32 %v9747_v1, %v10149_v4  ;;  %s9732_s15 = smul.u32 240, %s13115_s10  ;;  %v10228_v32 = vand.u32 %v9748_v10, %v10149_v4  ;;  %vm1469_vm8 = vcmask 1044480   ;;  %s8239_s12 = sshll.u32 %s13115_s10, 4 }
  0x11   : > { %vm5094_vm9 = vcmask 519168   ;;  %vm5117_vm10 = vcmask 523268   ;;  %vm5101_vm11 = vcmask 1043968   ;;  %vm5123_vm12 = vcmask 1048068   ;;  %s332_s16 = scalar_lea.vmem %s12937_s9, %s8239_s12 }
  0x12   : > { %9090 = vmatprep.subr.bf16.mxu0 %v480_v5  ;;  %s10159_s18 = scalar_lea.vmem %s12928_s0, %s9732_s15  ;;  %vm5573_vm13 = vcmask 523264   ;;  %vm10082_vm14 = vmmov 0   ;;  %vm6794_vm15 = vcmask 256000   ;;  %vm6800_vm1 = vcmask 519425  }
  0x13   : > { %9091 = vmatpush3.bf16.msra.mxu0 %v480_v5  ;;  %v10162_v7 = vld [vmem:[%s10159_s18 + $0x8] sm:$0xff]  ;;  %v10165_v8 = vld [vmem:[%s10159_s18 + $0x10] sm:$0xff]  ;;  %v10168_v9 = vld [vmem:[%s10159_s18 + $0x18] sm:$0xff] }
  0x14   : > { %9116 = vmatprep.subr.bf16.mxu0 %v653_v6  ;;  %v10174_v11 = vld [vmem:[%s10159_s18 + $0x20] sm:$0xff]  ;;  %v378_v12 = vpack.c.bf16 %v10165_v8, %v10162_v7  ;;  %v10179_v13 = vld [vmem:[%s10159_s18 + $0x28] sm:$0xff]  ;;  %v10182_v14 = vld [vmem:[%s10159_s18 + $0x30] sm:$0xff] }
  0x15   : > { %v10186_v15 = vpack.c.bf16 %v10174_v11, %v10168_v9  ;;  %v10190_v16 = vpack.c.bf16 %v10182_v14, %v10179_v13  ;;  %v10193_v17 = vld [vmem:[%s10159_s18 + $0x38] sm:$0xff]  ;;  %v10196_v18 = vld [vmem:[%s10159_s18 + $0x40] sm:$0xff]  ;;  %v10199_v19 = vld [vmem:[%s10159_s18 + $0x48] sm:$0xff] }
  0x16   : > { %v408_v20 = vrot.slane %v378_v12, 2  ;;  %v10203_v21 = vpack.c.bf16 %v10196_v18, %v10193_v17  ;;  %v10206_v22 = vld [vmem:[%s10159_s18 + $0x50] sm:$0xff]  ;;  %v10209_v23 = vld [vmem:[%s10159_s18 + $0x58] sm:$0xff]  ;;  %v10212_v24 = vld [vmem:[%s10159_s18 + $0x60] sm:$0xff] }
  0x17   : > { %v409_v25 = vrot.slane %v10186_v15, 2  ;;  %v411_v26 = vrot.slane %v10190_v16, 2  ;;  %v10219_v28 = vpack.c.bf16 %v10206_v22, %v10199_v19  ;;  %v10225_v31 = vpack.c.bf16 %v10212_v24, %v10209_v23  ;;  %v10234_v34 = vld [vmem:[%s10159_s18 + $0x68] sm:$0xff]  ;;  %v10237_v35 = vld [vmem:[%s10159_s18 + $0x70] sm:$0xff]  ;;  %v10242_v37 = vld [vmem:[%s10159_s18 + $0x78] sm:$0xff] }
  0x18   : > { %v413_v27 = vrot.slane %v10203_v21, 2  ;;  %v10245_v38 = vld [vmem:[%s10159_s18 + $0x80] sm:$0xff]  ;;  %v10251_v40 = vpack.c.bf16 %v10237_v35, %v10234_v34  ;;  %v351_v46 = vld [vmem:[%s10159_s18 + $0x88] sm:$0xff]  ;;  %v352_v47 = vld [vmem:[%s10159_s18 + $0x90] sm:$0xff] }
  0x19   : > { %v410_v29 = vsel %vm407_vm2, %v408_v20, %v409_v25  ;;  %v412_v30 = vsel %vm407_vm2, %v409_v25, %v411_v26  ;;  %v415_v36 = vrot.slane %v10219_v28, 2  ;;  %v417_v39 = vrot.slane %v10225_v31, 2  ;;  %v353_v48 = vld [vmem:[%s10159_s18 + $0x98] sm:$0xff]  ;;  %v354_v49 = vld [vmem:[%s10159_s18 + $0xa0] sm:$0xff]  ;;  %v355_v54 = vld [vmem:[%s10159_s18 + $0xa8] sm:$0xff] }
  0x1a   : > { %9092 = vmatprep.mubr.msk.bf16.mxu0 %vm438_vm3, %v410_v29  ;;  %v414_v33 = vsel %vm407_vm2, %v411_v26, %v413_v27  ;;  %v10255_v41 = vpack.c.bf16 %v10245_v38, %v10242_v37  ;;  %v419_v44 = vrot.slane %v10251_v40, 2  ;;  %v10268_v51 = vpack.c.bf16 %v352_v47, %v351_v46  ;;  %v356_v55 = vld [vmem:[%s10159_s18 + $0xb0] sm:$0xff]  ;;  %v357_v56 = vld [vmem:[%s10159_s18 + $0xb8] sm:$0xff]  ;;  %v358_v57 = vld [vmem:[%s10159_s18 + $0xc0] sm:$0xff] }
  0x1b   : > { %9093 = vmatmul.mubr.msk.bf16.vlgmr.msra.gmra.mrb[0].mxu0 %vm438_vm3, %v412_v30  ;;  %v416_v42 = vsel %vm407_vm2, %v413_v27, %v415_v36  ;;  %v418_v43 = vsel %vm407_vm2, %v415_v36, %v417_v39  ;;  %v10270_v52 = vpack.c.bf16 %v354_v49, %v353_v48  ;;  %v10282_v61 = vpack.c.bf16 %v356_v55, %v355_v54  ;;  %v10289_v0 = vld [vmem:[%s10159_s18 + $0xc8] sm:$0xff]  ;;  %v334_v12 = vld [vmem:[%s10159_s18] sm:$0xff]  ;;  %v9749_v26 = vld [vmem:[%s12929_s1 + $0x18] sm:$0xff]  }
  0x1c   : > { %9117 = vmatpush3.bf16.msra.mxu0 %v653_v6  ;;  %9096 = vmatprep.mubr.msk.bf16.mxu0 %vm438_vm3, %v414_v33  ;;  %v421_v45 = vrot.slane %v10255_v41, 2  ;;  %v420_v50 = vsel %vm407_vm2, %v417_v39, %v419_v44  ;;  %v423_v58 = vrot.slane %v10268_v51, 2  ;;  %v10284_v62 = vpack.c.bf16 %v358_v57, %v357_v56 }
  0x1d   : > { %9142 = vmatprep.subr.bf16.mxu0 %v10228_v32  ;;  %v425_v59 = vrot.slane %v10270_v52, 2  ;;  %v427_v1 = vrot.slane %v10282_v61, 2  ;;  %v390_v5 = vpack.c.bf16 %v10289_v0, %v10289_v0  ;;  %v364_v25 = vpack.c.bf16 %v10162_v7, %v334_v12  ;;  %v9763_v12 = vld [vmem:[%s12931_s3 + $0x198] sm:$0xff]  }
  0x1e   : > { %v422_v53 = vsel %vm407_vm2, %v419_v44, %v421_v45  ;;  %v424_v60 = vsel %vm407_vm2, %v421_v45, %v423_v58  ;;  %v429_v2 = vrot.slane %v10284_v62, 2  ;;  %v10309_v27 = vpack.c.bf16 %v10289_v0, %v358_v57 }
  0x1f   : > { %v426_v63 = vsel %vm407_vm2, %v423_v58, %v425_v59  ;;  %v428_v3 = vsel %vm407_vm2, %v425_v59, %v427_v1  ;;  %v431_v10 = vrot.slane %v390_v5, 2  ;;  %v365_v29 = vpack.c.bf16 %v10168_v9, %v10165_v8  ;;  %v9762_v5 = vld [vmem:[%s12931_s3 + $0x290] sm:$0xff]  }
  0x20   : > { %v430_v6 = vsel %vm407_vm2, %v427_v1, %v429_v2  ;;  %v10315_v30 = vpack.c.bf16 %v10179_v13, %v10174_v11  ;;  %v1071_v7 = vand.u32 %v9749_v26, %v10149_v4  ;;  %v10324_v33 = vpack.c.bf16 %v10193_v17, %v10182_v14  ;;  %v9757_v1 = vld [vmem:[%s12931_s3 + $0x2c8] sm:$0xff]   ;;  %v9766_v26 = vld [vmem:[%s12931_s3 + $0x298] sm:$0xff]  }
  0x21   : > { %v432_v20 = vsel %vm407_vm2, %v429_v2, %v431_v10  ;;  %v10328_v8 = vpack.c.bf16 %v10199_v19, %v10196_v18  ;;  %v10336_v9 = vpack.c.bf16 %v10209_v23, %v10206_v22  ;;  %v10340_v11 = vpack.c.bf16 %v10234_v34, %v10212_v24  ;;  %v9750_v22 = vld [vmem:[%s12929_s1 + $0x20] sm:$0xff]   ;;  %v361_v24 = vld [vmem:[%s10159_s18 + $0xd8] sm:$0xff]  ;;  %v360_v34 = vld [vmem:[%s10159_s18 + $0xd0] sm:$0xff] }
  0x22   : > { %v10348_v13 = vpack.c.bf16 %v10242_v37, %v10237_v35  ;;  %v10351_v14 = vpack.c.bf16 %v351_v46, %v10245_v38  ;;  %v10357_v17 = vpack.c.bf16 %v353_v48, %v352_v47  ;;  %v10359_v18 = vpack.c.bf16 %v355_v54, %v354_v49  ;;  %v9756_v49 = vld [vmem:[%s12931_s3 + $0x148] sm:$0xff]  }
  0x23   : > { %9097 = vmatmul.mubr.msk.bf16.gmra.mrb[4].mxu0 %vm438_vm3, %v416_v42  ;;  %v10365_v19 = vpack.c.bf16 %v357_v56, %v356_v55  ;;  %v1245_v23 = vand.u32 %v9750_v22, %v10149_v4  ;;  %v10384_v35 = vpack.c.bf16 %v361_v24, %v360_v34  ;;  %v9751_v4 = vld [vmem:[%s12931_s3 + $0x180] sm:$0xff]   ;;  %v1005_v37 = vrot.slane %v10324_v33, 2  ;;  %v9758_v2 = vld [vmem:[%s12931_s3 + $0x288] sm:$0xff]   ;;  %v9780_v22 = vld [vmem:[%s12931_s3 + $0x178] sm:$0xff]  }
  0x24   : > { %9100 = vmatprep.mubr.msk.bf16.mxu0 %vm438_vm3, %v418_v43  ;;  %v1009_v38 = vrot.slane %v10336_v9, 2  ;;  %v1011_v39 = vrot.slane %v10340_v11, 2  ;;  %v1013_v42 = vrot.slane %v10348_v13, 2  ;;  %v1015_v43 = vrot.slane %v10351_v14, 2  ;;  %8305 = vmatprep.subr.bf16.mxu1 %v9751_v4  ;;  %v9782_v24 = vld [vmem:[%s12931_s3 + $0x2b8] sm:$0xff]  }
  0x25   : > { %v1017_v44 = vrot.slane %v10357_v17, 2  ;;  %v1021_v45 = vrot.slane %v10365_v19, 2  ;;  %v1023_v46 = vrot.slane %v10309_v27, 2  ;;  %v1025_v47 = vrot.slane %v10384_v35, 2 }
  0x26   : > { %v784_v54 = vpack.c.bf16 %v360_v34, %v10289_v0  ;;  %v1012_v55 = vsel %vm407_vm2, %v1009_v38, %v1011_v39  ;;  %v1014_v56 = vsel %vm407_vm2, %v1011_v39, %v1013_v42  ;;  %v1016_v57 = vsel %vm407_vm2, %v1013_v42, %v1015_v43  ;;  %v9754_v0 = vld [vmem:[%s12931_s3 + $0x280] sm:$0xff]  }
  0x27   : > { %v1018_v58 = vsel %vm407_vm2, %v1015_v43, %v1017_v44  ;;  %v9790_v34 = vld [vmem:[%s12931_s3 + $0x400] sm:$0xff]  }
  0x2b   : > { %9101 = vmatmul.mubr.msk.bf16.gmra.mrb[8].mxu0 %vm438_vm3, %v420_v50  ;;  %v9759_v50 = vld [vmem:[%s12931_s3 + $0x190] sm:$0xff]  }
  0x2c   : > { %9104 = vmatprep.mubr.msk.bf16.mxu0 %vm438_vm3, %v422_v53  ;;  %v9760_v53 = vld [vmem:[%s12931_s3 + $0x150] sm:$0xff]  }
  0x33   : > { %9105 = vmatmul.mubr.msk.bf16.gmra.mrb[12].mxu0 %vm438_vm3, %v424_v60 }
  0x34   : > { %9108 = vmatprep.mubr.msk.bf16.mxu0 %vm438_vm3, %v426_v63 }
  0x3b   : > { %9109 = vmatmul.mubr.msk.bf16.gmra.mrb[16].mxu0 %vm438_vm3, %v428_v3  ;;  %v9761_v3 = vld [vmem:[%s12931_s3 + $0x2d0] sm:$0xff]  }
  0x3c   : > { %9112 = vmatprep.mubr.msk.bf16.mxu0 %vm438_vm3, %v430_v6  ;;  %v363_v6 = vld [vmem:[%s10159_s18 + $0xe8] sm:$0xff] }
  0x43   : > { %9113 = vmatmul.mubr.msk.bf16.gmra.mrb[20].mxu0 %vm438_vm3, %v432_v20  ;;  %v9764_v20 = vld [vmem:[%s12931_s3 + $0x158] sm:$0xff]  }
  0x44   : > { %9118 = vmatprep.mubr.msk.bf16.mxu0 %vm438_vm3, %v364_v25  ;;  %v9765_v25 = vld [vmem:[%s12931_s3 + $0x2d8] sm:$0xff]  }
  0x4b   : > { %9119 = vmatmul.mubr.msk.bf16.vlgmr.msra.gmra.mrb[0].mxu0 %vm438_vm3, %v365_v29  ;;  %v9768_v29 = vld [vmem:[%s12931_s3 + $0x160] sm:$0xff]  }
  0x4c   : > { %9143 = vmatpush3.bf16.msra.mxu0 %v10228_v32  ;;  %9122 = vmatprep.mubr.msk.bf16.mxu0 %vm438_vm3, %v10315_v30  ;;  %v10381_v32 = vld [vmem:[%s10159_s18 + $0xe0] sm:$0xff] }
  0x4d   : > { %9168 = vmatprep.subr.bf16.mxu0 %v1071_v7  ;;  %v987_v36 = vpack.c.bf16 %v10381_v32, %v10381_v32  ;;  %v1226_v10 = vpack.c.bf16 %v363_v6, %v10381_v32  ;;  %v9783_v32 = vld [vmem:[%s12931_s3 + $0x200] sm:$0xff]  }
  0x4f   : > { %v1027_v48 = vrot.slane %v987_v36, 2 }
  0x51   : > { %v1028_v63 = vsel %vm407_vm2, %v1025_v47, %v1027_v48 }
  0x53   : > { %9123 = vmatmul.mubr.msk.bf16.gmra.mrb[4].mxu0 %vm438_vm3, %v10324_v33 }
  0x54   : > { %9126 = vmatprep.mubr.msk.bf16.mxu0 %vm438_vm3, %v10328_v8 }
  0x5b   : > { %9127 = vmatmul.mubr.msk.bf16.gmra.mrb[8].mxu0 %vm438_vm3, %v10336_v9 }
  0x5c   : > { %9130 = vmatprep.mubr.msk.bf16.mxu0 %vm438_vm3, %v10340_v11 }
  0x63   : > { %9131 = vmatmul.mubr.msk.bf16.gmra.mrb[12].mxu0 %vm438_vm3, %v10348_v13 }
  0x64   : > { %9134 = vmatprep.mubr.msk.bf16.mxu0 %vm438_vm3, %v10351_v14 }
  0x6b   : > { %9135 = vmatmul.mubr.msk.bf16.gmra.mrb[16].mxu0 %vm438_vm3, %v10357_v17 }
  0x6c   : > { %9138 = vmatprep.mubr.msk.bf16.mxu0 %vm438_vm3, %v10359_v18 }
  0x73   : > { %9139 = vmatmul.mubr.msk.bf16.gmra.mrb[20].mxu0 %vm438_vm3, %v10365_v19 }
  0x74   : > { %9144 = vmatprep.mubr.msk.bf16.mxu0 %vm438_vm3, %v10186_v15  ;;  %v1007_v15 = vrot.slane %v10328_v8, 2 }
  0x7b   : > { %9145 = vmatmul.mubr.msk.bf16.vlgmr.msra.gmra.mrb[0].mxu0 %vm438_vm3, %v10190_v16  ;;  %v9752_v16 = vld [vmem:[%s12931_s3 + $0x140] sm:$0xff]  }
  0x7c   : > { %9169 = vmatpush3.bf16.msra.mxu0 %v1071_v7  ;;  %9148 = vmatprep.mubr.msk.bf16.mxu0 %vm438_vm3, %v10203_v21  ;;  %v1004_v21 = vrot.slane %v10315_v30, 2  ;;  %v9769_v30 = vld [vmem:[%s12931_s3 + $0x2e0] sm:$0xff]  }
  0x7d   : > { %9194 = vmatprep.subr.bf16.mxu0 %v1245_v23  ;;  %8306 = vmatpush3.bf16.msra.mxu1 %v9752_v16  ;;  %v9770_v7 = vld [vmem:[%s12931_s3 + $0x2a0] sm:$0xff]  }
  0x83   : > { %9149 = vmatmul.mubr.msk.bf16.gmra.mrb[4].mxu0 %vm438_vm3, %v10219_v28  ;;  %v9755_v28 = vld [vmem:[%s12931_s3 + $0x188] sm:$0xff]  }
  0x84   : > { %9152 = vmatprep.mubr.msk.bf16.mxu0 %vm438_vm3, %v10225_v31  ;;  %v1019_v31 = vrot.slane %v10359_v18, 2  ;;  %8307 = vmatprep.subr.bf16.mxu1 %v9755_v28 }
  0x85   : > { %8308 = vmatpush3.bf16.msra.mxu1 %v9756_v49 }
  0x86   : > { %8309 = vmatprep.subr.bf16.mxu1 %v9759_v50  ;;  %v1020_v59 = vsel %vm407_vm2, %v1017_v44, %v1019_v31  ;;  %v1022_v60 = vsel %vm407_vm2, %v1019_v31, %v1021_v45 }
  0x89   : > { %8310 = vmatpush3.bf16.msra.mxu1 %v9760_v53 }
  0x8a   : > { %8311 = vmatprep.subr.bf16.mxu1 %v9763_v12 }
  0x8b   : > { %9153 = vmatmul.mubr.msk.bf16.gmra.mrb[8].mxu0 %vm438_vm3, %v10251_v40  ;;  %v1006_v40 = vsel %vm407_vm2, %v1004_v21, %v1005_v37 }
  0x8c   : > { %9156 = vmatprep.mubr.msk.bf16.mxu0 %vm438_vm3, %v10255_v41  ;;  %v9753_v41 = vld [vmem:[%s12931_s3 + $0x2c0] sm:$0xff]  }
  0x8d   : > { %8312 = vmatpush3.bf16.msra.mxu1 %v9764_v20 }
  0x93   : > { %9157 = vmatmul.mubr.msk.bf16.gmra.mrb[12].mxu0 %vm438_vm3, %v10268_v51  ;;  %v1008_v51 = vsel %vm407_vm2, %v1005_v37, %v1007_v15 }
  0x94   : > { %9160 = vmatprep.mubr.msk.bf16.mxu0 %vm438_vm3, %v10270_v52  ;;  %v1010_v52 = vsel %vm407_vm2, %v1007_v15, %v1009_v38 }
  0x9b   : > { %9161 = vmatmul.mubr.msk.bf16.gmra.mrb[16].mxu0 %vm438_vm3, %v10282_v61  ;;  %v1024_v61 = vsel %vm407_vm2, %v1021_v45, %v1023_v46 }
  0x9c   : > { %9164 = vmatprep.mubr.msk.bf16.mxu0 %vm438_vm3, %v10284_v62  ;;  %v1026_v62 = vsel %vm407_vm2, %v1023_v46, %v1025_v47  ;;  %v9796_v47 = vld [vmem:[%s12931_s3 + $0x1e0] sm:$0xff]  }
  0xa3   : > { %9165 = vmatmul.mubr.msk.bf16.gmra.mrb[20].mxu0 %vm438_vm3, %v784_v54 }
  0xa4   : > { %9170 = vmatprep.mubr.msk.bf16.mxu0 %vm438_vm3, %v1006_v40 }
  0xab   : > { %9171 = vmatmul.mubr.msk.bf16.vlgmr.msra.gmra.mrb[0].mxu0 %vm438_vm3, %v1008_v51 }
  0xac   : > { %9195 = vmatpush3.bf16.msra.mxu0 %v1245_v23  ;;  %9174 = vmatprep.mubr.msk.bf16.mxu0 %vm438_vm3, %v1010_v52  ;;  %v9781_v23 = vld [vmem:[%s12931_s3 + $0x2f8] sm:$0xff]  }
  0xad   : > { %8541 = vmatprep.subr.bf16.mxu0 %v9753_v41 }
  0xb3   : > { %9175 = vmatmul.mubr.msk.bf16.gmra.mrb[4].mxu0 %vm438_vm3, %v1012_v55 }
  0xb4   : > { %9178 = vmatprep.mubr.msk.bf16.mxu0 %vm438_vm3, %v1014_v56 }
  0xbb   : > { %9179 = vmatmul.mubr.msk.bf16.gmra.mrb[8].mxu0 %vm438_vm3, %v1016_v57 }
  0xbc   : > { %9182 = vmatprep.mubr.msk.bf16.mxu0 %vm438_vm3, %v1018_v58 }
  0xc3   : > { %9183 = vmatmul.mubr.msk.bf16.gmra.mrb[12].mxu0 %vm438_vm3, %v1020_v59 }
  0xc4   : > { %9186 = vmatprep.mubr.msk.bf16.mxu0 %vm438_vm3, %v1022_v60 }
  0xcb   : > { %9187 = vmatmul.mubr.msk.bf16.gmra.mrb[16].mxu0 %vm438_vm3, %v1024_v61 }
  0xcc   : > { %9190 = vmatprep.mubr.msk.bf16.mxu0 %vm438_vm3, %v1026_v62 }
  0xd3   : > { %9191 = vmatmul.mubr.msk.bf16.gmra.mrb[20].mxu0 %vm438_vm3, %v1028_v63 }
  0xd4   : > { %9196 = vmatprep.mubr.msk.bf16.mxu0 %vm438_vm3, %v10324_v33  ;;  %v9771_v33 = vld [vmem:[%s12931_s3 + $0x1a8] sm:$0xff]  }
  0xdb   : > { %9197 = vmatmul.mubr.msk.bf16.vlgmr.msra.gmra.mrb[0].mxu0 %vm438_vm3, %v10328_v8  ;;  %v9772_v8 = vld [vmem:[%s12931_s3 + $0x168] sm:$0xff]  }
  0xdc   : > { %9200 = vmatprep.mubr.msk.bf16.mxu0 %vm438_vm3, %v10336_v9  ;;  %8542 = vmatpush3.bf16.msra.mxu0 %v9754_v0  ;;  %v9773_v9 = vld [vmem:[%s12931_s3 + $0x2e8] sm:$0xff]  }
  0xdd   : > { %8543 = vmatprep.subr.bf16.mxu0 %v9757_v1 }
  0xe0   : > { %8544 = vmatpush3.bf16.msra.mxu0 %v9758_v2 }
  0xe1   : > { %8545 = vmatprep.subr.bf16.mxu0 %v9761_v3 }
  0xe3   : > { %9201 = vmatmul.mubr.msk.bf16.gmra.mrb[4].mxu0 %vm438_vm3, %v10340_v11  ;;  %v9774_v11 = vld [vmem:[%s12931_s3 + $0x2a8] sm:$0xff]  }
  0xe4   : > { %9204 = vmatprep.mubr.msk.bf16.mxu0 %vm438_vm3, %v10348_v13  ;;  %8546 = vmatpush3.bf16.msra.mxu0 %v9762_v5  ;;  %v9775_v13 = vld [vmem:[%s12931_s3 + $0x1b0] sm:$0xff]  }
  0xe5   : > { %8547 = vmatprep.subr.bf16.mxu0 %v9765_v25 }
  0xe8   : > { %8548 = vmatpush3.bf16.msra.mxu0 %v9766_v26 }
  0xe9   : > { %8549 = vmatprep.subr.bf16.mxu0 %v9769_v30 }
  0xeb   : > { %9205 = vmatmul.mubr.msk.bf16.gmra.mrb[8].mxu0 %vm438_vm3, %v10351_v14  ;;  %v9776_v14 = vld [vmem:[%s12931_s3 + $0x170] sm:$0xff]  }
  0xec   : > { %9208 = vmatprep.mubr.msk.bf16.mxu0 %vm438_vm3, %v10357_v17  ;;  %8550 = vmatpush3.bf16.msra.mxu0 %v9770_v7  ;;  %v9777_v17 = vld [vmem:[%s12931_s3 + $0x2f0] sm:$0xff]  }
  0xed   : > { %8551 = vmatprep.subr.bf16.mxu0 %v9773_v9 }
  0xf0   : > { %8552 = vmatpush3.bf16.msra.mxu0 %v9774_v11 }
  0xf1   : > { %8553 = vmatprep.subr.bf16.mxu0 %v9777_v17 }
  0xf3   : > { %9209 = vmatmul.mubr.msk.bf16.gmra.mrb[12].mxu0 %vm438_vm3, %v10359_v18  ;;  %v9778_v18 = vld [vmem:[%s12931_s3 + $0x2b0] sm:$0xff]  }
  0xf4   : > { %9212 = vmatprep.mubr.msk.bf16.mxu0 %vm438_vm3, %v10365_v19  ;;  %v9779_v19 = vld [vmem:[%s12931_s3 + $0x1b8] sm:$0xff]   ;;  %8554 = vmatpush3.bf16.msra.mxu0 %v9778_v18 }
  0xf5   : > { %8555 = vmatprep.subr.bf16.mxu0 %v9781_v23 }
  0xf8   : > { %8556 = vmatpush3.bf16.msra.mxu0 %v9782_v24 }
  0xf9   : > { %8659 = vmatprep.subr.bf16.mxu0 %v9790_v34 }
  0xfb   : > { %9213 = vmatmul.mubr.msk.bf16.gmra.mrb[16].mxu0 %vm438_vm3, %v10309_v27  ;;  %v9767_v27 = vld [vmem:[%s12931_s3 + $0x1a0] sm:$0xff]  }
  0xfc   : > { %9216 = vmatprep.mubr.msk.bf16.mxu0 %vm438_vm3, %v10384_v35  ;;  %8313 = vmatprep.subr.bf16.mxu1 %v9767_v27  ;;  %v10572_v35 = vld [vmem:[%s12930_s2] ss:$0 sm:$0xff] }
  0xfd   : > { %8314 = vmatpush3.bf16.msra.mxu1 %v9768_v29 }
  0xfe   : > { %8315 = vmatprep.subr.bf16.mxu1 %v9771_v33 }
 0x101   : > { %8316 = vmatpush3.bf16.msra.mxu1 %v9772_v8 }
 0x102   : > { %8317 = vmatprep.subr.bf16.mxu1 %v9775_v13 }
 0x103   : > { %9217 = vmatmul.mubr.msk.bf16.gmra.mrb[20].mxu0 %vm438_vm3, %v1226_v10  ;;  %vm7246_vm3 = vcmask 130048  }
 0x105   : > { %8318 = vmatpush3.bf16.msra.mxu1 %v9776_v14 }
 0x106   : > { %8319 = vmatprep.subr.bf16.mxu1 %v9779_v19 }
 0x109   : > { %8320 = vmatpush3.bf16.msra.mxu1 %v9780_v22 }
 0x10a   : > { %8357 = vmatprep.subr.bf16.mxu1 %v9783_v32 }
 0x1ae   : > { %v9198_v36 = vpop.f32.mrb[0].mxu0 }
 0x1af   : > { %v1409_v15 = vadd.f32 %v9198_v36, %v10572_v35  ;;  %v1281_v4 = vpop.f32.mrb[1].mxu0 }
 0x1b0   : > { %v1407_v16 = vadd.f32 %v10572_v35, %v1281_v4  ;;  %v9199_v21 = vpop.f32.mrb[2].mxu0 }
 0x1b1   : > { %v10576_v37 = vmax.f32 %v1409_v15, 0.0  ;;  %v1410_v38 = vadd.f32 %v9199_v21, %v10572_v35  ;;  %v1284_v39 = vpop.f32.mrb[3].mxu0  ;;  %v9784_v15 = vld [vmem:[%s12931_s3 + $0x1c0] sm:$0xff]  }
 0x1b2   : > { %v10579_v28 = vmax.f32 %v1407_v16, 0.0  ;;  %v1408_v42 = vadd.f32 %v10572_v35, %v1284_v39 }
 0x1b3   : > { %12990 = vst [vmem:[#allocation5_spill] sm:$0xff] %v10576_v37  ;;  %v10582_v43 = vmax.f32 %v1410_v38, 0.0  ;;  %v1488_v31 = vrot.slane %v10576_v37, 5  ;;  %v1482_v45 = vrot.slane %v10576_v37, 4  ;;  %v1500_v46 = vrot.slane %v10576_v37, 7 }
 0x1b4   : > { %v10584_v44 = vmax.f32 %v1408_v42, 0.0  ;;  %v1458_v48 = vrot.slane %v10579_v28, 1  ;;  %v1494_v50 = vrot.slane %v10576_v37, 6  ;;  %v9785_v42 = vld [vmem:[%s12931_s3 + $0x208] sm:$0xff]  }
 0x1b5   : > { %v1508_v49 = vrot.slane %v10582_v43, 1  ;;  %v1518_v51 = vrot.slane %v10582_v43, 3  ;;  %v1513_v58 = vrot.slane %v10582_v43, 2 }
 0x1b6   : > { %12991 = vst [vmem:[#allocation6_spill] sm:$0xff] %v10584_v44  ;;  %v9202_v53 = vpop.f32.mrb[4].mxu0  ;;  %v1459_v54 = vrot.slane %v10584_v44, 1  ;;  %v1487_v40 = vrot.slane %v10584_v44, 5  ;;  %v12938_v41 = vrot.slane %v10584_v44, 4  ;;  %v1499_v56 = vrot.slane %v10584_v44, 7 }
 0x1b7   : > { %v1413_v52 = vadd.f32 %v9202_v53, %v10572_v35  ;;  %v1297_v55 = vpop.f32.mrb[5].mxu0  ;;  %v1493_v57 = vrot.slane %v10584_v44, 6 }
 0x1b8   : > { %v1411_v59 = vadd.f32 %v10572_v35, %v1297_v55  ;;  %v9203_v60 = vpop.f32.mrb[6].mxu0  ;;  %v10603_v61 = vsel %vm475_vm0, %v1458_v48, %v1459_v54  ;;  %v10606_v62 = vsel %vm1486_vm4, %v1487_v40, %v1488_v31  ;;  %v10611_v63 = vsel %vm1475_vm5, %v12938_v41, %v1482_v45  ;;  %v9802_v41 = vld [vmem:[%s12931_s3 + $0x3d8] sm:$0xff]  }
 0x1b9   : > { %12992 = vst [vmem:[#allocation7_spill] sm:$0xff] %v10603_v61  ;;  %12993 = vst [vmem:[#allocation8_spill] sm:$0xff] %v10606_v62  ;;  %v10613_v0 = vmax.f32 %v1413_v52, 0.0  ;;  %v1414_v1 = vadd.f32 %v9203_v60, %v10572_v35  ;;  %v1300_v2 = vpop.f32.mrb[7].mxu0  ;;  %v1988_v12 = vpack.c.bf16 %v10582_v43, %v10611_v63  ;;  %v10629_v27 = vsel %vm1498_vm6, %v1499_v56, %v1500_v46  ;;  %v9792_v52 = vld [vmem:[%s12931_s3 + $0x3c0] sm:$0xff]   ;;  %v9786_v56 = vld [vmem:[%s12931_s3 + $0x1c8] sm:$0xff]  }
 0x1ba   : > { %12994 = vst [vmem:[#allocation9_spill] sm:$0xff] %v10611_v63  ;;  %v10619_v6 = vmax.f32 %v1411_v59, 0.0  ;;  %v1412_v10 = vadd.f32 %v10572_v35, %v1300_v2  ;;  %v10632_v29 = vsel %vm1492_vm7, %v1493_v57, %v1494_v50 }
 0x1bb   : > { %v10625_v25 = vmax.f32 %v1414_v1, 0.0  ;;  %v1552_v26 = vrot.slane %v10613_v0, 1 }
 0x1bc   : > { %v10634_v30 = vmax.f32 %v1412_v10, 0.0  ;;  %v1509_v7 = vrot.slane %v10619_v6, 1  ;;  %v1533_v33 = vrot.slane %v10619_v6, 5  ;;  %v12942_v8 = vrot.slane %v10619_v6, 4 }
 0x1bd   : > { %v1553_v9 = vrot.slane %v10625_v25, 1  ;;  %v1577_v11 = vrot.slane %v10625_v25, 5  ;;  %v12940_v13 = vrot.slane %v10625_v25, 4  ;;  %v1519_v14 = vrot.slane %v10619_v6, 3 }
 0x1be   : > { %v9206_v17 = vpop.f32.mrb[8].mxu0  ;;  %v1510_v18 = vsel %vm475_vm0, %v1508_v49, %v1509_v7  ;;  %v1534_v19 = vrot.slane %v10634_v30, 5  ;;  %v1529_v22 = vrot.slane %v10634_v30, 4  ;;  %v1514_v23 = vrot.slane %v10619_v6, 2 }
 0x1bf   : > { %v1417_v24 = vadd.f32 %v9206_v17, %v10572_v35  ;;  %v1313_v32 = vpop.f32.mrb[9].mxu0  ;;  %v1989_v34 = vpack.c.bf16 %v1510_v18, %v10606_v62  ;;  %v1554_v36 = vsel %vm475_vm0, %v1552_v26, %v1553_v9  ;;  %v10654_v4 = vsel %vm1469_vm8, %v1518_v51, %v1519_v14  ;;  %v9793_v9 = vld [vmem:[%s12931_s3 + $0x408] sm:$0xff]   ;;  %v10959_v62 = vld [vmem:[%s12931_s3 + $0x240] sm:$0xff]  }
 0x1c0   : > { %v1415_v16 = vadd.f32 %v10572_v35, %v1313_v32  ;;  %v9207_v21 = vpop.f32.mrb[10].mxu0  ;;  %v1535_v38 = vsel %vm1486_vm4, %v1533_v33, %v1534_v19  ;;  %v1530_v39 = vsel %vm1475_vm5, %v12942_v8, %v1529_v22  ;;  %v10705_v26 = vsel %vm407_vm2, %v1513_v58, %v1514_v23  ;;  %v9794_v23 = vld [vmem:[%s12931_s3 + $0x3c8] sm:$0xff]   ;;  %v9805_v8 = vld [vmem:[%s12931_s3 + $0x230] sm:$0xff]  }
 0x1c1   : > { %v10666_v45 = vmax.f32 %v1417_v24, 0.0  ;;  %v1418_v46 = vadd.f32 %v9207_v21, %v10572_v35  ;;  %v1316_v48 = vpop.f32.mrb[11].mxu0  ;;  %v10669_v49 = vpack.c.bf16 %v1535_v38, %v1510_v18  ;;  %2371 = vmatprep.mubr.bf16.mxu1 %v1989_v34  ;;  %v10671_v50 = vpack.c.bf16 %v1554_v36, %v1535_v38  ;;  %v9788_v21 = vld [vmem:[%s12931_s3 + $0x1d0] sm:$0xff]  }
 0x1c2   : > { %v10673_v53 = vmax.f32 %v1415_v16, 0.0  ;;  %v1416_v54 = vadd.f32 %v10572_v35, %v1316_v48  ;;  %2372 = vmatmul.mubr.bf16.vlgmr.msra.gmra.mrb[0].mxu1 %v1988_v12  ;;  %v10677_v40 = vpack.c.bf16 %v1530_v39, %v10582_v43  ;;  %v10680_v51 = vpack.c.bf16 %v10613_v0, %v1530_v39  ;;  %v9787_v12 = vld [vmem:[%s12931_s3 + $0x210] sm:$0xff]  }
 0x1c3   : > { %12995 = vst [vmem:[#allocation10_spill] sm:$0xff] %v10669_v49  ;;  %v10685_v55 = vmax.f32 %v1418_v46, 0.0  ;;  %2379 = vmatprep.mubr.bf16.mxu1 %v10671_v50  ;;  %8358 = vmatpush3.bf16.msra.mxu1 %v9784_v15  ;;  %v1597_v57 = vrot.slane %v10666_v45, 1  ;;  %v1621_v59 = vrot.slane %v10666_v45, 5  ;;  %v12939_v60 = vrot.slane %v10666_v45, 4 }
 0x1c4   : > { %12996 = vst [vmem:[#allocation11_spill] sm:$0xff] %v10677_v40  ;;  %v10694_v1 = vmax.f32 %v1416_v54, 0.0  ;;  %3508 = vmatprep.mubr.bf16.mxu0 %v10669_v49  ;;  %8359 = vmatprep.subr.bf16.mxu1 %v9785_v42  ;;  %v1578_v2 = vrot.slane %v10673_v53, 5  ;;  %v1573_v10 = vrot.slane %v10673_v53, 4  ;;  %v1543_v17 = vrot.slane %v10619_v6, 7  ;;  %v9797_v54 = vld [vmem:[%s12931_s3 + $0x410] sm:$0xff]  }
 0x1c5   : > { %3509 = vmatmul.mubr.bf16.vlgmr.msra.gmra.mrb[24].mxu0 %v10677_v40  ;;  %v1622_v7 = vrot.slane %v10685_v55, 5  ;;  %v1617_v33 = vrot.slane %v10685_v55, 4  ;;  %v1544_v24 = vrot.slane %v10634_v30, 7  ;;  %v1558_v14 = vrot.slane %v10625_v25, 2 }
 0x1c6   : > { %v9210_v18 = vpop.f32.mrb[12].mxu0  ;;  %v1579_v19 = vsel %vm1486_vm4, %v1577_v11, %v1578_v2  ;;  %v1596_v58 = vrot.slane %v10694_v1, 1  ;;  %v1574_v22 = vsel %vm1475_vm5, %v12940_v13, %v1573_v10  ;;  %8660 = vmatpush3.bf16.msra.mxu0 %v9792_v52 }
 0x1c7   : > { %v1421_v32 = vadd.f32 %v9210_v18, %v10572_v35  ;;  %v1329_v34 = vpop.f32.mrb[13].mxu0  ;;  %8360 = vmatpush3.bf16.msra.mxu1 %v9786_v56  ;;  %v10726_v15 = vpack.c.bf16 %v1579_v19, %v1554_v36  ;;  %v10729_v11 = vpack.c.bf16 %v1574_v22, %v10613_v0  ;;  %v10732_v16 = vsel %vm1486_vm4, %v1621_v59, %v1622_v7  ;;  %v9789_v36 = vld [vmem:[%s12931_s3 + $0x218] sm:$0xff]  }
 0x1c8   : > { %v1419_v38 = vadd.f32 %v10572_v35, %v1329_v34  ;;  %v9211_v39 = vpop.f32.mrb[14].mxu0  ;;  %v1598_v42 = vsel %vm475_vm0, %v1596_v58, %v1597_v57  ;;  %8361 = vmatprep.subr.bf16.mxu1 %v9787_v12  ;;  %v10740_v46 = vpack.c.bf16 %v10694_v1, %v1574_v22  ;;  %v1618_v48 = vsel %vm1475_vm5, %v12939_v60, %v1617_v33  ;;  %v9798_v33 = vld [vmem:[%s12931_s3 + $0x3d0] sm:$0xff]   ;;  %v9800_v22 = vld [vmem:[%s12931_s3 + $0x418] sm:$0xff]  }
 0x1c9   : > { %12997 = vst [vmem:[#allocation12_spill] sm:$0xff] %v10726_v15  ;;  %12998 = vst [vmem:[#allocation13_spill] sm:$0xff] %v10729_v11  ;;  %v10751_v52 = vmax.f32 %v1421_v32, 0.0  ;;  %v1422_v56 = vadd.f32 %v9211_v39, %v10572_v35  ;;  %v1332_v57 = vpop.f32.mrb[15].mxu0  ;;  %3516 = vmatprep.mubr.bf16.mxu0 %v10726_v15  ;;  %v10755_v59 = vpack.c.bf16 %v1598_v42, %v1579_v19  ;;  %8661 = vmatprep.subr.bf16.mxu0 %v9793_v9  ;;  %v9791_v9 = vld [vmem:[%s12931_s3 + $0x1d8] sm:$0xff]  }
 0x1ca   : > { %12999 = vst [vmem:[#allocation14_spill] sm:$0xff] %v10740_v46  ;;  %v10758_v2 = vpack.c.bf16 %v10732_v16, %v1598_v42  ;;  %v10760_v10 = vmax.f32 %v1419_v38, 0.0  ;;  %v1420_v12 = vadd.f32 %v10572_v35, %v1332_v57  ;;  %2380 = vmatmul.mubr.bf16.gmra.mrb[4].mxu1 %v10680_v51  ;;  %v10765_v7 = vpack.c.bf16 %v1618_v48, %v10694_v1 }
 0x1cb   : > { %8662 = vmatpush3.bf16.msra.mxu0 %v9794_v23  ;;  %v10771_v18 = vsel %vm1498_vm6, %v1543_v17, %v1544_v24  ;;  %v10773_v19 = vmax.f32 %v1422_v56, 0.0  ;;  %2387 = vmatprep.mubr.bf16.mxu1 %v10755_v59  ;;  %v1666_v58 = vrot.slane %v10751_v52, 5  ;;  %v1562_v23 = vrot.slane %v10613_v0, 3 }
 0x1cc   : > { %13000 = vst [vmem:[#allocation15_spill] sm:$0xff] %v10758_v2  ;;  %13001 = vst [vmem:[#allocation16_spill] sm:$0xff] %v10765_v7  ;;  %8362 = vmatpush3.bf16.msra.mxu1 %v9788_v21  ;;  %v1563_v17 = vrot.slane %v10625_v25, 3  ;;  %v10785_v24 = vmax.f32 %v1420_v12, 0.0  ;;  %v1640_v32 = vrot.slane %v10760_v10, 1  ;;  %v10789_v34 = vpack.c.bf16 %v10760_v10, %v1618_v48  ;;  %v9795_v21 = vld [vmem:[%s12931_s3 + $0x220] sm:$0xff]   ;;  %8663 = vmatprep.subr.bf16.mxu0 %v9797_v54 }
 0x1cd   : > { %8363 = vmatprep.subr.bf16.mxu1 %v9789_v36  ;;  %v1661_v38 = vrot.slane %v10751_v52, 4  ;;  %3517 = vmatmul.mubr.bf16.gmra.mrb[28].mxu0 %v10729_v11  ;;  %v1538_v56 = vrot.slane %v10619_v6, 6  ;;  %v1539_v36 = vrot.slane %v10634_v30, 6 }
 0x1ce   : > { %13002 = vst [vmem:[#allocation17_spill] sm:$0xff] %v10789_v34  ;;  %v10798_v42 = vsel %vm1469_vm8, %v1562_v23, %v1563_v17  ;;  %3524 = vmatprep.mubr.bf16.mxu0 %v10758_v2  ;;  %v9214_v48 = vpop.f32.mrb[16].mxu0  ;;  %v1641_v57 = vrot.slane %v10785_v24, 1  ;;  %v1665_v12 = vrot.slane %v10785_v24, 5  ;;  %v12941_v54 = vrot.slane %v10785_v24, 4 }
 0x1cf   : > { %8664 = vmatpush3.bf16.msra.mxu0 %v9798_v33  ;;  %v10811_v23 = vpack.c.bf16 %v10798_v42, %v10771_v18  ;;  %v1425_v17 = vadd.f32 %v9214_v48, %v10572_v35  ;;  %v1345_v3 = vpop.f32.mrb[17].mxu0  ;;  %v10818_v20 = vsel %vm1492_vm7, %v1538_v56, %v1539_v36  ;;  %v1557_v33 = vrot.slane %v10613_v0, 2  ;;  %v9803_v56 = vld [vmem:[%s12931_s3 + $0x420] sm:$0xff]  }
 0x1d0   : > { %8364 = vmatpush3.bf16.msra.mxu1 %v9791_v9  ;;  %8665 = vmatprep.subr.bf16.mxu0 %v9800_v22  ;;  %v1423_v60 = vadd.f32 %v10572_v35, %v1345_v3  ;;  %v9215_v13 = vpop.f32.mrb[18].mxu0  ;;  %v1642_v31 = vsel %vm475_vm0, %v1640_v32, %v1641_v57  ;;  %v1667_v48 = vsel %vm1486_vm4, %v1665_v12, %v1666_v58  ;;  %v9799_v22 = vld [vmem:[%s12931_s3 + $0x228] sm:$0xff]  }
 0x1d1   : > { %8365 = vmatprep.subr.bf16.mxu1 %v9795_v21  ;;  %v1662_v9 = vsel %vm1475_vm5, %v12941_v54, %v1661_v38  ;;  %v10834_v36 = vmax.f32 %v1425_v17, 0.0  ;;  %v1426_v3 = vadd.f32 %v9215_v13, %v10572_v35  ;;  %v1348_v32 = vpop.f32.mrb[19].mxu0  ;;  %v10838_v58 = vpack.c.bf16 %v1642_v31, %v10732_v16  ;;  %v9804_v13 = vld [vmem:[%s12931_s3 + $0x3e0] sm:$0xff]  }
 0x1d2   : > { %v10840_v21 = vpack.c.bf16 %v1667_v48, %v1642_v31  ;;  %v10842_v57 = vmax.f32 %v1423_v60, 0.0  ;;  %v1424_v38 = vadd.f32 %v10572_v35, %v1348_v32  ;;  %2388 = vmatmul.mubr.bf16.gmra.mrb[8].mxu1 %v10740_v46  ;;  %v10847_v12 = vpack.c.bf16 %v1662_v9, %v10760_v10  ;;  %v9801_v31 = vld [vmem:[%s12931_s3 + $0x1e8] sm:$0xff]  }
 0x1d3   : > { %13003 = vst [vmem:[#allocation18_spill] sm:$0xff] %v10838_v58  ;;  %8666 = vmatpush3.bf16.msra.mxu0 %v9802_v41  ;;  %v10850_v17 = vpack.c.bf16 %v10773_v19, %v1662_v9  ;;  %v10855_v16 = vmax.f32 %v1426_v3, 0.0  ;;  %2395 = vmatprep.mubr.bf16.mxu1 %v10838_v58  ;;  %v9807_v41 = vld [vmem:[%s12931_s3 + $0x428] sm:$0xff]   ;;  %v10865_v60 = vsel %vm407_vm2, %v1557_v33, %v1558_v14  ;;  %v1587_v9 = vrot.slane %v10625_v25, 7 }
 0x1d4   : > { %13004 = vst [vmem:[#allocation19_spill] sm:$0xff] %v10840_v21  ;;  %13005 = vst [vmem:[#allocation20_spill] sm:$0xff] %v10847_v12  ;;  %8366 = vmatpush3.bf16.msra.mxu1 %v9796_v47  ;;  %v1588_v32 = vrot.slane %v10673_v53, 7  ;;  %v10869_v3 = vmax.f32 %v1424_v38, 0.0  ;;  %v1685_v54 = vrot.slane %v10842_v57, 1  ;;  %v1709_v47 = vrot.slane %v10842_v57, 5  ;;  %8667 = vmatprep.subr.bf16.mxu0 %v9803_v56 }
 0x1d5   : > { %13006 = vst [vmem:[#allocation21_spill] sm:$0xff] %v10850_v17  ;;  %8367 = vmatprep.subr.bf16.mxu1 %v9799_v22  ;;  %v1728_v5 = vrot.slane %v10834_v36, 1  ;;  %3525 = vmatmul.mubr.bf16.gmra.mrb[32].mxu0 %v10765_v7  ;;  %v1729_v14 = vrot.slane %v10855_v16, 1  ;;  %v1753_v38 = vrot.slane %v10855_v16, 5  ;;  %v10883_v39 = vpack.c.bf16 %v10865_v60, %v10818_v20  ;;  %v9808_v33 = vld [vmem:[%s12931_s3 + $0x3e8] sm:$0xff]  }
 0x1d6   : > { %3532 = vmatprep.mubr.bf16.mxu0 %v10840_v21  ;;  %v9218_v22 = vpop.f32.mrb[20].mxu0  ;;  %v13008_v56 = vrot.slane %v10773_v19, 1  ;;  %v1710_v11 = vrot.slane %v10869_v3, 5  ;;  %v1705_v7 = vrot.slane %v10869_v3, 4  ;;  %v10895_v15 = vsel %vm1498_vm6, %v1587_v9, %v1588_v32 }
 0x1d7   : > { %13007 = vst [vmem:[#allocation22_spill] sm:$0xff] %v10883_v39  ;;  %8668 = vmatpush3.bf16.msra.mxu0 %v9804_v13  ;;  %v1429_v40 = vadd.f32 %v9218_v22, %v10572_v35  ;;  %v1361_v21 = vpop.f32.mrb[21].mxu0  ;;  %v1606_v13 = vrot.slane %v10694_v1, 3  ;;  %v13010_v32 = vrot.slane %v10842_v57, 4  ;;  %v1675_v46 = vrot.slane %v10785_v24, 7 }
 0x1d8   : > { %v1686_v2 = vsel %vm475_vm0, %v13008_v56, %v1685_v54  ;;  %8368 = vmatpush3.bf16.msra.mxu1 %v9801_v31  ;;  %v1730_v54 = vsel %vm475_vm0, %v1728_v5, %v1729_v14  ;;  %v9806_v56 = vld [vmem:[%s12931_s3 + $0x1f0] sm:$0xff]   ;;  %8669 = vmatprep.subr.bf16.mxu0 %v9807_v41  ;;  %v1427_v63 = vadd.f32 %v10572_v35, %v1361_v21  ;;  %v9219_v61 = vpop.f32.mrb[22].mxu0  ;;  %v9809_v5 = vld [vmem:[%s12931_s3 + $0x238] sm:$0xff]   ;;  %v1720_v39 = vrot.slane %v10869_v3, 7 }
 0x1d9   : > { %v10898_v49 = vpack.c.bf16 %v1686_v2, %v1667_v48  ;;  %v1711_v9 = vsel %vm1486_vm4, %v1709_v47, %v1710_v11  ;;  %v1706_v48 = vsel %vm1475_vm5, %v13010_v32, %v1705_v7  ;;  %8369 = vmatprep.subr.bf16.mxu1 %v9805_v8  ;;  %v9810_v41 = vld [vmem:[%s12931_s3 + $0x430] sm:$0xff]   ;;  %v10918_v21 = vadd.f32 %v9219_v61, %v10572_v35  ;;  %v1364_v14 = vpop.f32.mrb[23].mxu0 }
 0x1da   : > { %v10920_v11 = vpack.c.bf16 %v1711_v9, %v1686_v2  ;;  %v10922_v47 = vpack.c.bf16 %v1730_v54, %v1711_v9  ;;  %v1607_v8 = vrot.slane %v10666_v45, 3  ;;  %v10925_v7 = vmax.f32 %v1427_v63, 0.0  ;;  %2396 = vmatmul.mubr.bf16.gmra.mrb[12].mxu1 %v10789_v34  ;;  %v9812_v2 = vld [vmem:[%s12931_s3 + $0x3f0] sm:$0xff]   ;;  %v9813_v63 = vld [vmem:[%s12931_s3 + $0x438] sm:$0xff]  }
 0x1db   : > { %13009 = vst [vmem:[#allocation23_spill] sm:$0xff] %v10898_v49  ;;  %v1428_v22 = vadd.f32 %v10572_v35, %v1364_v14  ;;  %v10930_v32 = vpack.c.bf16 %v1706_v48, %v10773_v19  ;;  %8670 = vmatpush3.bf16.msra.mxu0 %v9808_v33  ;;  %v10933_v61 = vpack.c.bf16 %v10834_v36, %v1706_v48  ;;  %v10938_v9 = vmax.f32 %v1429_v40, 0.0  ;;  %v9811_v35 = vld [vmem:[%s12931_s3 + $0x1f8] sm:$0xff]  }
 0x1dc   : > { %13011 = vst [vmem:[#allocation24_spill] sm:$0xff] %v10920_v11  ;;  %13012 = vst [vmem:[#allocation25_spill] sm:$0xff] %v10922_v47  ;;  %2403 = vmatprep.mubr.bf16.mxu1 %v10898_v49  ;;  %8370 = vmatpush3.bf16.msra.mxu1 %v9806_v56  ;;  %v10948_v33 = vsel %vm1469_vm8, %v1606_v13, %v1607_v8  ;;  %v1582_v48 = vrot.slane %v10625_v25, 6  ;;  %v1583_v14 = vrot.slane %v10673_v53, 6  ;;  %v1754_v31 = vrot.slane %v10925_v7, 5 }
 0x1dd   : > { %13013 = vst [vmem:[#allocation26_spill] sm:$0xff] %v10930_v32  ;;  %v10952_v40 = vmax.f32 %v1428_v22, 0.0  ;;  %8371 = vmatprep.subr.bf16.mxu1 %v9809_v5  ;;  %v1749_v56 = vrot.slane %v10925_v7, 4  ;;  %8671 = vmatprep.subr.bf16.mxu0 %v9810_v41  ;;  %v10963_v13 = vpack.c.bf16 %v10948_v33, %v10895_v15  ;;  %v1601_v22 = vrot.slane %v10694_v1, 2 }
 0x1de   : > { %3533 = vmatmul.mubr.bf16.gmra.mrb[36].mxu0 %v10847_v12  ;;  %v10967_v8 = vsel %vm1492_vm7, %v1582_v48, %v1583_v14  ;;  %v1602_v5 = vrot.slane %v10666_v45, 2  ;;  %v1631_v41 = vrot.slane %v10666_v45, 7  ;;  %v10974_v37 = vsel %vm1486_vm4, %v1753_v38, %v1754_v31  ;;  %v9814_v48 = vld [vmem:[%s12931_s3 + $0x3f8] sm:$0xff]  }
 0x1df   : > { %13014 = vst [vmem:[#allocation27_spill] sm:$0xff] %v10963_v13  ;;  %3540 = vmatprep.mubr.bf16.mxu0 %v10920_v11  ;;  %v13015_v49 = vrot.slane %v10855_v16, 4  ;;  %8672 = vmatpush3.bf16.msra.mxu0 %v9812_v2  ;;  %v1632_v14 = vrot.slane %v10685_v55, 7  ;;  %v1650_v12 = vrot.slane %v10760_v10, 3  ;;  %v10987_v58 = vpack.c.bf16 %v10974_v37, %v1730_v54  ;;  %v9819_v2 = vld [vmem:[%s12931_s3 + $0x480] sm:$0xff]  }
 0x1e0   : > { %8372 = vmatpush3.bf16.msra.mxu1 %v9811_v35  ;;  %8673 = vmatprep.subr.bf16.mxu0 %v9813_v63  ;;  %v1651_v31 = vrot.slane %v10785_v24, 3  ;;  %v1626_v35 = vrot.slane %v10666_v45, 6  ;;  %v1627_v63 = vrot.slane %v10685_v55, 6  ;;  %v1646_v11 = vrot.slane %v10785_v24, 2 }
 0x1e1   : > { %v10979_v34 = vsel %vm1475_vm5, %v13015_v49, %v1749_v56  ;;  %13016 = vst [vmem:[#allocation28_spill] sm:$0xff] %v10987_v58  ;;  %v10994_v49 = vsel %vm407_vm2, %v1601_v22, %v1602_v5  ;;  %9220 = vmatprep.subr.bf16.mxu1 %v10959_v62  ;;  %v11006_v56 = vsel %vm1498_vm6, %v1631_v41, %v1632_v14  ;;  %v1645_v5 = vrot.slane %v10760_v10, 2 }
 0x1e2   : > { %v10991_v38 = vpack.c.bf16 %v10979_v34, %v10834_v36  ;;  %v11003_v54 = vpack.c.bf16 %v10994_v49, %v10967_v8  ;;  %v11011_v22 = vsel %vm1469_vm8, %v1650_v12, %v1651_v31  ;;  %2404 = vmatmul.mubr.bf16.gmra.mrb[16].mxu1 %v10850_v17  ;;  %v11022_v14 = vsel %vm1492_vm7, %v1626_v35, %v1627_v63 }
 0x1e3   : > { %8674 = vmatpush3.bf16.msra.mxu0 %v9814_v48  ;;  %v11019_v41 = vpack.c.bf16 %v11011_v22, %v11006_v56  ;;  %v1694_v12 = vrot.slane %v10773_v19, 3  ;;  %2411 = vmatprep.mubr.bf16.mxu1 %v10922_v47  ;;  %v11028_v31 = vsel %vm407_vm2, %v1645_v5, %v1646_v11  ;;  %v1695_v17 = vrot.slane %v10842_v57, 3 }
 0x1e4   : > { %13017 = vst [vmem:[#allocation29_spill] sm:$0xff] %v10991_v38  ;;  %13018 = vst [vmem:[#allocation30_spill] sm:$0xff] %v11003_v54  ;;  %v1676_v54 = vrot.slane %v10751_v52, 7  ;;  %8711 = vmatprep.subr.bf16.mxu0 %v9819_v2  ;;  %v1670_v48 = vrot.slane %v10785_v24, 6  ;;  %v1671_v13 = vrot.slane %v10751_v52, 6  ;;  %v11035_v35 = vpack.c.bf16 %v11028_v31, %v11022_v14 }
 0x1e5   : > { %13019 = vst [vmem:[#allocation31_spill] sm:$0xff] %v11019_v41  ;;  %v1689_v41 = vrot.slane %v10773_v19, 2  ;;  %v1690_v2 = vrot.slane %v10842_v57, 2  ;;  %v11044_v11 = vsel %vm1469_vm8, %v1694_v12, %v1695_v17  ;;  %v1719_v47 = vrot.slane %v10842_v57, 7 }
 0x1e6   : > { %13020 = vst [vmem:[#allocation32_spill] sm:$0xff] %v11035_v35  ;;  %v11038_v63 = vsel %vm1498_vm6, %v1675_v46, %v1676_v54  ;;  %3541 = vmatmul.mubr.bf16.gmra.mrb[40].mxu0 %v10930_v32  ;;  %13021 = vst [vmem:[#allocation33_spill] sm:$0xff] %v11044_v11  ;;  %v11047_v5 = vsel %vm1492_vm7, %v1670_v48, %v1671_v13  ;;  %v1738_v32 = vrot.slane %v10834_v36, 3  ;;  %v1739_v17 = vrot.slane %v10855_v16, 3 }
 0x1e7   : > { %3548 = vmatprep.mubr.bf16.mxu0 %v10987_v58  ;;  %v11054_v46 = vpack.c.bf16 %v11044_v11, %v11038_v63  ;;  %v11057_v54 = vsel %vm407_vm2, %v1689_v41, %v1690_v2  ;;  %v11066_v12 = vsel %vm1498_vm6, %v1719_v47, %v1720_v39  ;;  %v1772_v48 = vrot.slane %v10952_v40, 1 }
 0x1e8   : > { %13023 = vst [vmem:[#allocation35_spill] sm:$0xff] %v11057_v54  ;;  %v11063_v13 = vpack.c.bf16 %v11057_v54, %v11047_v5  ;;  %v1773_v58 = vrot.slane %v10938_v9, 1  ;;  %v1714_v41 = vrot.slane %v10842_v57, 6  ;;  %v1715_v2 = vrot.slane %v10869_v3, 6 }
 0x1e9   : > { %13022 = vst [vmem:[#allocation34_spill] sm:$0xff] %v11054_v46  ;;  %v11071_v46 = vsel %vm1469_vm8, %v1738_v32, %v1739_v17  ;;  %v1733_v35 = vrot.slane %v10834_v36, 2  ;;  %v1734_v47 = vrot.slane %v10855_v16, 2  ;;  %v13027_v32 = vrot.slane %v10582_v43, 4 }
 0x1ea   : > { %13024 = vst [vmem:[#allocation36_spill] sm:$0xff] %v11063_v13  ;;  %v11078_v54 = vpack.c.bf16 %v11071_v46, %v11066_v12  ;;  %v11081_v39 = vsel %vm475_vm0, %v1772_v48, %v1773_v58  ;;  %v13026_v13 = vrot.slane %v10619_v6, 4  ;;  %v11092_v11 = vmax.f32 %v10918_v21, 0.0  ;;  %2412 = vmatmul.mubr.bf16.gmra.mrb[20].mxu1 %v10933_v61 }
 0x1eb   : > { %v11098_v58 = vsel %vm1492_vm7, %v1714_v41, %v1715_v2  ;;  %v13029_v43 = vpack.c.bf16 %v10654_v4, %v10629_v27  ;;  %v11108_v6 = vsel %vm407_vm2, %v1733_v35, %v1734_v47  ;;  %v1655_v2 = vrot.slane %v10760_v10, 4 }
 0x1ec   : > { %13025 = vst [vmem:[#allocation37_spill] sm:$0xff] %v11078_v54  ;;  %v11089_v17 = vsel %vm1475_vm5, %v13027_v32, %v13026_v13  ;;  %v1567_v13 = vrot.slane %v10613_v0, 4  ;;  %v1611_v32 = vrot.slane %v10694_v1, 4  ;;  %v11116_v41 = vpack.c.bf16 %v11108_v6, %v11098_v58 }
 0x1ed   : > { %v11102_v48 = vpack.c.bf16 %v10634_v30, %v11089_v17  ;;  %2452 = vmatprep.mubr.bf16.mxu1 %v13029_v43  ;;  %v1699_v54 = vrot.slane %v10773_v19, 4  ;;  %v1743_v43 = vrot.slane %v10834_v36, 4  ;;  %v13030_v35 = vrot.slane %v10625_v25, 4 }
 0x1ee   : > { %3549 = vmatmul.mubr.bf16.gmra.mrb[44].mxu0 %v10991_v38  ;;  %v13031_v0 = vrot.slane %v10666_v45, 4  ;;  %v1763_v21 = vrot.slane %v10855_v16, 7  ;;  %v1764_v10 = vrot.slane %v10925_v7, 7  ;;  %v13032_v36 = vrot.slane %v10785_v24, 4  ;;  %v9820_v38 = vld [vmem:[%s12931_s3 + $0x440] sm:$0xff]  }
 0x1ef   : > { %13028 = vst [vmem:[#allocation38_spill] sm:$0xff] %v11102_v48  ;;  %v11125_v47 = vsel %vm1475_vm5, %v1567_v13, %v13030_v35  ;;  %4174 = vmatprep.mubr.bf16.mxu0 %v10671_v50  ;;  %v13033_v13 = vrot.slane %v10842_v57, 4  ;;  %v13036_v35 = vrot.slane %v10855_v16, 4  ;;  %v9816_v57 = vld [vmem:[%s12931_s3 + $0x248] sm:$0xff]   ;;  %v13038_v48 = vpack.c.bf16 %v10705_v26, %v10632_v29 }
 0x1f0   : > { %v11130_v1 = vsel %vm1475_vm5, %v1611_v32, %v13031_v0  ;;  %v11137_v19 = vpack.c.bf16 %v11125_v47, %v10634_v30  ;;  %v11146_v45 = vsel %vm1475_vm5, %v1655_v2, %v13032_v36  ;;  %v11167_v2 = vsel %vm1498_vm6, %v1763_v21, %v1764_v10 }
 0x1f1   : > { %v11141_v25 = vpack.c.bf16 %v11130_v1, %v10673_v53  ;;  %v11151_v32 = vsel %vm1475_vm5, %v1699_v54, %v13033_v13  ;;  %v11155_v50 = vpack.c.bf16 %v11146_v45, %v10685_v55  ;;  %v11164_v24 = vsel %vm1475_vm5, %v1743_v43, %v13036_v35 }
 0x1f2   : > { %v11159_v30 = vpack.c.bf16 %v11151_v32, %v10751_v52  ;;  %v11174_v54 = vpack.c.bf16 %v11164_v24, %v10869_v3  ;;  %v1782_v0 = vrot.slane %v10952_v40, 3  ;;  %v1783_v36 = vrot.slane %v10938_v9, 3  ;;  %2453 = vmatmul.mubr.bf16.vlgmr.msra.gmra.mrb[24].mxu1 %v13038_v48  ;;  %v9821_v48 = vld [vmem:[%s12931_s3 + $0x488] sm:$0xff]  }
 0x1f3   : > { %13034 = vst [vmem:[#allocation39_spill] sm:$0xff] %v11155_v50  ;;  %v1758_v13 = vrot.slane %v10855_v16, 6  ;;  %v1759_v43 = vrot.slane %v10925_v7, 6  ;;  %v1777_v35 = vrot.slane %v10952_v40, 2  ;;  %v1778_v21 = vrot.slane %v10938_v9, 2  ;;  %2460 = vmatprep.mubr.bf16.mxu1 %v10811_v23  ;;  %9221 = vmatpush3.bf16.msra.mxu1 %v10959_v62  ;;  %v9817_v62 = vld [vmem:[%s12931_s3 + $0x250] sm:$0xff]  }
 0x1f4   : > { %13035 = vst [vmem:[#allocation40_spill] sm:$0xff] %v11159_v30  ;;  %13037 = vst [vmem:[#allocation41_spill] sm:$0xff] %v11174_v54  ;;  %v1471_v10 = vrot.slane %v10584_v44, 3  ;;  %v11190_v54 = vsel %vm1469_vm8, %v1782_v0, %v1783_v36  ;;  %v1465_v16 = vrot.slane %v10584_v44, 2  ;;  %v11195_v30 = vpack.c.bf16 %v10771_v18, %v10654_v4  ;;  %9222 = vmatprep.subr.bf16.mxu1 %v9816_v57 }
 0x1f5   : > { %v1797_v50 = vrot.slane %v10938_v9, 5  ;;  %v11206_v36 = vsel %vm1492_vm7, %v1758_v13, %v1759_v43  ;;  %v11209_v44 = vsel %vm407_vm2, %v1777_v35, %v1778_v21  ;;  %v1798_v4 = vrot.slane %v11092_v11, 5 }
 0x1f6   : > { %13039 = vst [vmem:[#allocation42_spill] sm:$0xff] %v11195_v30  ;;  %v13040_v30 = vrot.slane %v10579_v28, 3  ;;  %v13041_v13 = vrot.slane %v10579_v28, 2  ;;  %v11229_v35 = vpack.c.bf16 %v10818_v20, %v10705_v26  ;;  %4175 = vmatmul.mubr.bf16.vlgmr.msra.gmra.mrb[48].mxu0 %v10680_v51  ;;  %v9822_v20 = vld [vmem:[%s12931_s3 + $0x448] sm:$0xff]   ;;  %v1788_v26 = vrot.slane %v10938_v9, 4 }
 0x1f7   : > { %4182 = vmatprep.mubr.bf16.mxu0 %v10755_v59  ;;  %8712 = vmatpush3.bf16.msra.mxu0 %v9820_v38  ;;  %v11261_v59 = vpack.c.bf16 %v11022_v14, %v10994_v49  ;;  %v11278_v38 = vpack.c.bf16 %v11047_v5, %v11028_v31  ;;  %v13042_v49 = vld [vmem:[#allocation33_spill] sm:$0xff]  ;;  %v13044_v31 = vld [vmem:[#allocation22_spill] sm:$0xff]  ;;  %vm6802_vm0 = vcmask 260100  }
 0x1f8   : > { %v11220_v0 = vsel %vm1469_vm8, %v13040_v30, %v1471_v10  ;;  %v11225_v43 = vsel %vm407_vm2, %v13041_v13, %v1465_v16  ;;  %v11237_v30 = vsel %vm1486_vm4, %v1797_v50, %v1798_v4  ;;  %v11241_v10 = vpack.c.bf16 %v10895_v15, %v10798_v42  ;;  %9223 = vmatpush3.bf16.msra.mxu1 %v9816_v57  ;;  %v9825_v5 = vld [vmem:[%s12931_s3 + $0x450] sm:$0xff]  }
 0x1f9   : > { %v1876_v21 = vpack.c.bf16 %v10629_v27, %v11220_v0  ;;  %v1875_v18 = vpack.c.bf16 %v10632_v29, %v11225_v43  ;;  %v4483_v51 = vpack.c.bf16 %v11237_v30, %v11081_v39  ;;  %v1793_v16 = vrot.slane %v11092_v11, 4  ;;  %8713 = vmatprep.subr.bf16.mxu0 %v9821_v48  ;;  %9224 = vmatprep.subr.bf16.mxu1 %v9817_v62  ;;  %v13046_v13 = vld [vmem:[#allocation14_spill] sm:$0xff]  ;;  %v13082_v0 = vld [vmem:[#allocation29_spill] sm:$0xff]  ;;  %v9890_v29 = vld [vmem:[%s12931_s3 + $0x118] sm:$0xff]  }
 0x1fa   : > { %v11253_v50 = vpack.c.bf16 %v10967_v8, %v10865_v60  ;;  %v11257_v15 = vpack.c.bf16 %v11006_v56, %v10948_v33  ;;  %v11265_v42 = vpack.c.bf16 %v11038_v63, %v11011_v22  ;;  %v9818_v60 = vld [vmem:[%s12931_s3 + $0x258] sm:$0xff]   ;;  %v9824_v8 = vld [vmem:[%s12931_s3 + $0x490] sm:$0xff]   ;;  %v11282_v56 = vpack.c.bf16 %v11066_v12, %v13042_v49  ;;  %2461 = vmatmul.mubr.bf16.gmra.mrb[28].mxu1 %v13044_v31 }
 0x1fb   : > { %v11274_v33 = vsel %vm1475_vm5, %v1788_v26, %v1793_v16  ;;  %v13043_v22 = vld [vmem:[#allocation35_spill] sm:$0xff]  ;;  %v11292_v57 = vpack.c.bf16 %v10673_v53, %v11125_v47  ;;  %v11296_v48 = vpack.c.bf16 %v10685_v55, %v11130_v1  ;;  %8714 = vmatpush3.bf16.msra.mxu0 %v9822_v20  ;;  %v11304_v12 = vpack.c.bf16 %v10751_v52, %v11146_v45  ;;  %v13047_v16 = vld [vmem:[#allocation18_spill] sm:$0xff] }
 0x1fc   : > { %v11286_v14 = vpack.c.bf16 %v11098_v58, %v13043_v22  ;;  %v4482_v63 = vpack.c.bf16 %v11274_v33, %v10952_v40  ;;  %v11308_v58 = vpack.c.bf16 %v10869_v3, %v11151_v32  ;;  %v1787_v53 = vrot.slane %v10952_v40, 4  ;;  %v13045_v47 = vld [vmem:[#allocation27_spill] sm:$0xff]  ;;  %9225 = vmatpush3.bf16.msra.mxu1 %v9817_v62  ;;  %v9823_v32 = vld [vmem:[%s12931_s3 + $0x260] sm:$0xff]   ;;  %8715 = vmatprep.subr.bf16.mxu0 %v9824_v8  ;;  %v13057_v22 = vld [vmem:[#allocation37_spill] sm:$0xff] }
 0x1fd   : > { %2468 = vmatprep.mubr.bf16.mxu1 %v13045_v47  ;;  %v9827_v55 = vld [vmem:[%s12931_s3 + $0x498] sm:$0xff]   ;;  %v11317_v1 = vpack.c.bf16 %v11167_v2, %v11071_v46  ;;  %v11321_v52 = vpack.c.bf16 %v11206_v36, %v11108_v6  ;;  %v11325_v3 = vpack.c.bf16 %v10925_v7, %v11164_v24  ;;  %v1807_v45 = vrot.slane %v10938_v9, 7  ;;  %9226 = vmatprep.subr.bf16.mxu1 %v9818_v60  ;;  %v9889_v27 = vld [vmem:[%s12931_s3 + $0x110] sm:$0xff]  }
 0x1fe   : > { %v11332_v4 = vsel %vm1475_vm5, %v1787_v53, %v1788_v26  ;;  %v1808_v46 = vrot.slane %v11092_v11, 7  ;;  %v1802_v6 = vrot.slane %v10938_v9, 6  ;;  %v1803_v62 = vrot.slane %v11092_v11, 6  ;;  %4183 = vmatmul.mubr.bf16.gmra.mrb[52].mxu0 %v13046_v13  ;;  %v9828_v26 = vld [vmem:[%s12931_s3 + $0x458] sm:$0xff]   ;;  %v9829_v53 = vld [vmem:[%s12931_s3 + $0x4a0] sm:$0xff]   ;;  %v9893_v43 = vld [vmem:[%s12931_s3 + $0x130] sm:$0xff]  }
 0x1ff   : > { %4190 = vmatprep.mubr.bf16.mxu0 %v13047_v16  ;;  %8716 = vmatpush3.bf16.msra.mxu0 %v9825_v5  ;;  %v9826_v5 = vld [vmem:[%s12931_s3 + $0x268] sm:$0xff]   ;;  %v13051_v13 = vld [vmem:[#allocation23_spill] sm:$0xff]  ;;  %v1476_v30 = vrot.slane %v10579_v28, 4  ;;  %vm7248_vm4 = vcmask 125952  }
 0x200   : > { %v11347_v8 = vsel %vm1498_vm6, %v1807_v45, %v1808_v46  ;;  %v11350_v9 = vsel %vm1492_vm7, %v1802_v6, %v1803_v62  ;;  %9227 = vmatpush3.bf16.msra.mxu1 %v9818_v60  ;;  %8717 = vmatprep.subr.bf16.mxu0 %v9827_v55  ;;  %v13048_v45 = vld [vmem:[#allocation30_spill] sm:$0xff]  ;;  %v9830_v60 = vld [vmem:[%s12931_s3 + $0x460] sm:$0xff]   ;;  %v13049_v55 = vld [vmem:[#allocation31_spill] sm:$0xff] }
 0x201   : > { %9228 = vmatprep.subr.bf16.mxu1 %v9823_v32  ;;  %v9832_v46 = vld [vmem:[%s12931_s3 + $0x4a8] sm:$0xff]   ;;  %v9831_v6 = vld [vmem:[%s12931_s3 + $0x270] sm:$0xff]   ;;  %v9839_v20 = vld [vmem:[%s12931_s3 + $0x478] sm:$0xff]  }
 0x202   : > { %2469 = vmatmul.mubr.bf16.gmra.mrb[32].mxu1 %v13048_v45  ;;  %v13050_v62 = vld [vmem:[#allocation17_spill] sm:$0xff] }
 0x203   : > { %8718 = vmatpush3.bf16.msra.mxu0 %v9828_v26  ;;  %2476 = vmatprep.mubr.bf16.mxu1 %v13049_v55  ;;  %v9833_v16 = vld [vmem:[%s12931_s3 + $0x468] sm:$0xff]   ;;  %v9835_v26 = vld [vmem:[%s12931_s3 + $0x4b0] sm:$0xff]  }
 0x204   : > { %9229 = vmatpush3.bf16.msra.mxu1 %v9823_v32  ;;  %8719 = vmatprep.subr.bf16.mxu0 %v9829_v53  ;;  %v9834_v32 = vld [vmem:[%s12931_s3 + $0x278] sm:$0xff]   ;;  %v13052_v53 = vld [vmem:[#allocation32_spill] sm:$0xff] }
 0x205   : > { %9230 = vmatprep.subr.bf16.mxu1 %v9826_v5 }
 0x206   : > { %4191 = vmatmul.mubr.bf16.gmra.mrb[56].mxu0 %v13050_v62  ;;  %v13053_v62 = vld [vmem:[#allocation34_spill] sm:$0xff] }
 0x207   : > { %4198 = vmatprep.mubr.bf16.mxu0 %v13051_v13  ;;  %8720 = vmatpush3.bf16.msra.mxu0 %v9830_v60  ;;  %v9836_v60 = vld [vmem:[%s12931_s3 + $0x470] sm:$0xff]   ;;  %v13054_v13 = vld [vmem:[#allocation21_spill] sm:$0xff] }
 0x208   : > { %9231 = vmatpush3.bf16.msra.mxu1 %v9826_v5  ;;  %8721 = vmatprep.subr.bf16.mxu0 %v9832_v46  ;;  %v9837_v5 = vld [vmem:[%s12931_s3 + $0x4b8] sm:$0xff]   ;;  %v9838_v46 = vld [vmem:[%s12931_s3 + $0x40] sm:$0xff]  }
 0x209   : > { %9232 = vmatprep.subr.bf16.mxu1 %v9831_v6 }
 0x20a   : > { %2477 = vmatmul.mubr.bf16.gmra.mrb[36].mxu1 %v13052_v53 }
 0x20b   : > { %8722 = vmatpush3.bf16.msra.mxu0 %v9833_v16  ;;  %2484 = vmatprep.mubr.bf16.mxu1 %v13053_v62  ;;  %v13055_v16 = vld [vmem:[#allocation25_spill] sm:$0xff] }
 0x20c   : > { %9233 = vmatpush3.bf16.msra.mxu1 %v9831_v6  ;;  %8723 = vmatprep.subr.bf16.mxu0 %v9835_v26  ;;  %v9849_v6 = vld [vmem:[%s12931_s3 + $0x540] sm:$0xff]  }
 0x20d   : > { %9234 = vmatprep.subr.bf16.mxu1 %v9834_v32  ;;  %v13056_v26 = vld [vmem:[#allocation36_spill] sm:$0xff] }
 0x20e   : > { %4199 = vmatmul.mubr.bf16.gmra.mrb[60].mxu0 %v13054_v13  ;;  %v13059_v13 = vld [vmem:[#allocation5_spill] sm:$0xff] }
 0x20f   : > { %4206 = vmatprep.mubr.bf16.mxu0 %v13055_v16  ;;  %8724 = vmatpush3.bf16.msra.mxu0 %v9836_v60  ;;  %v13058_v60 = vpack.c.bf16 %v11081_v39, %v10974_v37  ;;  %v9841_v37 = vld [vmem:[%s12931_s3 + $0x48] sm:$0xff]   ;;  %v9844_v16 = vld [vmem:[%s12931_s3 + $0x10] sm:$0xff]  }
 0x210   : > { %9235 = vmatpush3.bf16.msra.mxu1 %v9834_v32  ;;  %8725 = vmatprep.subr.bf16.mxu0 %v9837_v5  ;;  %v1992_v32 = vpack.c.bf16 %v11089_v17, %v13059_v13  ;;  %v13060_v5 = vpack.c.bf16 %v10952_v40, %v10979_v34  ;;  %v9851_v17 = vld [vmem:[%s12931_s3 + $0x500] sm:$0xff]   ;;  %v9842_v34 = vld [vmem:[%s12931_s3 + $0x8] sm:$0xff]   ;;  %v9894_v40 = vld [vmem:[%s12931_s3 + $0x138] sm:$0xff]  }
 0x211   : > { %8423 = vmatprep.subr.bf16.mxu1 %v9838_v46  ;;  %v9855_v46 = vld [vmem:[%s12931_s3 + $0x508] sm:$0xff]  }
 0x212   : > { %2485 = vmatmul.mubr.bf16.gmra.mrb[40].mxu1 %v13056_v26  ;;  %v9892_v39 = vld [vmem:[%s12931_s3 + $0x128] sm:$0xff]  }
 0x213   : > { %8726 = vmatpush3.bf16.msra.mxu0 %v9839_v20  ;;  %2492 = vmatprep.mubr.bf16.mxu1 %v13057_v22  ;;  %v9843_v20 = vld [vmem:[%s12931_s3 + $0x50] sm:$0xff]  }
 0x214   : > { %8777 = vmatprep.subr.bf16.mxu0 %v9849_v6  ;;  %v9845_v6 = vld [vmem:[%s12931_s3 + $0x58] sm:$0xff]  }
 0x216   : > { %4207 = vmatmul.mubr.bf16.gmra.mrb[64].mxu0 %v10933_v61  ;;  %v9840_v61 = vld [vmem:[%s12931_s3] sm:$0xff]  }
 0x217   : > { %4214 = vmatprep.mubr.bf16.mxu0 %v13058_v60  ;;  %v9859_v60 = vld [vmem:[%s12931_s3 + $0x510] sm:$0xff]  }
 0x21a   : > { %2493 = vmatmul.mubr.bf16.gmra.mrb[44].mxu1 %v11116_v41 }
 0x21b   : > { %9236 = vmatprep.mubr.bf16.mxu1 %v1992_v32  ;;  %v13062_v32 = vld [vmem:[#allocation40_spill] sm:$0xff] }
 0x21e   : > { %4215 = vmatmul.mubr.bf16.gmra.mrb[68].mxu0 %v13060_v5  ;;  %v9846_v5 = vld [vmem:[%s12931_s3 + $0x18] sm:$0xff]  }
 0x21f   : > { %4255 = vmatprep.mubr.bf16.mxu0 %v10811_v23  ;;  %v9853_v23 = vld [vmem:[%s12931_s3 + $0x548] sm:$0xff]  }
 0x222   : > { %9237 = vmatmul.mubr.bf16.vlgmr.msra.gmra.mrb[48].mxu1 %v11137_v19 }
 0x223   : > { %8424 = vmatpush3.bf16.msra.mxu1 %v9840_v61  ;;  %9240 = vmatprep.mubr.bf16.mxu1 %v11141_v25  ;;  %v9861_v61 = vld [vmem:[%s12931_s3 + $0x558] sm:$0xff]  }
 0x224   : > { %8425 = vmatprep.subr.bf16.mxu1 %v9841_v37  ;;  %v9847_v37 = vld [vmem:[%s12931_s3 + $0x60] sm:$0xff]  }
 0x226   : > { %4256 = vmatmul.mubr.bf16.vlgmr.msra.gmra.mrb[72].mxu0 %v13044_v31  ;;  %v9857_v31 = vld [vmem:[%s12931_s3 + $0x550] sm:$0xff]  }
 0x227   : > { %4263 = vmatprep.mubr.bf16.mxu0 %v13045_v47  ;;  %8778 = vmatpush3.bf16.msra.mxu0 %v9851_v17  ;;  %v13061_v47 = vld [vmem:[#allocation39_spill] sm:$0xff] }
 0x228   : > { %8426 = vmatpush3.bf16.msra.mxu1 %v9842_v34  ;;  %8779 = vmatprep.subr.bf16.mxu0 %v9853_v23  ;;  %v9863_v17 = vld [vmem:[%s12931_s3 + $0x518] sm:$0xff]   ;;  %v9848_v34 = vld [vmem:[%s12931_s3 + $0x20] sm:$0xff]   ;;  %v9850_v23 = vld [vmem:[%s12931_s3 + $0x68] sm:$0xff]  }
 0x229   : > { %8427 = vmatprep.subr.bf16.mxu1 %v9843_v20  ;;  %v9866_v20 = vld [vmem:[%s12931_s3 + $0x520] sm:$0xff]  }
 0x22a   : > { %9241 = vmatmul.mubr.bf16.gmra.mrb[52].mxu1 %v13061_v47 }
 0x22b   : > { %8780 = vmatpush3.bf16.msra.mxu0 %v9855_v46  ;;  %9244 = vmatprep.mubr.bf16.mxu1 %v13062_v32  ;;  %v13064_v46 = vld [vmem:[#allocation8_spill] sm:$0xff] }
 0x22c   : > { %8428 = vmatpush3.bf16.msra.mxu1 %v9844_v16  ;;  %8781 = vmatprep.subr.bf16.mxu0 %v9857_v31  ;;  %v13065_v16 = vld [vmem:[#allocation7_spill] sm:$0xff]  ;;  %v9852_v31 = vld [vmem:[%s12931_s3 + $0x28] sm:$0xff]  }
 0x22d   : > { %8429 = vmatprep.subr.bf16.mxu1 %v9845_v6  ;;  %v13066_v6 = vpack.c.bf16 %v13064_v46, %v13065_v16  ;;  %v9864_v46 = vld [vmem:[%s12931_s3 + $0x80] sm:$0xff]   ;;  %v13067_v16 = vld [vmem:[#allocation9_spill] sm:$0xff] }
 0x22e   : > { %4264 = vmatmul.mubr.bf16.gmra.mrb[76].mxu0 %v13048_v45  ;;  %v9865_v45 = vld [vmem:[%s12931_s3 + $0x560] sm:$0xff]  }
 0x22f   : > { %4271 = vmatprep.mubr.bf16.mxu0 %v13049_v55  ;;  %8782 = vmatpush3.bf16.msra.mxu0 %v9859_v60  ;;  %v13063_v55 = vld [vmem:[#allocation41_spill] sm:$0xff] }
 0x230   : > { %8430 = vmatpush3.bf16.msra.mxu1 %v9846_v5  ;;  %8783 = vmatprep.subr.bf16.mxu0 %v9861_v61  ;;  %v9869_v60 = vld [vmem:[%s12931_s3 + $0x568] sm:$0xff]   ;;  %v9854_v5 = vld [vmem:[%s12931_s3 + $0x70] sm:$0xff]  }
 0x231   : > { %8431 = vmatprep.subr.bf16.mxu1 %v9847_v37  ;;  %v9870_v61 = vld [vmem:[%s12931_s3 + $0x528] sm:$0xff]   ;;  %v9856_v37 = vld [vmem:[%s12931_s3 + $0x30] sm:$0xff]  }
 0x232   : > { %9245 = vmatmul.mubr.bf16.gmra.mrb[56].mxu1 %v13063_v55 }
 0x233   : > { %8784 = vmatpush3.bf16.msra.mxu0 %v9863_v17  ;;  %2854 = vmatprep.mubr.bf16.mxu1 %v13066_v6  ;;  %v9871_v17 = vld [vmem:[%s12931_s3 + $0x570] sm:$0xff]   ;;  %v1873_v6 = vpack.c.bf16 %v13067_v16, %v10579_v28 }
 0x234   : > { %8432 = vmatpush3.bf16.msra.mxu1 %v9848_v34  ;;  %8785 = vmatprep.subr.bf16.mxu0 %v9865_v45  ;;  %v9860_v34 = vld [vmem:[%s12931_s3 + $0x38] sm:$0xff]   ;;  %v9862_v45 = vld [vmem:[%s12931_s3 + $0xc0] sm:$0xff]   ;;  %v9884_v16 = vld [vmem:[%s12931_s3 + $0xb0] sm:$0xff]  }
 0x235   : > { %8433 = vmatprep.subr.bf16.mxu1 %v9850_v23  ;;  %v9875_v23 = vld [vmem:[%s12931_s3 + $0x578] sm:$0xff]  }
 0x236   : > { %4272 = vmatmul.mubr.bf16.gmra.mrb[80].mxu0 %v13052_v53  ;;  %v9858_v53 = vld [vmem:[%s12931_s3 + $0x78] sm:$0xff]  }
 0x237   : > { %4279 = vmatprep.mubr.bf16.mxu0 %v13053_v62  ;;  %8786 = vmatpush3.bf16.msra.mxu0 %v9866_v20  ;;  %v9873_v62 = vld [vmem:[%s12931_s3 + $0x530] sm:$0xff]   ;;  %v9876_v20 = vld [vmem:[%s12931_s3 + $0x538] sm:$0xff]  }
 0x238   : > { %8434 = vmatpush3.bf16.msra.mxu1 %v9852_v31  ;;  %8787 = vmatprep.subr.bf16.mxu0 %v9869_v60  ;;  %v9868_v31 = vld [vmem:[%s12931_s3 + $0x88] sm:$0xff]   ;;  %v9872_v60 = vld [vmem:[%s12931_s3 + $0xd0] sm:$0xff]  }
 0x239   : > { %8435 = vmatprep.subr.bf16.mxu1 %v9854_v5  ;;  %v13069_v5 = vpack.c.bf16 %v11190_v54, %v11167_v2  ;;  %v9879_v2 = vld [vmem:[%s12931_s3 + $0xe0] sm:$0xff]  }
 0x23b   : > { %8788 = vmatpush3.bf16.msra.mxu0 %v9870_v61  ;;  %v9874_v61 = vld [vmem:[%s12931_s3 + $0x90] sm:$0xff]  }
 0x23c   : > { %8436 = vmatpush3.bf16.msra.mxu1 %v9856_v37  ;;  %8789 = vmatprep.subr.bf16.mxu0 %v9871_v17  ;;  %v9877_v37 = vld [vmem:[%s12931_s3 + $0xd8] sm:$0xff]  }
 0x23d   : > { %8437 = vmatprep.subr.bf16.mxu1 %v9858_v53  ;;  %v13070_v17 = vld [vmem:[#allocation11_spill] sm:$0xff]  ;;  %v13071_v53 = vld [vmem:[#allocation12_spill] sm:$0xff] }
 0x23e   : > { %4280 = vmatmul.mubr.bf16.gmra.mrb[84].mxu0 %v13056_v26  ;;  %v9867_v26 = vld [vmem:[%s12931_s3 + $0xc8] sm:$0xff]  }
 0x23f   : > { %4287 = vmatprep.mubr.bf16.mxu0 %v13057_v22  ;;  %8790 = vmatpush3.bf16.msra.mxu0 %v9873_v62  ;;  %v13068_v22 = vld [vmem:[#allocation10_spill] sm:$0xff]  ;;  %v13072_v62 = vpack.c.bf16 %v11209_v44, %v11206_v36  ;;  %v9882_v36 = vld [vmem:[%s12931_s3 + $0xa8] sm:$0xff]  }
 0x240   : > { %8438 = vmatpush3.bf16.msra.mxu1 %v9860_v34  ;;  %8791 = vmatprep.subr.bf16.mxu0 %v9875_v23  ;;  %v9880_v34 = vld [vmem:[%s12931_s3 + $0xa0] sm:$0xff]   ;;  %v9881_v23 = vld [vmem:[%s12931_s3 + $0xe8] sm:$0xff]  }
 0x241   : > { %8475 = vmatprep.subr.bf16.mxu1 %v9862_v45  ;;  %v13073_v45 = vld [vmem:[#allocation13_spill] sm:$0xff] }
 0x243   : > { %2855 = vmatmul.mubr.bf16.vlgmr.msra.gmra.mrb[60].mxu1 %v1873_v6  ;;  %8792 = vmatpush3.bf16.msra.mxu0 %v9876_v20  ;;  %v13074_v20 = vld [vmem:[#allocation15_spill] sm:$0xff] }
 0x244   : > { %2862 = vmatprep.mubr.bf16.mxu1 %v13068_v22  ;;  %8476 = vmatpush3.bf16.msra.mxu1 %v9864_v46  ;;  %v9883_v46 = vld [vmem:[%s12931_s3 + $0xf0] sm:$0xff]   ;;  %v9885_v6 = vld [vmem:[%s12931_s3 + $0xf8] sm:$0xff]  }
 0x245   : > { %8477 = vmatprep.subr.bf16.mxu1 %v9867_v26  ;;  %v13075_v26 = vld [vmem:[#allocation16_spill] sm:$0xff]  ;;  %v13076_v22 = vld [vmem:[#allocation19_spill] sm:$0xff] }
 0x246   : > { %4288 = vmatmul.mubr.bf16.gmra.mrb[88].mxu0 %v11116_v41  ;;  %v9878_v41 = vld [vmem:[%s12931_s3 + $0x98] sm:$0xff]  }
 0x247   : > { %4295 = vmatprep.mubr.bf16.mxu0 %v13069_v5  ;;  %v13077_v5 = vld [vmem:[#allocation20_spill] sm:$0xff] }
 0x248   : > { %8478 = vmatpush3.bf16.msra.mxu1 %v9868_v31  ;;  %v9886_v31 = vld [vmem:[%s12931_s3 + $0xb8] sm:$0xff]  }
 0x249   : > { %8479 = vmatprep.subr.bf16.mxu1 %v9872_v60  ;;  %v9887_v60 = vld [vmem:[%s12931_s3 + $0x100] sm:$0xff]  }
 0x24b   : > { %2863 = vmatmul.mubr.bf16.gmra.mrb[64].mxu1 %v13070_v17  ;;  %v13080_v17 = vld [vmem:[#allocation28_spill] sm:$0xff] }
 0x24c   : > { %2870 = vmatprep.mubr.bf16.mxu1 %v13071_v53  ;;  %8480 = vmatpush3.bf16.msra.mxu1 %v9874_v61  ;;  %v13078_v61 = vld [vmem:[#allocation24_spill] sm:$0xff] }
 0x24d   : > { %8481 = vmatprep.subr.bf16.mxu1 %v9877_v37  ;;  %v13079_v37 = vld [vmem:[#allocation26_spill] sm:$0xff] }
 0x24e   : > { %4296 = vmatmul.mubr.bf16.gmra.mrb[92].mxu0 %v13072_v62 }
 0x24f   : > { %4840 = vmatprep.mubr.bf16.mxu0 %v13071_v53  ;;  %v9888_v53 = vld [vmem:[%s12931_s3 + $0x108] sm:$0xff]  }
 0x250   : > { %8482 = vmatpush3.bf16.msra.mxu1 %v9878_v41  ;;  %v13081_v41 = vld [vmem:[#allocation42_spill] sm:$0xff] }
 0x251   : > { %8483 = vmatprep.subr.bf16.mxu1 %v9879_v2 }
 0x253   : > { %2871 = vmatmul.mubr.bf16.gmra.mrb[68].mxu1 %v13073_v45 }
 0x254   : > { %2878 = vmatprep.mubr.bf16.mxu1 %v13074_v20  ;;  %8484 = vmatpush3.bf16.msra.mxu1 %v9880_v34 }
 0x255   : > { %8485 = vmatprep.subr.bf16.mxu1 %v9881_v23 }
 0x256   : > { %4841 = vmatmul.mubr.bf16.vlgmr.msra.gmra.mrb[96].mxu0 %v13073_v45 }
 0x257   : > { %4848 = vmatprep.mubr.bf16.mxu0 %v13074_v20 }
 0x258   : > { %8486 = vmatpush3.bf16.msra.mxu1 %v9882_v36 }
 0x259   : > { %8487 = vmatprep.subr.bf16.mxu1 %v9883_v46 }
 0x25b   : > { %2879 = vmatmul.mubr.bf16.gmra.mrb[72].mxu1 %v13075_v26 }
 0x25c   : > { %2886 = vmatprep.mubr.bf16.mxu1 %v13076_v22  ;;  %8488 = vmatpush3.bf16.msra.mxu1 %v9884_v16 }
 0x25d   : > { %8489 = vmatprep.subr.bf16.mxu1 %v9885_v6 }
 0x25e   : > { %4849 = vmatmul.mubr.bf16.gmra.mrb[100].mxu0 %v13075_v26 }
 0x25f   : > { %4856 = vmatprep.mubr.bf16.mxu0 %v13076_v22 }
 0x260   : > { %8490 = vmatpush3.bf16.msra.mxu1 %v9886_v31 }
 0x261   : > { %9248 = vmatprep.subr.bf16.mxu1 %v9887_v60 }
 0x263   : > { %2887 = vmatmul.mubr.bf16.gmra.mrb[76].mxu1 %v13077_v5 }
 0x264   : > { %2894 = vmatprep.mubr.bf16.mxu1 %v13078_v61 }
 0x266   : > { %4857 = vmatmul.mubr.bf16.gmra.mrb[104].mxu0 %v13077_v5 }
 0x267   : > { %4864 = vmatprep.mubr.bf16.mxu0 %v13078_v61 }
 0x26b   : > { %2895 = vmatmul.mubr.bf16.gmra.mrb[80].mxu1 %v13079_v37 }
 0x26c   : > { %2935 = vmatprep.mubr.bf16.mxu1 %v1876_v21  ;;  %v9895_v21 = vld [vmem:[%s12931_s3 + $0x340] sm:$0xff]  }
 0x26e   : > { %4865 = vmatmul.mubr.bf16.gmra.mrb[108].mxu0 %v13079_v37  ;;  %v9896_v37 = vld [vmem:[%s12931_s3 + $0x300] sm:$0xff]  }
 0x26f   : > { %4872 = vmatprep.mubr.bf16.mxu0 %v13080_v17 }
 0x273   : > { %2936 = vmatmul.mubr.bf16.vlgmr.msra.gmra.mrb[84].mxu1 %v1875_v18  ;;  %v9891_v18 = vld [vmem:[%s12931_s3 + $0x120] sm:$0xff]  }
 0x274   : > { %2943 = vmatprep.mubr.bf16.mxu1 %v13081_v41  ;;  %9249 = vmatpush3.bf16.msra.mxu1 %v9887_v60 }
 0x275   : > { %9250 = vmatprep.subr.bf16.mxu1 %v9888_v53 }
 0x276   : > { %4873 = vmatmul.mubr.bf16.gmra.mrb[112].mxu0 %v13082_v0 }
 0x277   : > { %4880 = vmatprep.mubr.bf16.mxu0 %v4483_v51 }
 0x278   : > { %9251 = vmatpush3.bf16.msra.mxu1 %v9888_v53  ;;  %v9897_v53 = vld [vmem:[%s12931_s3 + $0x348] sm:$0xff]  }
 0x279   : > { %9252 = vmatprep.subr.bf16.mxu1 %v9889_v27 }
 0x27b   : > { %2944 = vmatmul.mubr.bf16.gmra.mrb[88].mxu1 %v11229_v35 }
 0x27c   : > { %2951 = vmatprep.mubr.bf16.mxu1 %v11241_v10  ;;  %9253 = vmatpush3.bf16.msra.mxu1 %v9889_v27 }
 0x27d   : > { %9254 = vmatprep.subr.bf16.mxu1 %v9890_v29 }
 0x27e   : > { %4881 = vmatmul.mubr.bf16.gmra.mrb[116].mxu0 %v4482_v63  ;;  %v13083_v63 = vld [vmem:[#allocation6_spill] sm:$0xff] }
 0x27f   : > { %v13084_v2 = vrot.slane %v13083_v63, 4 }
 0x280   : > { %9255 = vmatpush3.bf16.msra.mxu1 %v9890_v29 }
 0x281   : > { %9256 = vmatprep.subr.bf16.mxu1 %v9891_v18  ;;  %v1478_v62 = vsel %vm1475_vm5, %v1476_v30, %v13084_v2  ;;  %v9899_v30 = vld [vmem:[%s12931_s3 + $0x350] sm:$0xff]  }
 0x282   : > { %v1877_v16 = vpack.c.bf16 %v13059_v13, %v1478_v62  ;;  %v9900_v62 = vld [vmem:[%s12931_s3 + $0x310] sm:$0xff]  }
 0x283   : > { %2952 = vmatmul.mubr.bf16.gmra.mrb[92].mxu1 %v11253_v50 }
 0x284   : > { %2959 = vmatprep.mubr.bf16.mxu1 %v11257_v15  ;;  %9257 = vmatpush3.bf16.msra.mxu1 %v9891_v18  ;;  %v13088_v18 = vld [vmem:[#allocation38_spill] sm:$0xff] }
 0x285   : > { %9258 = vmatprep.subr.bf16.mxu1 %v9892_v39 }
 0x288   : > { %9259 = vmatpush3.bf16.msra.mxu1 %v9892_v39 }
 0x289   : > { %9260 = vmatprep.subr.bf16.mxu1 %v9893_v43 }
 0x28b   : > { %2960 = vmatmul.mubr.bf16.gmra.mrb[96].mxu1 %v11261_v59 }
 0x28c   : > { %2967 = vmatprep.mubr.bf16.mxu1 %v11265_v42  ;;  %9261 = vmatpush3.bf16.msra.mxu1 %v9893_v43 }
 0x28d   : > { %9262 = vmatprep.subr.bf16.mxu1 %v9894_v40 }
 0x290   : > { %9263 = vmatpush3.bf16.msra.mxu1 %v9894_v40  ;;  %v9898_v40 = vld [vmem:[%s12931_s3 + $0x308] sm:$0xff]  }
 0x291   : > { %8593 = vmatprep.subr.bf16.mxu1 %v9895_v21 }
 0x293   : > { %2968 = vmatmul.mubr.bf16.gmra.mrb[100].mxu1 %v11278_v38 }
 0x294   : > { %2975 = vmatprep.mubr.bf16.mxu1 %v11282_v56 }
 0x295   : > { %v8321_v51 = vpop.f32.mrb[0].mxu1 }
 0x296   : > { %v8322_v33 = vpop.f32.mrb[1].mxu1 }
 0x297   : > { %v11651_v34 = vadd.f32 %v8322_v33, %v8321_v51  ;;  %v8324_v23 = vpop.f32.mrb[2].mxu1 }
 0x298   : > { %v8557_v45 = vpop.f32.mrb[24].mxu0  ;;  %v8325_v20 = vpop.f32.mrb[3].mxu1 }
 0x299   : > { %v11653_v36 = vadd.f32 %v8325_v20, %v8324_v23  ;;  %v8558_v46 = vpop.f32.mrb[25].mxu0  ;;  %v9901_v20 = vld [vmem:[%s12931_s3 + $0x358] sm:$0xff]  }
 0x29a   : > { %v11656_v6 = vadd.f32 %v8558_v46, %v8557_v45  ;;  %v8560_v28 = vpop.f32.mrb[26].mxu0 }
 0x29b   : > { %2976 = vmatmul.mubr.bf16.gmra.mrb[104].mxu1 %v11286_v14  ;;  %v8561_v26 = vpop.f32.mrb[27].mxu0 }
 0x29c   : > { %13085 = vst [vmem:[#allocation33_spill] sm:$0xff] %v11656_v6  ;;  %9264 = vmatprep.mubr.bf16.mxu1 %v1877_v16  ;;  %v11659_v22 = vadd.f32 %v8561_v26, %v8560_v28 }
 0x29d   : > { %v8327_v31 = vpop.f32.mrb[4].mxu1 }
 0x29e   : > { %13086 = vst [vmem:[#allocation35_spill] sm:$0xff] %v11659_v22  ;;  %v8328_v60 = vpop.f32.mrb[5].mxu1 }
 0x29f   : > { %v11661_v5 = vadd.f32 %v8328_v60, %v8327_v31  ;;  %v8330_v61 = vpop.f32.mrb[6].mxu1  ;;  %v9902_v60 = vld [vmem:[%s12931_s3 + $0x318] sm:$0xff]  }
 0x2a0   : > { %v8563_v17 = vpop.f32.mrb[28].mxu0  ;;  %v8331_v13 = vpop.f32.mrb[7].mxu1 }
 0x2a1   : > { %v11669_v27 = vadd.f32 %v8331_v13, %v8330_v61  ;;  %v8564_v0 = vpop.f32.mrb[29].mxu0 }
 0x2a2   : > { %v11671_v29 = vadd.f32 %v8564_v0, %v8563_v17  ;;  %v8566_v39 = vpop.f32.mrb[30].mxu0 }
 0x2a3   : > { %9265 = vmatmul.mubr.bf16.vlgmr.msra.gmra.mrb[48].mxu1 %v13088_v18  ;;  %v8567_v43 = vpop.f32.mrb[31].mxu0 }
 0x2a4   : > { %13087 = vst [vmem:[#allocation22_spill] sm:$0xff] %v11671_v29  ;;  %8594 = vmatpush3.bf16.msra.mxu1 %v9896_v37  ;;  %9268 = vmatprep.mubr.bf16.mxu1 %v11292_v57  ;;  %v11678_v21 = vadd.f32 %v8567_v43, %v8566_v39  ;;  %v9903_v37 = vld [vmem:[%s12931_s3 + $0x360] sm:$0xff]  }
 0x2a5   : > { %8595 = vmatprep.subr.bf16.mxu1 %v9897_v53  ;;  %v8333_v51 = vpop.f32.mrb[8].mxu1  ;;  %v9904_v39 = vld [vmem:[%s12931_s3 + $0x320] sm:$0xff]  }
 0x2a6   : > { %13089 = vst [vmem:[#allocation27_spill] sm:$0xff] %v11678_v21  ;;  %v8334_v33 = vpop.f32.mrb[9].mxu1 }
 0x2a7   : > { %v11683_v63 = vadd.f32 %v8334_v33, %v8333_v51  ;;  %v8336_v2 = vpop.f32.mrb[10].mxu1 }
 0x2a8   : > { %8596 = vmatpush3.bf16.msra.mxu1 %v9898_v40  ;;  %v8569_v23 = vpop.f32.mrb[32].mxu0  ;;  %v8337_v45 = vpop.f32.mrb[11].mxu1 }
 0x2a9   : > { %8597 = vmatprep.subr.bf16.mxu1 %v9899_v30  ;;  %v11691_v46 = vadd.f32 %v8337_v45, %v8336_v2  ;;  %v8570_v16 = vpop.f32.mrb[33].mxu0  ;;  %v9905_v30 = vld [vmem:[%s12931_s3 + $0x368] sm:$0xff]  }
 0x2aa   : > { %v11693_v28 = vadd.f32 %v8570_v16, %v8569_v23  ;;  %v8572_v26 = vpop.f32.mrb[34].mxu0  ;;  %v9906_v45 = vld [vmem:[%s12931_s3 + $0x328] sm:$0xff]   ;;  %v9907_v16 = vld [vmem:[%s12931_s3 + $0x370] sm:$0xff]  }
 0x2ab   : > { %9269 = vmatmul.mubr.bf16.gmra.mrb[52].mxu1 %v11296_v48  ;;  %v8573_v31 = vpop.f32.mrb[35].mxu0 }
 0x2ac   : > { %13090 = vst [vmem:[#allocation14_spill] sm:$0xff] %v11693_v28  ;;  %8598 = vmatpush3.bf16.msra.mxu1 %v9900_v62  ;;  %9272 = vmatprep.mubr.bf16.mxu1 %v11304_v12  ;;  %v11700_v61 = vadd.f32 %v8573_v31, %v8572_v26 }
 0x2ad   : > { %8599 = vmatprep.subr.bf16.mxu1 %v9901_v20  ;;  %v8339_v17 = vpop.f32.mrb[12].mxu1 }
 0x2ae   : > { %13091 = vst [vmem:[#allocation18_spill] sm:$0xff] %v11700_v61  ;;  %v8340_v13 = vpop.f32.mrb[13].mxu1 }
 0x2af   : > { %v11705_v53 = vadd.f32 %v8340_v13, %v8339_v17  ;;  %v8342_v0 = vpop.f32.mrb[14].mxu1 }
 0x2b0   : > { %8600 = vmatpush3.bf16.msra.mxu1 %v9902_v60  ;;  %v8343_v40 = vpop.f32.mrb[15].mxu1 }
 0x2b1   : > { %v8575_v43 = vpop.f32.mrb[36].mxu0  ;;  %8601 = vmatprep.subr.bf16.mxu1 %v9903_v37  ;;  %v11713_v51 = vadd.f32 %v8343_v40, %v8342_v0  ;;  %v9909_v0 = vld [vmem:[%s12931_s3 + $0x378] sm:$0xff]  }
 0x2b2   : > { %v8576_v33 = vpop.f32.mrb[37].mxu0 }
 0x2b3   : > { %v11715_v2 = vadd.f32 %v8576_v33, %v8575_v43  ;;  %9273 = vmatmul.mubr.bf16.gmra.mrb[56].mxu1 %v11308_v58  ;;  %v8578_v62 = vpop.f32.mrb[38].mxu0 }
 0x2b4   : > { %8602 = vmatpush3.bf16.msra.mxu1 %v9904_v39  ;;  %v8579_v23 = vpop.f32.mrb[39].mxu0  ;;  %3589 = vmatprep.mubr.bf16.mxu1 %v13081_v41  ;;  %v9908_v41 = vld [vmem:[%s12931_s3 + $0x330] sm:$0xff]  }
 0x2b5   : > { %13092 = vst [vmem:[#allocation30_spill] sm:$0xff] %v11715_v2  ;;  %v11722_v20 = vadd.f32 %v8579_v23, %v8578_v62  ;;  %8603 = vmatprep.subr.bf16.mxu1 %v9905_v30  ;;  %v8345_v26 = vpop.f32.mrb[16].mxu1  ;;  %v9910_v62 = vld [vmem:[%s12931_s3 + $0x338] sm:$0xff]  }
 0x2b6   : > { %v8346_v31 = vpop.f32.mrb[17].mxu1 }
 0x2b7   : > { %13093 = vst [vmem:[#allocation31_spill] sm:$0xff] %v11722_v20  ;;  %v11727_v60 = vadd.f32 %v8346_v31, %v8345_v26  ;;  %v8348_v37 = vpop.f32.mrb[18].mxu1 }
 0x2b8   : > { %8604 = vmatpush3.bf16.msra.mxu1 %v9906_v45  ;;  %v8349_v13 = vpop.f32.mrb[19].mxu1  ;;  %v9911_v45 = vld [vmem:[%s12931_s3 + $0x380] sm:$0xff]  }
 0x2b9   : > { %v8581_v17 = vpop.f32.mrb[40].mxu0  ;;  %8605 = vmatprep.subr.bf16.mxu1 %v9907_v16  ;;  %v11735_v39 = vadd.f32 %v8349_v13, %v8348_v37  ;;  %v9912_v13 = vld [vmem:[%s12931_s3 + $0x388] sm:$0xff]  }
 0x2ba   : > { %v8582_v43 = vpop.f32.mrb[41].mxu0 }
 0x2bb   : > { %v11737_v40 = vadd.f32 %v8582_v43, %v8581_v17  ;;  %v8584_v30 = vpop.f32.mrb[42].mxu0 }
 0x2bc   : > { %8606 = vmatpush3.bf16.msra.mxu1 %v9908_v41  ;;  %v8585_v33 = vpop.f32.mrb[43].mxu0 }
 0x2bd   : > { %13094 = vst [vmem:[#allocation17_spill] sm:$0xff] %v11737_v40  ;;  %v11742_v23 = vadd.f32 %v8585_v33, %v8584_v30  ;;  %8607 = vmatprep.subr.bf16.mxu1 %v9909_v0  ;;  %v8351_v16 = vpop.f32.mrb[20].mxu1 }
 0x2be   : > { %v8352_v26 = vpop.f32.mrb[21].mxu1 }
 0x2bf   : > { %13095 = vst [vmem:[#allocation23_spill] sm:$0xff] %v11742_v23  ;;  %v11747_v31 = vadd.f32 %v8352_v26, %v8351_v16  ;;  %v8354_v37 = vpop.f32.mrb[22].mxu1  ;;  %v9913_v26 = vld [vmem:[%s12931_s3 + $0x390] sm:$0xff]  }
 0x2c0   : > { %8608 = vmatpush3.bf16.msra.mxu1 %v9910_v62  ;;  %v8355_v41 = vpop.f32.mrb[23].mxu1 }
 0x2c1   : > { %v8587_v17 = vpop.f32.mrb[44].mxu0  ;;  %9276 = vmatprep.subr.bf16.mxu1 %v9911_v45  ;;  %v11752_v43 = vadd.f32 %v8355_v41, %v8354_v37 }
 0x2c2   : > { %v8588_v0 = vpop.f32.mrb[45].mxu0 }
 0x2c3   : > { %v11754_v30 = vadd.f32 %v8588_v0, %v8587_v17  ;;  %3590 = vmatmul.mubr.bf16.vlgmr.msra.gmra.mrb[108].mxu1 %v11229_v35  ;;  %v8590_v33 = vpop.f32.mrb[46].mxu0  ;;  %v9914_v35 = vld [vmem:[%s12931_s3 + $0x398] sm:$0xff]  }
 0x2c4   : > { %3597 = vmatprep.mubr.bf16.mxu1 %v11241_v10  ;;  %9277 = vmatpush3.bf16.msra.mxu1 %v9911_v45  ;;  %v8591_v62 = vpop.f32.mrb[47].mxu0 }
 0x2c5   : > { %13096 = vst [vmem:[#allocation32_spill] sm:$0xff] %v11754_v30  ;;  %v11758_v16 = vadd.f32 %v8591_v62, %v8590_v33  ;;  %9278 = vmatprep.subr.bf16.mxu1 %v9912_v13  ;;  %v8373_v49 = vpop.f32.mrb[24].mxu1 }
 0x2c6   : > { %v8374_v37 = vpop.f32.mrb[25].mxu1 }
 0x2c7   : > { %13097 = vst [vmem:[#allocation34_spill] sm:$0xff] %v11758_v16  ;;  %v8375_v41 = vadd.f32 %v8374_v37, %v8373_v49  ;;  %v8376_v24 = vpop.f32.mrb[26].mxu1 }
 0x2c8   : > { %9279 = vmatpush3.bf16.msra.mxu1 %v9912_v13  ;;  %v8377_v0 = vpop.f32.mrb[27].mxu1 }
 0x2c9   : > { %v8675_v17 = vpop.f32.mrb[48].mxu0  ;;  %9280 = vmatprep.subr.bf16.mxu1 %v9913_v26  ;;  %v11767_v45 = vadd.f32 %v8375_v41, %v11651_v34  ;;  %v8378_v33 = vadd.f32 %v8377_v0, %v8376_v24  ;;  %v9915_v24 = vld [vmem:[%s12931_s3 + $0x3a0] sm:$0xff]  }
 0x2ca   : > { %v8676_v62 = vpop.f32.mrb[49].mxu0 }
 0x2cb   : > { %3598 = vmatmul.mubr.bf16.gmra.mrb[112].mxu1 %v11253_v50  ;;  %v11770_v16 = vadd.f32 %v8676_v62, %v8675_v17  ;;  %v8678_v30 = vpop.f32.mrb[50].mxu0  ;;  %v11773_v49 = vadd.f32 %v8378_v33, %v11653_v36  ;;  %v9916_v36 = vld [vmem:[%s12931_s3 + $0x3a8] sm:$0xff]  }
 0x2cc   : > { %3605 = vmatprep.mubr.bf16.mxu1 %v11257_v15  ;;  %v8679_v13 = vpop.f32.mrb[51].mxu0  ;;  %9281 = vmatpush3.bf16.msra.mxu1 %v9913_v26 }
 0x2cd   : > { %v11776_v37 = vadd.f32 %v8679_v13, %v8678_v30  ;;  %9282 = vmatprep.subr.bf16.mxu1 %v9914_v35  ;;  %v8379_v34 = vpop.f32.mrb[28].mxu1 }
 0x2ce   : > { %v8380_v41 = vpop.f32.mrb[29].mxu1 }
 0x2cf   : > { %v8381_v0 = vadd.f32 %v8380_v41, %v8379_v34  ;;  %v8382_v17 = vpop.f32.mrb[30].mxu1 }
 0x2d0   : > { %9283 = vmatpush3.bf16.msra.mxu1 %v9914_v35  ;;  %v8383_v23 = vpop.f32.mrb[31].mxu1 }
 0x2d1   : > { %v8681_v62 = vpop.f32.mrb[52].mxu0  ;;  %9284 = vmatprep.subr.bf16.mxu1 %v9915_v24  ;;  %v11785_v30 = vadd.f32 %v8381_v0, %v11661_v5  ;;  %v8384_v26 = vadd.f32 %v8383_v23, %v8382_v17  ;;  %v9917_v5 = vld [vmem:[%s12931_s3 + $0x3b0] sm:$0xff]  }
 0x2d2   : > { %v8682_v33 = vpop.f32.mrb[53].mxu0 }
 0x2d3   : > { %3606 = vmatmul.mubr.bf16.gmra.mrb[116].mxu1 %v11261_v59  ;;  %v11788_v13 = vadd.f32 %v8682_v33, %v8681_v62  ;;  %v8684_v40 = vpop.f32.mrb[54].mxu0  ;;  %v11791_v34 = vadd.f32 %v8384_v26, %v11669_v27  ;;  %v9918_v27 = vld [vmem:[%s12931_s3 + $0x3b8] sm:$0xff]  }
 0x2d4   : > { %3613 = vmatprep.mubr.bf16.mxu1 %v11265_v42  ;;  %v8685_v35 = vpop.f32.mrb[55].mxu0  ;;  %9285 = vmatpush3.bf16.msra.mxu1 %v9915_v24 }
 0x2d5   : > { %v11794_v41 = vadd.f32 %v8685_v35, %v8684_v40  ;;  %9286 = vmatprep.subr.bf16.mxu1 %v9916_v36  ;;  %v8385_v23 = vpop.f32.mrb[32].mxu1 }
 0x2d6   : > { %v8386_v0 = vpop.f32.mrb[33].mxu1 }
 0x2d7   : > { %v8387_v17 = vadd.f32 %v8386_v0, %v8385_v23  ;;  %v8388_v62 = vpop.f32.mrb[34].mxu1 }
 0x2d8   : > { %9287 = vmatpush3.bf16.msra.mxu1 %v9916_v36  ;;  %v8389_v20 = vpop.f32.mrb[35].mxu1 }
 0x2d9   : > { %v8687_v33 = vpop.f32.mrb[56].mxu0  ;;  %9288 = vmatprep.subr.bf16.mxu1 %v9917_v5  ;;  %v11803_v40 = vadd.f32 %v8387_v17, %v11683_v63  ;;  %v8390_v24 = vadd.f32 %v8389_v20, %v8388_v62  ;;  %v9919_v63 = vld [vmem:[%s12931_s3 + $0x4c0] sm:$0xff]  }
 0x2da   : > { %v8688_v26 = vpop.f32.mrb[57].mxu0 }
 0x2db   : > { %3614 = vmatmul.mubr.bf16.gmra.mrb[120].mxu1 %v11278_v38  ;;  %v11806_v35 = vadd.f32 %v8688_v26, %v8687_v33  ;;  %v8690_v2 = vpop.f32.mrb[58].mxu0  ;;  %v11809_v23 = vadd.f32 %v8390_v24, %v11691_v46 }
 0x2dc   : > { %3621 = vmatprep.mubr.bf16.mxu1 %v11282_v56  ;;  %v8691_v36 = vpop.f32.mrb[59].mxu0  ;;  %9289 = vmatpush3.bf16.msra.mxu1 %v9917_v5 }
 0x2dd   : > { %v11812_v0 = vadd.f32 %v8691_v36, %v8690_v2  ;;  %9290 = vmatprep.subr.bf16.mxu1 %v9918_v27  ;;  %v8391_v20 = vpop.f32.mrb[36].mxu1 }
 0x2de   : > { %v8392_v17 = vpop.f32.mrb[37].mxu1 }
 0x2df   : > { %v8393_v62 = vadd.f32 %v8392_v17, %v8391_v20  ;;  %v8394_v33 = vpop.f32.mrb[38].mxu1 }
 0x2e0   : > { %9291 = vmatpush3.bf16.msra.mxu1 %v9918_v27  ;;  %v8395_v61 = vpop.f32.mrb[39].mxu1 }
 0x2e1   : > { %v8693_v26 = vpop.f32.mrb[60].mxu0  ;;  %9304 = vmatprep.subr.bf16.mxu1 %v9919_v63  ;;  %v11818_v46 = vadd.f32 %v8393_v62, %v11705_v53  ;;  %v8396_v24 = vadd.f32 %v8395_v61, %v8394_v33 }
 0x2e2   : > { %v8694_v5 = vpop.f32.mrb[61].mxu0 }
 0x2e3   : > { %3622 = vmatmul.mubr.bf16.gmra.mrb[124].mxu1 %v11286_v14  ;;  %v11821_v2 = vadd.f32 %v8694_v5, %v8693_v26  ;;  %v8696_v36 = vpop.f32.mrb[62].mxu0  ;;  %v11824_v28 = vadd.f32 %v8396_v24, %v11713_v51 }
 0x2e4   : > { %3629 = vmatprep.mubr.bf16.mxu1 %v11317_v1  ;;  %v8697_v20 = vpop.f32.mrb[63].mxu0 }
 0x2e5   : > { %v11827_v27 = vadd.f32 %v8697_v20, %v8696_v36  ;;  %v8397_v17 = vpop.f32.mrb[40].mxu1 }
 0x2e6   : > { %v8398_v21 = vpop.f32.mrb[41].mxu1 }
 0x2e7   : > { %v8399_v29 = vadd.f32 %v8398_v21, %v8397_v17  ;;  %v8400_v53 = vpop.f32.mrb[42].mxu1 }
 0x2e8   : > { %v8401_v61 = vpop.f32.mrb[43].mxu1 }
 0x2e9   : > { %v8699_v62 = vpop.f32.mrb[64].mxu0  ;;  %v11830_v33 = vadd.f32 %v8399_v29, %v11727_v60  ;;  %v8402_v26 = vadd.f32 %v8401_v61, %v8400_v53 }
 0x2ea   : > { %v8700_v5 = vpop.f32.mrb[65].mxu0 }
 0x2eb   : > { %3630 = vmatmul.mubr.bf16.gmra.mrb[128].mxu1 %v11321_v52  ;;  %v11833_v51 = vadd.f32 %v8700_v5, %v8699_v62  ;;  %v8702_v24 = vpop.f32.mrb[66].mxu0  ;;  %v11836_v22 = vadd.f32 %v8402_v26, %v11735_v39  ;;  %v9920_v62 = vld [vmem:[%s12931_s3 + $0x4c8] sm:$0xff]  }
 0x2ec   : > { %9292 = vmatprep.mubr.bf16.mxu1 %v13088_v18  ;;  %v8703_v36 = vpop.f32.mrb[67].mxu0 }
 0x2ed   : > { %v11839_v21 = vadd.f32 %v8703_v36, %v8702_v24  ;;  %v8403_v20 = vpop.f32.mrb[44].mxu1 }
 0x2ee   : > { %v8404_v17 = vpop.f32.mrb[45].mxu1 }
 0x2ef   : > { %v8405_v6 = vadd.f32 %v8404_v17, %v8403_v20  ;;  %v8406_v29 = vpop.f32.mrb[46].mxu1  ;;  %v9922_v17 = vld [vmem:[%s12931_s3 + $0x4d8] sm:$0xff]  }
 0x2f0   : > { %v8407_v53 = vpop.f32.mrb[47].mxu1 }
 0x2f1   : > { %v8705_v60 = vpop.f32.mrb[68].mxu0  ;;  %v11845_v61 = vadd.f32 %v8405_v6, %v11747_v31  ;;  %v8408_v39 = vadd.f32 %v8407_v53, %v8406_v29  ;;  %v9921_v6 = vld [vmem:[%s12931_s3 + $0x4d0] sm:$0xff]  }
 0x2f2   : > { %v8706_v26 = vpop.f32.mrb[69].mxu0 }
 0x2f3   : > { %9293 = vmatmul.mubr.bf16.vlgmr.msra.gmra.mrb[48].mxu1 %v11292_v57  ;;  %v11848_v18 = vadd.f32 %v8706_v26, %v8705_v60  ;;  %v8708_v5 = vpop.f32.mrb[70].mxu0  ;;  %v11851_v24 = vadd.f32 %v8408_v39, %v11752_v43 }
 0x2f4   : > { %9305 = vmatpush3.bf16.msra.mxu1 %v9919_v63  ;;  %9296 = vmatprep.mubr.bf16.mxu1 %v11296_v48  ;;  %v8709_v36 = vpop.f32.mrb[71].mxu0 }
 0x2f5   : > { %v11854_v20 = vadd.f32 %v8709_v36, %v8708_v5  ;;  %9306 = vmatprep.subr.bf16.mxu1 %v9920_v62  ;;  %v9924_v36 = vld [vmem:[%s12931_s3 + $0x4e8] sm:$0xff]  }
 0x2f8   : > { %9307 = vmatpush3.bf16.msra.mxu1 %v9920_v62  ;;  %v9923_v62 = vld [vmem:[%s12931_s3 + $0x4e0] sm:$0xff]  }
 0x2f9   : > { %v8727_v31 = vpop.f32.mrb[72].mxu0  ;;  %9308 = vmatprep.subr.bf16.mxu1 %v9921_v6 }
 0x2fa   : > { %v8728_v43 = vpop.f32.mrb[73].mxu0 }
 0x2fb   : > { %9297 = vmatmul.mubr.bf16.gmra.mrb[52].mxu1 %v11304_v12  ;;  %v8729_v63 = vadd.f32 %v8728_v43, %v8727_v31  ;;  %v8730_v29 = vpop.f32.mrb[74].mxu0 }
 0x2fc   : > { %9309 = vmatpush3.bf16.msra.mxu1 %v9921_v6  ;;  %9300 = vmatprep.mubr.bf16.mxu1 %v11308_v58  ;;  %v8731_v60 = vpop.f32.mrb[75].mxu0 }
 0x2fd   : > { %v11865_v53 = vadd.f32 %v8729_v63, %v11770_v16  ;;  %v8732_v39 = vadd.f32 %v8731_v60, %v8730_v29  ;;  %9310 = vmatprep.subr.bf16.mxu1 %v9922_v17 }
 0x2ff   : > { %v11871_v26 = vadd.f32 %v8732_v39, %v11776_v37 }
 0x300   : > { %9311 = vmatpush3.bf16.msra.mxu1 %v9922_v17  ;;  %v9925_v17 = vld [vmem:[%s12931_s3 + $0x4f0] sm:$0xff]  }
 0x301   : > { %v8733_v5 = vpop.f32.mrb[76].mxu0  ;;  %9312 = vmatprep.subr.bf16.mxu1 %v9923_v62 }
 0x302   : > { %v8734_v6 = vpop.f32.mrb[77].mxu0 }
 0x303   : > { %9301 = vmatmul.mubr.bf16.gmra.mrb[56].mxu1 %v11325_v3  ;;  %v8735_v16 = vadd.f32 %v8734_v6, %v8733_v5  ;;  %v8736_v31 = vpop.f32.mrb[78].mxu0 }
 0x304   : > { %9313 = vmatpush3.bf16.msra.mxu1 %v9923_v62  ;;  %9320 = vmatprep.mubr.bf16.mxu1 %v11137_v19  ;;  %v8737_v43 = vpop.f32.mrb[79].mxu0  ;;  %v9926_v19 = vld [vmem:[%s12931_s3 + $0x4f8] sm:$0xff]  }
 0x305   : > { %v11879_v63 = vadd.f32 %v8735_v16, %v11788_v13  ;;  %v8738_v37 = vadd.f32 %v8737_v43, %v8736_v31  ;;  %9314 = vmatprep.subr.bf16.mxu1 %v9924_v36  ;;  %v9928_v31 = vld [vmem:[%s12931_s3 + $0x580] sm:$0xff]  }
 0x307   : > { %v11885_v29 = vadd.f32 %v8738_v37, %v11794_v41  ;;  %v9927_v41 = vld [vmem:[%s12931_s3 + $0x5c0] sm:$0xff]  }
 0x308   : > { %9315 = vmatpush3.bf16.msra.mxu1 %v9924_v36 }
 0x309   : > { %v8739_v60 = vpop.f32.mrb[80].mxu0  ;;  %9316 = vmatprep.subr.bf16.mxu1 %v9925_v17 }
 0x30a   : > { %v8740_v39 = vpop.f32.mrb[81].mxu0 }
 0x30b   : > { %v8741_v62 = vadd.f32 %v8740_v39, %v8739_v60  ;;  %v8742_v13 = vpop.f32.mrb[82].mxu0 }
 0x30c   : > { %9317 = vmatpush3.bf16.msra.mxu1 %v9925_v17  ;;  %v8743_v5 = vpop.f32.mrb[83].mxu0 }
 0x30d   : > { %v11891_v6 = vadd.f32 %v8741_v62, %v11806_v35  ;;  %v8744_v16 = vadd.f32 %v8743_v5, %v8742_v13  ;;  %9318 = vmatprep.subr.bf16.mxu1 %v9926_v19  ;;  %v9929_v35 = vld [vmem:[%s12931_s3 + $0x5c8] sm:$0xff]   ;;  %v9931_v13 = vld [vmem:[%s12931_s3 + $0x5d0] sm:$0xff]  }
 0x30f   : > { %v11897_v36 = vadd.f32 %v8744_v16, %v11812_v0 }
 0x310   : > { %9319 = vmatpush3.bf16.msra.mxu1 %v9926_v19  ;;  %v9930_v19 = vld [vmem:[%s12931_s3 + $0x588] sm:$0xff]  }
 0x311   : > { %v8745_v43 = vpop.f32.mrb[84].mxu0  ;;  %8829 = vmatprep.subr.bf16.mxu1 %v9927_v41 }
 0x312   : > { %v8746_v37 = vpop.f32.mrb[85].mxu0 }
 0x313   : > { %9321 = vmatmul.mubr.bf16.vlgmr.msra.gmra.mrb[48].mxu1 %v11141_v25  ;;  %v8747_v17 = vadd.f32 %v8746_v37, %v8745_v43  ;;  %v8748_v60 = vpop.f32.mrb[86].mxu0 }
 0x314   : > { %9324 = vmatprep.mubr.bf16.mxu1 %v13061_v47  ;;  %8830 = vmatpush3.bf16.msra.mxu1 %v9928_v31  ;;  %v8749_v0 = vpop.f32.mrb[87].mxu0  ;;  %v9932_v31 = vld [vmem:[%s12931_s3 + $0x590] sm:$0xff]  }
 0x315   : > { %v11911_v39 = vadd.f32 %v8747_v17, %v11821_v2  ;;  %v8750_v62 = vadd.f32 %v8749_v0, %v8748_v60  ;;  %8831 = vmatprep.subr.bf16.mxu1 %v9929_v35  ;;  %v9933_v35 = vld [vmem:[%s12931_s3 + $0x5d8] sm:$0xff]  }
 0x316   : > { %v8439_v25 = vpop.f32.mrb[60].mxu1 }
 0x317   : > { %v11917_v5 = vadd.f32 %v8750_v62, %v11827_v27  ;;  %v8440_v47 = vpop.f32.mrb[61].mxu1 }
 0x318   : > { %8832 = vmatpush3.bf16.msra.mxu1 %v9930_v19  ;;  %v8441_v16 = vadd.f32 %v8440_v47, %v8439_v25  ;;  %v8442_v41 = vpop.f32.mrb[62].mxu1 }
 0x319   : > { %v8443_v2 = vpop.f32.mrb[63].mxu1  ;;  %v8751_v43 = vpop.f32.mrb[88].mxu0  ;;  %8833 = vmatprep.subr.bf16.mxu1 %v9931_v13  ;;  %v9934_v13 = vld [vmem:[%s12931_s3 + $0x598] sm:$0xff]  }
 0x31a   : > { %v11926_v37 = vadd.f32 %v8441_v16, %v11767_v45  ;;  %v8444_v27 = vadd.f32 %v8443_v2, %v8442_v41  ;;  %v8752_v17 = vpop.f32.mrb[89].mxu0 }
 0x31b   : > { %9325 = vmatmul.mubr.bf16.gmra.mrb[52].mxu1 %v13062_v32  ;;  %v8753_v60 = vadd.f32 %v8752_v17, %v8751_v43  ;;  %v8754_v0 = vpop.f32.mrb[90].mxu0  ;;  %v9935_v32 = vld [vmem:[%s12931_s3 + $0x5e0] sm:$0xff]   ;;  %v9937_v43 = vld [vmem:[%s12931_s3 + $0x5e8] sm:$0xff]   ;;  %v13098_v17 = vpack.c.bf16 %v11332_v4, %v10925_v7  ;;  %v9939_v7 = vld [vmem:[%s12931_s3 + $0x5f0] sm:$0xff]  }
 0x31c   : > { %v11930_v19 = vadd.f32 %v8444_v27, %v11773_v49  ;;  %9328 = vmatprep.mubr.bf16.mxu1 %v13063_v55  ;;  %8834 = vmatpush3.bf16.msra.mxu1 %v9932_v31  ;;  %v8755_v62 = vpop.f32.mrb[91].mxu0  ;;  %v9936_v31 = vld [vmem:[%s12931_s3 + $0x5a0] sm:$0xff]  }
 0x31d   : > { %v11937_v45 = vadd.f32 %v8753_v60, %v11833_v51  ;;  %v8756_v25 = vadd.f32 %v8755_v62, %v8754_v0  ;;  %8835 = vmatprep.subr.bf16.mxu1 %v9933_v35 }
 0x31e   : > { %v8445_v47 = vpop.f32.mrb[64].mxu1 }
 0x31f   : > { %v11943_v49 = vadd.f32 %v8756_v25, %v11839_v21  ;;  %v8446_v55 = vpop.f32.mrb[65].mxu1 }
 0x320   : > { %8836 = vmatpush3.bf16.msra.mxu1 %v9934_v13  ;;  %v8447_v16 = vadd.f32 %v8446_v55, %v8445_v47  ;;  %v8448_v41 = vpop.f32.mrb[66].mxu1 }
 0x321   : > { %v8449_v51 = vpop.f32.mrb[67].mxu1  ;;  %v8757_v2 = vpop.f32.mrb[92].mxu0  ;;  %8837 = vmatprep.subr.bf16.mxu1 %v9935_v32 }
 0x322   : > { %v11952_v35 = vadd.f32 %v8447_v16, %v11785_v30  ;;  %v8450_v21 = vadd.f32 %v8449_v51, %v8448_v41  ;;  %v8758_v27 = vpop.f32.mrb[93].mxu0  ;;  %v9938_v30 = vld [vmem:[%s12931_s3 + $0x5a8] sm:$0xff]   ;;  %v9940_v41 = vld [vmem:[%s12931_s3 + $0x5b0] sm:$0xff]   ;;  %v9941_v51 = vld [vmem:[%s12931_s3 + $0x5f8] sm:$0xff]  }
 0x323   : > { %9329 = vmatmul.mubr.bf16.gmra.mrb[56].mxu1 %v13098_v17  ;;  %v8759_v60 = vadd.f32 %v8758_v27, %v8757_v2  ;;  %v8760_v0 = vpop.f32.mrb[94].mxu0 }
 0x324   : > { %v11958_v62 = vadd.f32 %v8450_v21, %v11791_v34  ;;  %8838 = vmatpush3.bf16.msra.mxu1 %v9936_v31  ;;  %4921 = vmatprep.mubr.bf16.mxu1 %v11241_v10  ;;  %v8761_v13 = vpop.f32.mrb[95].mxu0 }
 0x325   : > { %v11965_v25 = vadd.f32 %v8759_v60, %v11848_v18  ;;  %v8762_v32 = vadd.f32 %v8761_v13, %v8760_v0  ;;  %8839 = vmatprep.subr.bf16.mxu1 %v9937_v43  ;;  %v9942_v0 = vld [vmem:[%s12931_s3 + $0x5b8] sm:$0xff]  }
 0x326   : > { %v8451_v47 = vpop.f32.mrb[68].mxu1 }
 0x327   : > { %v11971_v34 = vadd.f32 %v8762_v32, %v11854_v20  ;;  %v8452_v55 = vpop.f32.mrb[69].mxu1 }
 0x328   : > { %8840 = vmatpush3.bf16.msra.mxu1 %v9938_v30  ;;  %v8453_v10 = vadd.f32 %v8452_v55, %v8451_v47  ;;  %v8454_v16 = vpop.f32.mrb[70].mxu1 }
 0x329   : > { %v8455_v18 = vpop.f32.mrb[71].mxu1  ;;  %v8793_v31 = vpop.f32.mrb[96].mxu0  ;;  %8841 = vmatprep.subr.bf16.mxu1 %v9939_v7 }
 0x32a   : > { %v11980_v2 = vadd.f32 %v8453_v10, %v11803_v40  ;;  %v8456_v20 = vadd.f32 %v8455_v18, %v8454_v16  ;;  %v8794_v43 = vpop.f32.mrb[97].mxu0  ;;  %v9943_v40 = vld [vmem:[%s12931_s3 + $0x600] sm:$0xff]   ;;  %v9944_v10 = vld [vmem:[%s12931_s3 + $0x608] sm:$0xff]  }
 0x32b   : > { %v11982_v21 = vadd.f32 %v8794_v43, %v8793_v31  ;;  %v8796_v27 = vpop.f32.mrb[98].mxu0 }
 0x32c   : > { %v11985_v17 = vadd.f32 %v8456_v20, %v11809_v23  ;;  %8842 = vmatpush3.bf16.msra.mxu1 %v9940_v41  ;;  %v8797_v60 = vpop.f32.mrb[99].mxu0 }
 0x32d   : > { %v11990_v13 = vadd.f32 %v8797_v60, %v8796_v27  ;;  %8843 = vmatprep.subr.bf16.mxu1 %v9941_v51 }
 0x32e   : > { %v8457_v30 = vpop.f32.mrb[72].mxu1 }
 0x32f   : > { %v8458_v32 = vpop.f32.mrb[73].mxu1 }
 0x330   : > { %8844 = vmatpush3.bf16.msra.mxu1 %v9942_v0  ;;  %v8459_v7 = vadd.f32 %v8458_v32, %v8457_v30  ;;  %v8460_v47 = vpop.f32.mrb[74].mxu1 }
 0x331   : > { %v8461_v23 = vpop.f32.mrb[75].mxu1  ;;  %v8799_v55 = vpop.f32.mrb[100].mxu0  ;;  %9332 = vmatprep.subr.bf16.mxu1 %v9943_v40 }
 0x332   : > { %v11999_v16 = vadd.f32 %v8459_v7, %v11818_v46  ;;  %v8462_v41 = vadd.f32 %v8461_v23, %v8460_v47  ;;  %v8800_v18 = vpop.f32.mrb[101].mxu0  ;;  %v9945_v46 = vld [vmem:[%s12931_s3 + $0x610] sm:$0xff]  }
 0x333   : > { %4922 = vmatmul.mubr.bf16.vlgmr.msra.gmra.mrb[132].mxu1 %v11253_v50  ;;  %v12002_v31 = vadd.f32 %v8800_v18, %v8799_v55  ;;  %v8802_v51 = vpop.f32.mrb[102].mxu0 }
 0x334   : > { %v12005_v20 = vadd.f32 %v8462_v41, %v11824_v28  ;;  %4929 = vmatprep.mubr.bf16.mxu1 %v11257_v15  ;;  %9333 = vmatpush3.bf16.msra.mxu1 %v9943_v40  ;;  %v8803_v43 = vpop.f32.mrb[103].mxu0  ;;  %v9946_v15 = vld [vmem:[%s12931_s3 + $0x618] sm:$0xff]  }
 0x335   : > { %v12008_v27 = vadd.f32 %v8803_v43, %v8802_v51  ;;  %9334 = vmatprep.subr.bf16.mxu1 %v9944_v10 }
 0x336   : > { %v8463_v60 = vpop.f32.mrb[76].mxu1 }
 0x337   : > { %v8464_v0 = vpop.f32.mrb[77].mxu1 }
 0x338   : > { %v8465_v50 = vadd.f32 %v8464_v0, %v8463_v60  ;;  %v8466_v30 = vpop.f32.mrb[78].mxu1  ;;  %9335 = vmatpush3.bf16.msra.mxu1 %v9944_v10 }
 0x339   : > { %v8467_v32 = vpop.f32.mrb[79].mxu1  ;;  %v8805_v7 = vpop.f32.mrb[104].mxu0  ;;  %9336 = vmatprep.subr.bf16.mxu1 %v9945_v46 }
 0x33a   : > { %v12017_v28 = vadd.f32 %v8465_v50, %v11830_v33  ;;  %v8468_v40 = vadd.f32 %v8467_v32, %v8466_v30  ;;  %v8806_v47 = vpop.f32.mrb[105].mxu0  ;;  %v9947_v33 = vld [vmem:[%s12931_s3 + $0x620] sm:$0xff]  }
 0x33b   : > { %4930 = vmatmul.mubr.bf16.gmra.mrb[136].mxu1 %v11261_v59  ;;  %v12020_v23 = vadd.f32 %v8806_v47, %v8805_v7  ;;  %v8808_v55 = vpop.f32.mrb[106].mxu0 }
 0x33c   : > { %v12023_v41 = vadd.f32 %v8468_v40, %v11836_v22  ;;  %4937 = vmatprep.mubr.bf16.mxu1 %v11265_v42  ;;  %v8809_v10 = vpop.f32.mrb[107].mxu0  ;;  %9337 = vmatpush3.bf16.msra.mxu1 %v9945_v46  ;;  %v9948_v42 = vld [vmem:[%s12931_s3 + $0x628] sm:$0xff]  }
 0x33d   : > { %v12026_v18 = vadd.f32 %v8809_v10, %v8808_v55  ;;  %9338 = vmatprep.subr.bf16.mxu1 %v9946_v15 }
 0x33e   : > { %v8469_v51 = vpop.f32.mrb[80].mxu1 }
 0x33f   : > { %v8470_v43 = vpop.f32.mrb[81].mxu1 }
 0x340   : > { %v8471_v59 = vadd.f32 %v8470_v43, %v8469_v51  ;;  %v8472_v60 = vpop.f32.mrb[82].mxu1  ;;  %9339 = vmatpush3.bf16.msra.mxu1 %v9946_v15 }
 0x341   : > { %v8473_v0 = vpop.f32.mrb[83].mxu1  ;;  %v8811_v50 = vpop.f32.mrb[108].mxu0  ;;  %9340 = vmatprep.subr.bf16.mxu1 %v9947_v33 }
 0x342   : > { %v12035_v22 = vadd.f32 %v8471_v59, %v11845_v61  ;;  %v8474_v46 = vadd.f32 %v8473_v0, %v8472_v60  ;;  %v8812_v30 = vpop.f32.mrb[109].mxu0  ;;  %v9949_v61 = vld [vmem:[%s12931_s3 + $0x630] sm:$0xff]  }
 0x343   : > { %4938 = vmatmul.mubr.bf16.gmra.mrb[140].mxu1 %v11278_v38  ;;  %v12038_v32 = vadd.f32 %v8812_v30, %v8811_v50  ;;  %v8814_v7 = vpop.f32.mrb[110].mxu0 }
 0x344   : > { %v12041_v40 = vadd.f32 %v8474_v46, %v11851_v24  ;;  %4945 = vmatprep.mubr.bf16.mxu1 %v11282_v56  ;;  %v8815_v15 = vpop.f32.mrb[111].mxu0  ;;  %9341 = vmatpush3.bf16.msra.mxu1 %v9947_v33  ;;  %v9950_v56 = vld [vmem:[%s12931_s3 + $0x638] sm:$0xff]  }
 0x345   : > { %v12044_v47 = vadd.f32 %v8815_v15, %v8814_v7  ;;  %9342 = vmatprep.subr.bf16.mxu1 %v9948_v42 }
 0x346   : > { %v8491_v55 = vpop.f32.mrb[84].mxu1 }
 0x347   : > { %v8492_v10 = vpop.f32.mrb[85].mxu1 }
 0x348   : > { %v8493_v38 = vadd.f32 %v8492_v10, %v8491_v55  ;;  %v8494_v51 = vpop.f32.mrb[86].mxu1  ;;  %9343 = vmatpush3.bf16.msra.mxu1 %v9948_v42 }
 0x349   : > { %v8495_v43 = vpop.f32.mrb[87].mxu1  ;;  %v8817_v59 = vpop.f32.mrb[112].mxu0  ;;  %9344 = vmatprep.subr.bf16.mxu1 %v9949_v61 }
 0x34a   : > { %v12053_v24 = vadd.f32 %v11926_v37, %v8493_v38  ;;  %v8496_v33 = vadd.f32 %v8495_v43, %v8494_v51  ;;  %v8818_v60 = vpop.f32.mrb[113].mxu0 }
 0x34b   : > { %4946 = vmatmul.mubr.bf16.gmra.mrb[144].mxu1 %v11286_v14  ;;  %v12056_v0 = vadd.f32 %v8818_v60, %v8817_v59  ;;  %v8820_v50 = vpop.f32.mrb[114].mxu0  ;;  %v13099_v59 = vpack.c.bf16 %v11347_v8, %v11190_v54 }
 0x34c   : > { %v12059_v46 = vadd.f32 %v11930_v19, %v8496_v33  ;;  %4953 = vmatprep.mubr.bf16.mxu1 %v11317_v1  ;;  %v8821_v42 = vpop.f32.mrb[115].mxu0  ;;  %9345 = vmatpush3.bf16.msra.mxu1 %v9949_v61 }
 0x34d   : > { %v12062_v30 = vadd.f32 %v8821_v42, %v8820_v50  ;;  %9346 = vmatprep.subr.bf16.mxu1 %v9950_v56 }
 0x34e   : > { %v8497_v7 = vpop.f32.mrb[88].mxu1 }
 0x34f   : > { %v8498_v37 = vpop.f32.mrb[89].mxu1 }
 0x350   : > { %v8499_v15 = vadd.f32 %v8498_v37, %v8497_v7  ;;  %v8500_v55 = vpop.f32.mrb[90].mxu1  ;;  %9347 = vmatpush3.bf16.msra.mxu1 %v9950_v56 }
 0x351   : > { %v8501_v10 = vpop.f32.mrb[91].mxu1  ;;  %v8823_v14 = vpop.f32.mrb[116].mxu0 }
 0x352   : > { %v12065_v38 = vadd.f32 %v11952_v35, %v8499_v15  ;;  %v8502_v51 = vadd.f32 %v8501_v10, %v8500_v55  ;;  %v8824_v19 = vpop.f32.mrb[117].mxu0 }
 0x353   : > { %4954 = vmatmul.mubr.bf16.gmra.mrb[148].mxu1 %v11321_v52  ;;  %v12068_v1 = vadd.f32 %v8824_v19, %v8823_v14  ;;  %v8826_v61 = vpop.f32.mrb[118].mxu0 }
 0x354   : > { %v12071_v43 = vadd.f32 %v11958_v62, %v8502_v51  ;;  %4961 = vmatprep.mubr.bf16.mxu1 %v13099_v59  ;;  %v8827_v56 = vpop.f32.mrb[119].mxu0  ;;  %v13100_v62 = vpack.c.bf16 %v11350_v9, %v11209_v44 }
 0x355   : > { %v12076_v33 = vadd.f32 %v8827_v56, %v8826_v61 }
 0x356   : > { %v8503_v60 = vpop.f32.mrb[92].mxu1 }
 0x357   : > { %v8504_v35 = vpop.f32.mrb[93].mxu1 }
 0x358   : > { %v8505_v50 = vadd.f32 %v8504_v35, %v8503_v60  ;;  %v8506_v42 = vpop.f32.mrb[94].mxu1 }
 0x359   : > { %v8507_v7 = vpop.f32.mrb[95].mxu1 }
 0x35a   : > { %v12079_v52 = vadd.f32 %v11980_v2, %v8505_v50  ;;  %v8508_v37 = vadd.f32 %v8507_v7, %v8506_v42 }
 0x35b   : > { %4962 = vmatmul.mubr.bf16.gmra.mrb[152].mxu1 %v13100_v62 }
 0x35c   : > { %v12085_v15 = vadd.f32 %v11985_v17, %v8508_v37  ;;  %9348 = vmatprep.mubr.bf16.mxu1 %v11292_v57 }
 0x35e   : > { %v8509_v54 = vpop.f32.mrb[96].mxu1 }
 0x35f   : > { %v8510_v8 = vpop.f32.mrb[97].mxu1 }
 0x360   : > { %v8511_v55 = vadd.f32 %v8510_v8, %v8509_v54  ;;  %v8512_v10 = vpop.f32.mrb[98].mxu1  ;;  %v13102_v54 = vld [vmem:[#allocation33_spill] sm:$0xff] }
 0x361   : > { %v8513_v14 = vpop.f32.mrb[99].mxu1 }
 0x362   : > { %v12089_v51 = vadd.f32 %v11999_v16, %v8511_v55  ;;  %v8514_v2 = vadd.f32 %v8513_v14, %v8512_v10 }
 0x363   : > { %9349 = vmatmul.mubr.bf16.vlgmr.msra.gmra.mrb[48].mxu1 %v11296_v48 }
 0x364   : > { %v12093_v19 = vadd.f32 %v12005_v20, %v8514_v2  ;;  %9352 = vmatprep.mubr.bf16.mxu1 %v11304_v12 }
 0x366   : > { %v8515_v44 = vpop.f32.mrb[100].mxu1 }
 0x367   : > { %v8516_v9 = vpop.f32.mrb[101].mxu1 }
 0x368   : > { %v8517_v17 = vadd.f32 %v8516_v9, %v8515_v44  ;;  %v8518_v57 = vpop.f32.mrb[102].mxu1 }
 0x369   : > { %v8519_v61 = vpop.f32.mrb[103].mxu1 }
 0x36a   : > { %v12097_v59 = vadd.f32 %v12017_v28, %v8517_v17  ;;  %v8520_v56 = vadd.f32 %v8519_v61, %v8518_v57  ;;  %v13101_v28 = vpack.c.bf16 %v11092_v11, %v11332_v4  ;;  %v13104_v61 = vld [vmem:[#allocation22_spill] sm:$0xff] }
 0x36b   : > { %9353 = vmatmul.mubr.bf16.gmra.mrb[52].mxu1 %v11308_v58 }
 0x36c   : > { %v12101_v16 = vadd.f32 %v12023_v41, %v8520_v56  ;;  %9356 = vmatprep.mubr.bf16.mxu1 %v11325_v3 }
 0x36e   : > { %v8521_v48 = vpop.f32.mrb[104].mxu1 }
 0x36f   : > { %v8522_v20 = vpop.f32.mrb[105].mxu1 }
 0x370   : > { %v8523_v60 = vadd.f32 %v8522_v20, %v8521_v48  ;;  %v8524_v12 = vpop.f32.mrb[106].mxu1  ;;  %v13105_v20 = vld [vmem:[#allocation27_spill] sm:$0xff] }
 0x371   : > { %v8525_v35 = vpop.f32.mrb[107].mxu1 }
 0x372   : > { %v12105_v50 = vadd.f32 %v12035_v22, %v8523_v60  ;;  %v8526_v42 = vadd.f32 %v8525_v35, %v8524_v12  ;;  %v13103_v22 = vld [vmem:[#allocation35_spill] sm:$0xff] }
 0x373   : > { %9357 = vmatmul.mubr.bf16.gmra.mrb[56].mxu1 %v13101_v28 }
 0x374   : > { %v12111_v58 = vadd.f32 %v12041_v40, %v8526_v42 }
 0x396   : > { %v8609_v41 = vpop.f32.mrb[108].mxu1 }
 0x397   : > { %v8610_v7 = vpop.f32.mrb[109].mxu1 }
 0x398   : > { %v8611_v37 = vadd.f32 %v8610_v7, %v8609_v41  ;;  %v8612_v3 = vpop.f32.mrb[110].mxu1  ;;  %v13106_v7 = vld [vmem:[#allocation14_spill] sm:$0xff] }
 0x399   : > { %v8613_v62 = vpop.f32.mrb[111].mxu1 }
 0x39a   : > { %v3592_v8 = vadd.f32 %v8611_v37, %v13102_v54  ;;  %v8614_v55 = vadd.f32 %v8613_v62, %v8612_v3  ;;  %v13107_v62 = vld [vmem:[#allocation18_spill] sm:$0xff] }
 0x39c   : > { %v9488_v10 = vadd.f32 %v12053_v24, %v3592_v8  ;;  %v3595_v14 = vadd.f32 %v8614_v55, %v13103_v22 }
 0x39e   : > { %v9500_v2 = vadd.f32 %v12059_v46, %v3595_v14  ;;  %v8615_v44 = vpop.f32.mrb[112].mxu1  ;;  %v12118_v11 = vadd.f32 %v9488_v10, %v11865_v53 }
 0x39f   : > { %v8616_v4 = vpop.f32.mrb[113].mxu1 }
 0x3a0   : > { %v8617_v40 = vadd.f32 %v8616_v4, %v8615_v44  ;;  %v8618_v9 = vpop.f32.mrb[114].mxu1  ;;  %v12121_v17 = vadd.f32 %v9500_v2, %v11871_v26  ;;  %v13108_v2 = vld [vmem:[#allocation30_spill] sm:$0xff] }
 0x3a1   : > { %v8619_v57 = vpop.f32.mrb[115].mxu1 }
 0x3a2   : > { %v3600_v56 = vadd.f32 %v8617_v40, %v13104_v61  ;;  %v8620_v48 = vadd.f32 %v8619_v57, %v8618_v9  ;;  %v13109_v40 = vld [vmem:[#allocation31_spill] sm:$0xff] }
 0x3a4   : > { %v9482_v24 = vadd.f32 %v12065_v38, %v3600_v56  ;;  %v3603_v60 = vadd.f32 %v8620_v48, %v13105_v20  ;;  %v13110_v20 = vld [vmem:[#allocation17_spill] sm:$0xff] }
 0x3a6   : > { %v9494_v46 = vadd.f32 %v12071_v43, %v3603_v60  ;;  %v8621_v12 = vpop.f32.mrb[116].mxu1  ;;  %v12128_v53 = vadd.f32 %v9482_v24, %v11879_v63 }
 0x3a7   : > { %v8622_v35 = vpop.f32.mrb[117].mxu1 }
 0x3a8   : > { %v8623_v42 = vadd.f32 %v8622_v35, %v8621_v12  ;;  %v8624_v28 = vpop.f32.mrb[118].mxu1  ;;  %v12131_v26 = vadd.f32 %v9494_v46, %v11885_v29  ;;  %v13111_v12 = vld [vmem:[#allocation23_spill] sm:$0xff] }
 0x3a9   : > { %v8625_v41 = vpop.f32.mrb[119].mxu1 }
 0x3aa   : > { %v3608_v37 = vadd.f32 %v8623_v42, %v13106_v7  ;;  %v8626_v3 = vadd.f32 %v8625_v41, %v8624_v28 }
 0x3ac   : > { %v9512_v38 = vadd.f32 %v12079_v52, %v3608_v37  ;;  %v3611_v54 = vadd.f32 %v8626_v3, %v13107_v62  ;;  %v13112_v3 = vld [vmem:[#allocation32_spill] sm:$0xff] }
 0x3ae   : > { %v9524_v43 = vadd.f32 %v12085_v15, %v3611_v54  ;;  %v8627_v8 = vpop.f32.mrb[120].mxu1  ;;  %v12138_v63 = vadd.f32 %v9512_v38, %v11891_v6  ;;  %v13113_v54 = vld [vmem:[#allocation34_spill] sm:$0xff] }
 0x3af   : > { %v8628_v55 = vpop.f32.mrb[121].mxu1 }
 0x3b0   : > { %v8629_v10 = vadd.f32 %v8628_v55, %v8627_v8  ;;  %v8630_v22 = vpop.f32.mrb[122].mxu1  ;;  %v12141_v29 = vadd.f32 %v9524_v43, %v11897_v36  ;;  %v9952_v55 = vld [vmem:[%s12933_s5 + $0xa0] sm:$0xff]  }
 0x3b1   : > { %v8631_v14 = vpop.f32.mrb[123].mxu1 }
 0x3b2   : > { %v3616_v44 = vadd.f32 %v8629_v10, %v13108_v2  ;;  %v8632_v4 = vadd.f32 %v8631_v14, %v8630_v22 }
 0x3b4   : > { %v9506_v52 = vadd.f32 %v12089_v51, %v3616_v44  ;;  %v3619_v9 = vadd.f32 %v8632_v4, %v13109_v40 }
 0x3b6   : > { %v9518_v15 = vadd.f32 %v12093_v19, %v3619_v9  ;;  %v8633_v57 = vpop.f32.mrb[124].mxu1  ;;  %v12148_v6 = vadd.f32 %v9506_v52, %v11911_v39 }
 0x3b7   : > { %v8634_v61 = vpop.f32.mrb[125].mxu1 }
 0x3b8   : > { %v8635_v56 = vadd.f32 %v8634_v61, %v8633_v57  ;;  %v8636_v48 = vpop.f32.mrb[126].mxu1  ;;  %v12151_v36 = vadd.f32 %v9518_v15, %v11917_v5 }
 0x3b9   : > { %v8637_v24 = vpop.f32.mrb[127].mxu1 }
 0x3ba   : > { %v3624_v60 = vadd.f32 %v8635_v56, %v13110_v20  ;;  %v8638_v46 = vadd.f32 %v8637_v24, %v8636_v48 }
 0x3bc   : > { %v9536_v51 = vadd.f32 %v12097_v59, %v3624_v60  ;;  %v3627_v35 = vadd.f32 %v8638_v46, %v13111_v12 }
 0x3be   : > { %v9548_v19 = vadd.f32 %v12101_v16, %v3627_v35  ;;  %v8639_v42 = vpop.f32.mrb[128].mxu1  ;;  %v12158_v39 = vadd.f32 %v9536_v51, %v11937_v45 }
 0x3bf   : > { %v8640_v28 = vpop.f32.mrb[129].mxu1 }
 0x3c0   : > { %v8641_v41 = vadd.f32 %v8640_v28, %v8639_v42  ;;  %v8642_v7 = vpop.f32.mrb[130].mxu1  ;;  %v12161_v5 = vadd.f32 %v9548_v19, %v11943_v49  ;;  %v9951_v49 = vld [vmem:[%s12933_s5 + $0xe0] sm:$0xff]  }
 0x3c1   : > { %v8643_v37 = vpop.f32.mrb[131].mxu1  ;;  %8895 = vmatprep.subr.bf16.mxu0 %v9951_v49 }
 0x3c2   : > { %v3632_v38 = vadd.f32 %v8641_v41, %v13112_v3  ;;  %v8644_v62 = vadd.f32 %v8643_v37, %v8642_v7  ;;  %8896 = vmatpush3.bf16.msra.mxu0 %v9952_v55 }
 0x3c4   : > { %v9530_v59 = vadd.f32 %v12105_v50, %v3632_v38  ;;  %v3635_v43 = vadd.f32 %v8644_v62, %v13113_v54  ;;  %v9953_v50 = vld [vmem:[%s12933_s5 + $0xe8] sm:$0xff]  }
 0x3c5   : > { %8897 = vmatprep.subr.bf16.mxu0 %v9953_v50 }
 0x3c6   : > { %v9542_v16 = vadd.f32 %v12111_v58, %v3635_v43  ;;  %v12168_v8 = vadd.f32 %v9530_v59, %v11965_v25  ;;  %v9954_v25 = vld [vmem:[%s12933_s5 + $0xa8] sm:$0xff]  }
 0x3c7   : > { %8898 = vmatpush3.bf16.msra.mxu0 %v9954_v25 }
 0x3c8   : > { %v12171_v45 = vadd.f32 %v9542_v16, %v11971_v34 }
 0x406   : > { %v8845_v34 = vpop.f32.mrb[132].mxu1 }
 0x407   : > { %v8846_v58 = vpop.f32.mrb[133].mxu1 }
 0x408   : > { %v8847_v10 = vadd.f32 %v8846_v58, %v8845_v34  ;;  %v8848_v22 = vpop.f32.mrb[134].mxu1 }
 0x409   : > { %v8849_v14 = vpop.f32.mrb[135].mxu1 }
 0x40a   : > { %v4924_v2 = vadd.f32 %v8847_v10, %v11982_v21  ;;  %v8850_v44 = vadd.f32 %v8849_v14, %v8848_v22 }
 0x40c   : > { %v4927_v4 = vadd.f32 %v8850_v44, %v11990_v13  ;;  %v9490_v52 = vadd.f32 %v12118_v11, %v4924_v2 }
 0x40e   : > { %v8851_v40 = vpop.f32.mrb[136].mxu1  ;;  %v12189_v9 = vadd.f32 %v12121_v17, %v4927_v4 }
 0x40f   : > { %v8852_v15 = vpop.f32.mrb[137].mxu1 }
 0x410   : > { %v8853_v57 = vadd.f32 %v8852_v15, %v8851_v40  ;;  %v8854_v61 = vpop.f32.mrb[138].mxu1  ;;  %v9957_v15 = vld [vmem:[%s12933_s5 + $0xf8] sm:$0xff]  }
 0x411   : > { %v8855_v56 = vpop.f32.mrb[139].mxu1 }
 0x412   : > { %v4932_v48 = vadd.f32 %v8853_v57, %v12002_v31  ;;  %v8856_v24 = vadd.f32 %v8855_v56, %v8854_v61 }
 0x414   : > { %v4935_v20 = vadd.f32 %v8856_v24, %v12008_v27  ;;  %v9484_v21 = vadd.f32 %v12128_v53, %v4932_v48  ;;  %v9958_v48 = vld [vmem:[%s12933_s5 + $0xb8] sm:$0xff]  }
 0x416   : > { %v8857_v60 = vpop.f32.mrb[140].mxu1  ;;  %v9496_v13 = vadd.f32 %v12131_v26, %v4935_v20 }
 0x417   : > { %v8858_v46 = vpop.f32.mrb[141].mxu1 }
 0x418   : > { %v8859_v11 = vadd.f32 %v8858_v46, %v8857_v60  ;;  %v8860_v51 = vpop.f32.mrb[142].mxu1 }
 0x419   : > { %v8861_v12 = vpop.f32.mrb[143].mxu1 }
 0x41a   : > { %v4940_v17 = vadd.f32 %v8859_v11, %v12020_v23  ;;  %v8862_v35 = vadd.f32 %v8861_v12, %v8860_v51  ;;  %v9960_v11 = vld [vmem:[%s12933_s5] sm:$0xff]  }
 0x41c   : > { %v4943_v19 = vadd.f32 %v8862_v35, %v12026_v18  ;;  %v12198_v42 = vadd.f32 %v12138_v63, %v4940_v17 }
 0x41e   : > { %v8863_v31 = vpop.f32.mrb[144].mxu1  ;;  %v12201_v27 = vadd.f32 %v12141_v29, %v4943_v19 }
 0x41f   : > { %v8864_v53 = vpop.f32.mrb[145].mxu1 }
 0x420   : > { %v8865_v28 = vadd.f32 %v8864_v53, %v8863_v31  ;;  %v8866_v41 = vpop.f32.mrb[146].mxu1 }
 0x421   : > { %v8867_v26 = vpop.f32.mrb[147].mxu1 }
 0x422   : > { %v4948_v7 = vadd.f32 %v8865_v28, %v12038_v32  ;;  %v8868_v37 = vadd.f32 %v8867_v26, %v8866_v41  ;;  %v9961_v41 = vld [vmem:[%s12933_s5 + $0x100] sm:$0xff]   ;;  %v9962_v26 = vld [vmem:[%s12933_s5 + $0x48] sm:$0xff]  }
 0x424   : > { %v4951_v3 = vadd.f32 %v8868_v37, %v12044_v47  ;;  %v9508_v23 = vadd.f32 %v12148_v6, %v4948_v7 }
 0x426   : > { %v8869_v38 = vpop.f32.mrb[148].mxu1  ;;  %v12207_v18 = vadd.f32 %v12151_v36, %v4951_v3 }
 0x427   : > { %v8870_v63 = vpop.f32.mrb[149].mxu1 }
 0x428   : > { %v8871_v62 = vadd.f32 %v8870_v63, %v8869_v38  ;;  %v8872_v59 = vpop.f32.mrb[150].mxu1 }
 0x429   : > { %v8873_v29 = vpop.f32.mrb[151].mxu1 }
 0x42a   : > { %v4956_v54 = vadd.f32 %v8871_v62, %v12056_v0  ;;  %v8874_v43 = vadd.f32 %v8873_v29, %v8872_v59  ;;  %v9964_v59 = vld [vmem:[%s12933_s5 + $0x8] sm:$0xff]  }
 0x42c   : > { %v4959_v16 = vadd.f32 %v8874_v43, %v12062_v30  ;;  %v12212_v32 = vadd.f32 %v12158_v39, %v4956_v54  ;;  %v9955_v30 = vld [vmem:[%s12933_s5 + $0xf0] sm:$0xff]  }
 0x42d   : > { %8899 = vmatprep.subr.bf16.mxu0 %v9955_v30  ;;  %v9966_v30 = vld [vmem:[%s12933_s5 + $0x10] sm:$0xff]  }
 0x42e   : > { %v8875_v49 = vpop.f32.mrb[152].mxu1  ;;  %v12215_v47 = vadd.f32 %v12161_v5, %v4959_v16  ;;  %v12228_v5 = vld [vmem:[%s12932_s4] ss:$0 sm:$0xff] }
 0x42f   : > { %v8876_v6 = vpop.f32.mrb[153].mxu1 }
 0x430   : > { %v8877_v55 = vadd.f32 %v8876_v6, %v8875_v49  ;;  %v8878_v36 = vpop.f32.mrb[154].mxu1  ;;  %v9965_v6 = vld [vmem:[%s12933_s5 + $0x50] sm:$0xff]  }
 0x431   : > { %v8879_v50 = vpop.f32.mrb[155].mxu1 }
 0x432   : > { %v4964_v25 = vadd.f32 %v8877_v55, %v12068_v1  ;;  %v8880_v34 = vadd.f32 %v8879_v50, %v8878_v36  ;;  %v9956_v1 = vld [vmem:[%s12933_s5 + $0xb0] sm:$0xff]  }
 0x433   : > { %8900 = vmatpush3.bf16.msra.mxu0 %v9956_v1 }
 0x434   : > { %v4967_v58 = vadd.f32 %v8880_v34, %v12076_v33  ;;  %v12220_v0 = vadd.f32 %v12168_v8, %v4964_v25  ;;  %8901 = vmatprep.subr.bf16.mxu0 %v9957_v15 }
 0x436   : > { %v9350_v39 = vpop.f32.mrb[48].mxu1  ;;  %v12231_v10 = vadd.f32 %v12171_v45, %v4967_v58 }
 0x437   : > { %v9485_v33 = vadd.f32 %v9484_v21, %v9350_v39  ;;  %v5004_v8 = vpop.f32.mrb[49].mxu1  ;;  %8902 = vmatpush3.bf16.msra.mxu0 %v9958_v48 }
 0x438   : > { %v9491_v22 = vadd.f32 %v9490_v52, %v5004_v8  ;;  %v9351_v14 = vpop.f32.mrb[50].mxu1  ;;  %8903 = vmatprep.subr.bf16.mxu0 %v9961_v41 }
 0x439   : > { %v5072_v2 = vadd.f32 %v9485_v33, %v12228_v5  ;;  %v9497_v44 = vadd.f32 %v9496_v13, %v9351_v14  ;;  %v5007_v4 = vpop.f32.mrb[51].mxu1 }
 0x43a   : > { %v5070_v40 = vadd.f32 %v9491_v22, %v12228_v5  ;;  %v9503_v45 = vadd.f32 %v12189_v9, %v5007_v4  ;;  %v9959_v9 = vld [vmem:[%s12933_s5 + $0x40] sm:$0xff]   ;;  %v9967_v22 = vld [vmem:[%s12933_s5 + $0x108] sm:$0xff]  }
 0x43b   : > { %v5084_v57 = vmax.f32 %v5072_v2, 0.0  ;;  %v5073_v61 = vadd.f32 %v9497_v44, %v12228_v5  ;;  %8929 = vmatprep.subr.bf16.mxu1 %v9959_v9  ;;  %v9968_v4 = vld [vmem:[%s12933_s5 + $0xc8] sm:$0xff]  }
 0x43c   : > { %v12243_v56 = vmax.f32 %v5070_v40, 0.0  ;;  %v5071_v52 = vadd.f32 %v9503_v45, %v12228_v5  ;;  %8930 = vmatpush3.bf16.msra.mxu1 %v9960_v11  ;;  %v9969_v40 = vld [vmem:[%s12933_s5 + $0x58] sm:$0xff]   ;;  %v9972_v11 = vld [vmem:[%s12933_s5 + $0x60] sm:$0xff]  }
 0x43d   : > { %v5149_v24 = vrot.slane %v5084_v57, 4  ;;  %5134 = vst.msk [vmem:[#allocation3 + $0x18] sm:$0xf] %vm5094_vm9, %v5084_v57  ;;  %v5085_v20 = vmax.f32 %v5073_v61, 0.0  ;;  %v5144_v21 = vrot.slane %v5084_v57, 3  ;;  %v5141_v35 = vrot.slane %v5084_v57, 2  ;;  %8931 = vmatprep.subr.bf16.mxu1 %v9962_v26 }
 0x43e   : > { %v5111_v60 = vrot.slane %v12243_v56, 4  ;;  %5095 = vst.msk [vmem:[#allocation3] sm:$0xf] %vm5094_vm9, %v12243_v56  ;;  %v12256_v13 = vmax.f32 %v5071_v52, 0.0  ;;  %v9354_v46 = vpop.f32.mrb[52].mxu1  ;;  %v5136_v53 = vrot.slane %v5084_v57, 1 }
 0x43f   : > { %5151 = vst.msk [vmem:[#allocation3 + $0x28] sm:$0xf] %vm5094_vm9, %v5149_v24  ;;  %v9509_v51 = vadd.f32 %v9508_v23, %v9354_v46  ;;  %v5020_v12 = vpop.f32.mrb[53].mxu1  ;;  %5145 = vrot.lane.b32.xlu0 %v5144_v21, %s10080_s13  ;;  %v5164_v17 = vrot.slane %v5085_v20, 7  ;;  %v5161_v28 = vrot.slane %v5085_v20, 6  ;;  %v5103_v29 = vrot.slane %v12243_v56, 2 }
 0x440   : > { %5169 = vst.msk [vmem:[#allocation3 + $0x28] sm:$0xf0] %vm5117_vm10, %v5085_v20  ;;  %5133 = vst.msk [vmem:[#allocation3 + $0x10] sm:$0xf0] %vm5117_vm10, %v12256_v13  ;;  %v9515_v19 = vadd.f32 %v12198_v42, %v5020_v12  ;;  %v9355_v31 = vpop.f32.mrb[54].mxu1  ;;  %v5153_v42 = vrot.slane %v5085_v20, 4  ;;  %8932 = vmatpush3.bf16.msra.mxu1 %v9964_v59 }
 0x441   : > { %5113 = vst.msk [vmem:[#allocation3 + $0x10] sm:$0xf] %vm5094_vm9, %v5111_v60  ;;  %v5076_v7 = vadd.f32 %v9509_v51, %v12228_v5  ;;  %v9521_v37 = vadd.f32 %v12207_v18, %v9355_v31  ;;  %v5023_v3 = vpop.f32.mrb[55].mxu1  ;;  %5165 = vrot.lane.b32.xlu1 %v5164_v17, %s10080_s13  ;;  %5143 = vst.msk [vmem:[#allocation3 + $0x20] sm:$0xf] %vm5094_vm9, %v5141_v35  ;;  %v5125_v23 = vrot.slane %v12256_v13, 6  ;;  %8933 = vmatprep.subr.bf16.mxu1 %v9965_v6 }
 0x442   : > { %v5074_v38 = vadd.f32 %v9515_v19, %v12228_v5  ;;  %v9527_v63 = vadd.f32 %v12201_v27, %v5023_v3  ;;  %5163 = vst.msk [vmem:[#allocation3 + $0x20] sm:$0xf0] %vm5117_vm10, %v5161_v28  ;;  %v5115_v62 = vrot.slane %v12256_v13, 4  ;;  %v9963_v18 = vld [vmem:[%s12933_s5 + $0xc0] sm:$0xff]   ;;  %v5156_v43 = vrot.slane %v5085_v20, 5  ;;  %v9971_v46 = vld [vmem:[%s12933_s5 + $0x110] sm:$0xff]  }
 0x443   : > { %v12290_v54 = vmax.f32 %v5076_v7, 0.0  ;;  %v5077_v27 = vadd.f32 %v9521_v37, %v12228_v5  ;;  %5137 = vrot.lane.b32.xlu0 %v5136_v53, %s10080_s13  ;;  %5155 = vst.msk [vmem:[#allocation3 + $0x18] sm:$0xf0] %vm5117_vm10, %v5153_v42  ;;  %5127 = vst.msk [vmem:[#allocation3 + $0x8] sm:$0xf0] %vm5117_vm10, %v5125_v23  ;;  %8904 = vmatpush3.bf16.msra.mxu0 %v9963_v18  ;;  %v5128_v50 = vrot.slane %v12256_v13, 7 }
 0x444   : > { %v12296_v16 = vmax.f32 %v5074_v38, 0.0  ;;  %v5075_v49 = vadd.f32 %v9527_v63, %v12228_v5  ;;  %5118 = vst.msk [vmem:[#allocation3] sm:$0xf0] %vm5117_vm10, %v5115_v62  ;;  %v5119_v33 = vrot.slane %v12256_v13, 5  ;;  %8934 = vmatpush3.bf16.msra.mxu1 %v9966_v30  ;;  %8905 = vmatprep.subr.bf16.mxu0 %v9967_v22  ;;  %v9973_v19 = vld [vmem:[%s12933_s5 + $0xd0] sm:$0xff]   ;;  %v9974_v31 = vld [vmem:[%s12933_s5 + $0x20] sm:$0xff]  }
 0x445   : > { %5105 = vst.msk [vmem:[#allocation3 + $0x8] sm:$0xf] %vm5094_vm9, %v5103_v29  ;;  %v5221_v55 = vrot.slane %v12290_v54, 4  ;;  %5206 = vst.msk [vmem:[#allocation3 + $0x48] sm:$0xf] %vm5094_vm9, %v12290_v54  ;;  %v12307_v36 = vmax.f32 %v5077_v27, 0.0  ;;  %5157 = vrot.lane.b32.xlu1 %v5156_v43, %s10080_s13  ;;  %8935 = vmatprep.subr.bf16.mxu1 %v9969_v40 }
 0x446   : > { %v5185_v25 = vrot.slane %v12296_v16, 4  ;;  %5170 = vst.msk [vmem:[#allocation3 + $0x30] sm:$0xf] %vm5094_vm9, %v12296_v16  ;;  %v12314_v34 = vmax.f32 %v5075_v49, 0.0  ;;  %v9358_v58 = vpop.f32.mrb[56].mxu1  ;;  %v5213_v8 = vrot.slane %v12290_v54, 2 }
 0x447   : > { %5223 = vst.msk [vmem:[#allocation3 + $0x58] sm:$0xf] %vm5094_vm9, %v5221_v55  ;;  %v9533_v39 = vadd.f32 %v12220_v0, %v9358_v58  ;;  %v5036_v1 = vpop.f32.mrb[57].mxu1  ;;  %5129 = vrot.lane.b32.xlu0 %v5128_v50, %s10080_s13  ;;  %v5172_v0 = vrot.slane %v12296_v16, 1  ;;  %v5233_v44 = vrot.slane %v12307_v36, 6  ;;  %8906 = vmatpush3.bf16.msra.mxu0 %v9968_v4  ;;  %v5225_v24 = vrot.slane %v12307_v36, 4 }
 0x448   : > { %5241 = vst.msk [vmem:[#allocation3 + $0x58] sm:$0xf0] %vm5117_vm10, %v12307_v36  ;;  %5205 = vst.msk [vmem:[#allocation3 + $0x40] sm:$0xf0] %vm5117_vm10, %v12314_v34  ;;  %v9539_v14 = vadd.f32 %v12212_v32, %v5036_v1  ;;  %v9359_v2 = vpop.f32.mrb[58].mxu1  ;;  %v5177_v32 = vrot.slane %v12296_v16, 2  ;;  %8907 = vmatprep.subr.bf16.mxu0 %v9971_v46 }
 0x449   : > { %5187 = vst.msk [vmem:[#allocation3 + $0x40] sm:$0xf] %vm5094_vm9, %v5185_v25  ;;  %v5080_v45 = vadd.f32 %v9533_v39, %v12228_v5  ;;  %v9545_v15 = vadd.f32 %v12231_v10, %v9359_v2  ;;  %v5039_v57 = vpop.f32.mrb[59].mxu1  ;;  %5120 = vrot.lane.b32.xlu1 %v5119_v33, %s10080_s13  ;;  %5215 = vst.msk [vmem:[#allocation3 + $0x50] sm:$0xf] %vm5094_vm9, %v5213_v8  ;;  %v5197_v61 = vrot.slane %v12314_v34, 6 }
 0x44a   : > { %v5078_v52 = vadd.f32 %v9539_v14, %v12228_v5  ;;  %v9551_v48 = vadd.f32 %v12215_v47, %v5039_v57  ;;  %5235 = vst.msk [vmem:[#allocation3 + $0x50] sm:$0xf0] %vm5117_vm10, %v5233_v44  ;;  %v5189_v9 = vrot.slane %v12314_v34, 4  ;;  %v9970_v10 = vld [vmem:[%s12933_s5 + $0x18] sm:$0xff]   ;;  %v5216_v47 = vrot.slane %v12290_v54, 3  ;;  %v9975_v7 = vld [vmem:[%s12933_s5 + $0x68] sm:$0xff]  }
 0x44b   : > { %v12355_v20 = vmax.f32 %v5080_v45, 0.0  ;;  %v5081_v21 = vadd.f32 %v9545_v15, %v12228_v5  ;;  %5173 = vrot.lane.b32.xlu0 %v5172_v0, %s10080_s13  ;;  %5179 = vst.msk [vmem:[#allocation3 + $0x38] sm:$0xf] %vm5094_vm9, %v5177_v32  ;;  %8936 = vmatpush3.bf16.msra.mxu1 %v9970_v10  ;;  %v5180_v53 = vrot.slane %v12296_v16, 3  ;;  %v5200_v42 = vrot.slane %v12314_v34, 7  ;;  %v12414_v63 = vld [vmem:[#allocation3 + $0x28] sm:$0xff] }
 0x44c   : > { %5199 = vst.msk [vmem:[#allocation3 + $0x38] sm:$0xf0] %vm5117_vm10, %v5197_v61  ;;  %v12362_v60 = vmax.f32 %v5078_v52, 0.0  ;;  %v5079_v13 = vadd.f32 %v9551_v48, %v12228_v5  ;;  %5191 = vst.msk [vmem:[#allocation3 + $0x30] sm:$0xf0] %vm5117_vm10, %v5189_v9  ;;  %v5236_v5 = vrot.slane %v12307_v36, 7  ;;  %8937 = vmatprep.subr.bf16.mxu1 %v9972_v11  ;;  %8908 = vmatpush3.bf16.msra.mxu0 %v9973_v19 }
 0x44d   : > { %5227 = vst.msk [vmem:[#allocation3 + $0x48] sm:$0xf0] %vm5117_vm10, %v5225_v24  ;;  %v5293_v51 = vrot.slane %v12355_v20, 4  ;;  %v12376_v12 = vmax.f32 %v5081_v21, 0.0  ;;  %5217 = vrot.lane.b32.xlu1 %v5216_v47, %s10080_s13  ;;  %v5285_v41 = vrot.slane %v12355_v20, 2  ;;  %v9976_v62 = vld [vmem:[%s12933_s5 + $0x28] sm:$0xff]  }
 0x44e   : > { %5278 = vst.msk [vmem:[#allocation3 + $0x78] sm:$0xf] %vm5094_vm9, %v12355_v20  ;;  %v5257_v17 = vrot.slane %v12362_v60, 4  ;;  %5242 = vst.msk [vmem:[#allocation3 + $0x60] sm:$0xf] %vm5094_vm9, %v12362_v60  ;;  %v12383_v35 = vmax.f32 %v5079_v13, 0.0 }
 0x44f   : > { %5295 = vst.msk [vmem:[#allocation3 + $0x88] sm:$0xf] %vm5094_vm9, %v5293_v51  ;;  %5237 = vrot.lane.b32.xlu0 %v5236_v5, %s10080_s13  ;;  %v5249_v28 = vrot.slane %v12362_v60, 2  ;;  %8938 = vmatpush3.bf16.msra.mxu1 %v9974_v31  ;;  %5287 = vst.msk [vmem:[#allocation3 + $0x80] sm:$0xf] %vm5094_vm9, %v5285_v41  ;;  %v5305_v23 = vrot.slane %v12376_v12, 6 }
 0x450   : > { %5313 = vst.msk [vmem:[#allocation3 + $0x88] sm:$0xf0] %vm5117_vm10, %v12376_v12  ;;  %v12398_v26 = vld [vmem:[#allocation3 + $0x40] sm:$0xff]  ;;  %5277 = vst.msk [vmem:[#allocation3 + $0x70] sm:$0xf0] %vm5117_vm10, %v12383_v35  ;;  %v5269_v37 = vrot.slane %v12383_v35, 6  ;;  %8939 = vmatprep.subr.bf16.mxu1 %v9975_v7 }
 0x451   : > { %5259 = vst.msk [vmem:[#allocation3 + $0x70] sm:$0xf] %vm5094_vm9, %v5257_v17  ;;  %v5261_v3 = vrot.slane %v12383_v35, 4  ;;  %5181 = vrot.lane.b32.xlu1 %v5180_v53, %s10080_s13  ;;  %5251 = vst.msk [vmem:[#allocation3 + $0x68] sm:$0xf] %vm5094_vm9, %v5249_v28  ;;  %v5297_v38 = vrot.slane %v12376_v12, 4  ;;  %v5907_v59 = vpack.c.bf16 %v12398_v26, %v12414_v63 }
 0x452   : > { %v9977_v18 = vld [vmem:[%s12933_s5 + $0x118] sm:$0xff]   ;;  %5271 = vst.msk [vmem:[#allocation3 + $0x68] sm:$0xf0] %vm5117_vm10, %v5269_v37  ;;  %v5192_v29 = vrot.slane %v12314_v34, 5  ;;  %5307 = vst.msk [vmem:[#allocation3 + $0x80] sm:$0xf0] %vm5117_vm10, %v5305_v23 }
 0x453   : > { %5263 = vst.msk [vmem:[#allocation3 + $0x60] sm:$0xf0] %vm5117_vm10, %v5261_v3  ;;  %5201 = vrot.lane.b32.xlu0 %v5200_v42, %s10080_s13  ;;  %5299 = vst.msk [vmem:[#allocation3 + $0x78] sm:$0xf0] %vm5117_vm10, %v5297_v38  ;;  %8940 = vmatpush3.bf16.msra.mxu1 %v9976_v62  ;;  %v9978_v27 = vld [vmem:[%s12933_s5 + $0xd8] sm:$0xff]   ;;  %v9979_v43 = vld [vmem:[%s12933_s5 + $0x70] sm:$0xff]  }
 0x454   : > { %8909 = vmatprep.subr.bf16.mxu0 %v9977_v18  ;;  %v5208_v16 = vrot.slane %v12290_v54, 1  ;;  %v6182_v49 = vld [vmem:[#allocation3 + $0x28] sm:$0xf0]  ;;  %8941 = vmatprep.subr.bf16.mxu1 %v9979_v43  ;;  %v9980_v6 = vld [vmem:[%s12933_s5 + $0x30] sm:$0xff]   ;;  %v5228_v50 = vrot.slane %v12307_v36, 5  ;;  %v12444_v25 = vld [vmem:[#allocation3 + $0x58] sm:$0xff] }
 0x455   : > { %5193 = vrot.lane.b32.xlu1 %v5192_v29, %s10080_s13  ;;  %8910 = vmatpush3.bf16.msra.mxu0 %v9978_v27  ;;  %v6197_v55 = vpack.c.bf16 %v12398_v26, %v6182_v49  ;;  %v12451_v54 = vld [vmem:[%s12933_s5 + $0x120] sm:$0xff]   ;;  %v5252_v30 = vrot.slane %v12362_v60, 3  ;;  %v9982_v36 = vld [vmem:[%s12933_s5 + $0x78] sm:$0xff]   ;;  %v5244_v8 = vrot.slane %v12362_v60, 1  ;;  %v5106_v14 = vrot.slane %v12243_v56, 3 }
 0x456   : > { %9360 = vmatprep.subr.bf16.mxu0 %v12451_v54  ;;  %v9983_v39 = vld [vmem:[%s12933_s5 + $0x38] sm:$0xff]   ;;  %v9985_v2 = vld [vmem:[%s12933_s5 + $0x220] sm:$0xff]   ;;  %v5097_v0 = vrot.slane %v12243_v56, 1  ;;  %v5272_v44 = vrot.slane %v12383_v35, 7  ;;  %v5264_v4 = vrot.slane %v12383_v35, 5  ;;  %v5288_v40 = vrot.slane %v12355_v20, 3 }
 0x457   : > { %5209 = vrot.lane.b32.xlu0 %v5208_v16, %s10080_s13  ;;  %8942 = vmatpush3.bf16.msra.mxu1 %v9980_v6  ;;  %v6260_v1 = vrot.slane %v6197_v55, 2  ;;  %v5280_v45 = vrot.slane %v12355_v20, 1  ;;  %v5308_v56 = vrot.slane %v12376_v12, 7  ;;  %v5300_v15 = vrot.slane %v12376_v12, 5 }
 0x458   : > { %v12446_v34 = vld [vmem:[#allocation3 + $0x70] sm:$0xff]  ;;  %8943 = vmatprep.subr.bf16.mxu1 %v9982_v36 }
 0x459   : > { %v12455_v58 = vpack.c.bf16 %v12446_v34, %v12444_v25  ;;  %5229 = vrot.lane.b32.xlu1 %v5228_v50, %s10080_s13  ;;  %v9984_v50 = vld [vmem:[%s12933_s5 + $0x128] sm:$0xff]  }
 0x45b   : > { %v6261_v33 = vrot.slane %v12455_v58, 2  ;;  %5253 = vrot.lane.b32.xlu0 %v5252_v30, %s10080_s13  ;;  %8944 = vmatpush3.bf16.msra.mxu1 %v9983_v39 }
 0x45c   : > { %8997 = vmatprep.subr.bf16.mxu1 %v9985_v2 }
 0x45d   : > { %v12472_v22 = vsel %vm407_vm2, %v6260_v1, %v6261_v33  ;;  %5245 = vrot.lane.b32.xlu1 %v5244_v8, %s10080_s13  ;;  %v5374_v8 = vld [vmem:[#allocation3 + $0x10] sm:$0xf0] }
 0x45f   : > { %5107 = vrot.lane.b32.xlu0 %v5106_v14, %s10080_s13 }
 0x461   : > { %5098 = vrot.lane.b32.xlu1 %v5097_v0, %s10080_s13  ;;  %v12544_v0 = vpack.c.bf16 %v12444_v25, %v12398_v26  ;;  %v10045_v26 = vld [vmem:[%s12933_s5 + $0x270] sm:$0xff]  }
 0x463   : > { %5273 = vrot.lane.b32.xlu0 %v5272_v44, %s10080_s13 }
 0x465   : > { %5265 = vrot.lane.b32.xlu1 %v5264_v4, %s10080_s13 }
 0x467   : > { %5289 = vrot.lane.b32.xlu0 %v5288_v40, %s10080_s13 }
 0x469   : > { %5281 = vrot.lane.b32.xlu1 %v5280_v45, %s10080_s13 }
 0x46b   : > { %5309 = vrot.lane.b32.xlu0 %v5308_v56, %s10080_s13  ;;  %v9986_v56 = vld [vmem:[%s12933_s5 + $0x1e0] sm:$0xff]  }
 0x46d   : > { %5301 = vrot.lane.b32.xlu1 %v5300_v15, %s10080_s13  ;;  %v5380_v15 = vpack.c.bf16 %v12414_v63, %v5374_v8  ;;  %v10004_v8 = vld [vmem:[%s12933_s5 + $0x210] sm:$0xff]  }
 0x4b1   : > { %v5146_v57 = vpop.permute.xlu0 %5145 }
 0x4b2   : > { %5148 = vst.msk [vmem:[#allocation3 + $0x20] sm:$0xf] %vm5101_vm11, %v5146_v57 }
 0x4b3   : > { %v5166_v32 = vpop.permute.xlu1 %5165 }
 0x4b4   : > { %5168 = vst.msk [vmem:[#allocation3 + $0x20] sm:$0xf0] %vm5123_vm12, %v5166_v32  ;;  %v9988_v32 = vld [vmem:[%s12933_s5 + $0x228] sm:$0xff]  }
 0x4b5   : > { %v5138_v61 = vpop.permute.xlu0 %5137 }
 0x4b6   : > { %5140 = vst.msk [vmem:[#allocation3 + $0x18] sm:$0xf] %vm5101_vm11, %v5138_v61 }
 0x4b7   : > { %v5158_v52 = vpop.permute.xlu1 %5157 }
 0x4b8   : > { %5160 = vst.msk [vmem:[#allocation3 + $0x18] sm:$0xf0] %vm5123_vm12, %v5158_v52  ;;  %v5441_v52 = vrot.slane %v12544_v0, 2 }
 0x4b9   : > { %v5130_v48 = vpop.permute.xlu0 %5129 }
 0x4ba   : > { %5132 = vst.msk [vmem:[#allocation3 + $0x8] sm:$0xf0] %vm5123_vm12, %v5130_v48 }
 0x4bb   : > { %v5121_v9 = vpop.permute.xlu1 %5120  ;;  %v12507_v51 = vld [vmem:[#allocation3 + $0x20] sm:$0xff] }
 0x4bc   : > { %5124 = vst.msk [vmem:[#allocation3] sm:$0xf0] %vm5123_vm12, %v5121_v9  ;;  %v5377_v9 = vld [vmem:[#allocation3 + $0x70] sm:$0xf] }
 0x4bd   : > { %v5174_v10 = vpop.permute.xlu0 %5173 }
 0x4be   : > { %5176 = vst.msk [vmem:[#allocation3 + $0x30] sm:$0xf] %vm5101_vm11, %v5174_v10 }
 0x4bf   : > { %v5218_v24 = vpop.permute.xlu1 %5217  ;;  %v12517_v53 = vld [vmem:[#allocation3 + $0x18] sm:$0xff] }
 0x4c0   : > { %5220 = vst.msk [vmem:[#allocation3 + $0x50] sm:$0xf] %vm5101_vm11, %v5218_v24 }
 0x4c1   : > { %v5238_v20 = vpop.permute.xlu0 %5237  ;;  %v5373_v46 = vld [vmem:[#allocation3 + $0x8] sm:$0xf0] }
 0x4c2   : > { %5240 = vst.msk [vmem:[#allocation3 + $0x50] sm:$0xf0] %vm5123_vm12, %v5238_v20  ;;  %v5379_v12 = vpack.c.bf16 %v12507_v51, %v5373_v46  ;;  %v5440_v20 = vrot.slane %v5380_v15, 2  ;;  %v9991_v46 = vld [vmem:[%s12933_s5 + $0x230] sm:$0xff]   ;;  %v10008_v15 = vld [vmem:[%s12933_s5 + $0x218] sm:$0xff]  }
 0x4c3   : > { %v5182_v21 = vpop.permute.xlu1 %5181  ;;  %v5372_v41 = vld [vmem:[#allocation3] sm:$0xf0] }
 0x4c4   : > { %5184 = vst.msk [vmem:[#allocation3 + $0x38] sm:$0xf] %vm5101_vm11, %v5182_v21  ;;  %v5437_v7 = vrot.slane %v5379_v12, 2  ;;  %v5378_v38 = vpack.c.bf16 %v12517_v53, %v5372_v41  ;;  %v9989_v21 = vld [vmem:[%s12933_s5 + $0x1e8] sm:$0xff]   ;;  %v5383_v12 = vpack.c.bf16 %v5377_v9, %v5377_v9 }
 0x4c5   : > { %v5202_v47 = vpop.permute.xlu0 %5201 }
 0x4c6   : > { %5204 = vst.msk [vmem:[#allocation3 + $0x38] sm:$0xf0] %vm5123_vm12, %v5202_v47  ;;  %v5434_v16 = vrot.slane %v5378_v38, 2  ;;  %v9990_v47 = vld [vmem:[%s12933_s5 + $0x138] sm:$0xff]  }
 0x4c7   : > { %v5194_v60 = vpop.permute.xlu1 %5193 }
 0x4c8   : > { %5196 = vst.msk [vmem:[#allocation3 + $0x30] sm:$0xf0] %vm5123_vm12, %v5194_v60  ;;  %v6181_v60 = vld [vmem:[#allocation3 + $0x20] sm:$0xf0] }
 0x4c9   : > { %v5210_v13 = vpop.permute.xlu0 %5209  ;;  %v5324_v35 = vld [vmem:[#allocation3 + $0x50] sm:$0xff] }
 0x4ca   : > { %5212 = vst.msk [vmem:[#allocation3 + $0x48] sm:$0xf] %vm5101_vm11, %v5210_v13 }
 0x4cb   : > { %v5230_v11 = vpop.permute.xlu1 %5229 }
 0x4cc   : > { %5232 = vst.msk [vmem:[#allocation3 + $0x48] sm:$0xf0] %vm5123_vm12, %v5230_v11 }
 0x4cd   : > { %v5254_v5 = vpop.permute.xlu0 %5253  ;;  %v12511_v17 = vld [vmem:[#allocation3 + $0x38] sm:$0xff] }
 0x4ce   : > { %5256 = vst.msk [vmem:[#allocation3 + $0x68] sm:$0xf] %vm5101_vm11, %v5254_v5  ;;  %v12515_v19 = vpack.c.bf16 %v5324_v35, %v12511_v17  ;;  %v6196_v11 = vpack.c.bf16 %v12511_v17, %v6181_v60  ;;  %v5442_v5 = vsel %vm407_vm2, %v5440_v20, %v5441_v52  ;;  %v10015_v20 = vld [vmem:[%s12933_s5 + $0x2c8] sm:$0xff]  }
 0x4cf   : > { %v5246_v31 = vpop.permute.xlu1 %5245  ;;  %v12519_v28 = vld [vmem:[#allocation3 + $0x30] sm:$0xff] }
 0x4d0   : > { %5248 = vst.msk [vmem:[#allocation3 + $0x60] sm:$0xf] %vm5101_vm11, %v5246_v31  ;;  %v5438_v37 = vrot.slane %v12515_v19, 2  ;;  %v5905_v3 = vpack.c.bf16 %v12519_v28, %v12517_v53  ;;  %v9992_v31 = vld [vmem:[%s12933_s5 + $0x1f0] sm:$0xff]   ;;  %v6257_v41 = vrot.slane %v6196_v11, 2  ;;  %v10017_v11 = vld [vmem:[%s12933_s5 + $0x198] sm:$0xff]  }
 0x4d1   : > { %v5108_v42 = vpop.permute.xlu0 %5107 }
 0x4d2   : > { %5110 = vst.msk [vmem:[#allocation3 + $0x8] sm:$0xf] %vm5101_vm11, %v5108_v42  ;;  %v5439_v23 = vsel %vm407_vm2, %v5437_v7, %v5438_v37  ;;  %v9993_v7 = vld [vmem:[%s12933_s5 + $0x80] sm:$0xff]   ;;  %v9994_v42 = vld [vmem:[%s12933_s5 + $0x238] sm:$0xff]  }
 0x4d3   : > { %5612 = vmatprep.mubr.bf16.mxu0 %v5439_v23  ;;  %v5099_v62 = vpop.permute.xlu1 %5098  ;;  %v12528_v18 = vld [vmem:[#allocation3 + $0x48] sm:$0xff]  ;;  %v5316_v23 = vld [vmem:[#allocation3 + $0x10] sm:$0xff] }
 0x4d4   : > { %5102 = vst.msk [vmem:[#allocation3] sm:$0xf] %vm5101_vm11, %v5099_v62  ;;  %v12533_v29 = vpack.c.bf16 %v12528_v18, %v12519_v28  ;;  %v9995_v62 = vld [vmem:[%s12933_s5 + $0x1f8] sm:$0xff]  }
 0x4d5   : > { %v5274_v27 = vpop.permute.xlu0 %5273  ;;  %v5376_v43 = vld [vmem:[#allocation3 + $0x68] sm:$0xf] }
 0x4d6   : > { %5276 = vst.msk [vmem:[#allocation3 + $0x68] sm:$0xf0] %vm5123_vm12, %v5274_v27  ;;  %v5435_v49 = vrot.slane %v12533_v29, 2  ;;  %v5382_v6 = vpack.c.bf16 %v5376_v43, %v5376_v43  ;;  %v9996_v27 = vld [vmem:[%s12933_s5 + $0x88] sm:$0xff]  }
 0x4d7   : > { %v5266_v55 = vpop.permute.xlu1 %5265  ;;  %v5375_v30 = vld [vmem:[#allocation3 + $0x60] sm:$0xf] }
 0x4d8   : > { %5268 = vst.msk [vmem:[#allocation3 + $0x60] sm:$0xf0] %vm5123_vm12, %v5266_v55  ;;  %v5436_v36 = vsel %vm407_vm2, %v5434_v16, %v5435_v49  ;;  %v5445_v39 = vrot.slane %v5382_v6, 2  ;;  %v5381_v1 = vpack.c.bf16 %v5375_v30, %v5375_v30  ;;  %v5328_v16 = vpack.c.bf16 %v12414_v63, %v5316_v23  ;;  %v9998_v6 = vld [vmem:[%s12933_s5 + $0x200] sm:$0xff]   ;;  %v9999_v55 = vld [vmem:[%s12933_s5 + $0x90] sm:$0xff]   ;;  %v10001_v30 = vld [vmem:[%s12933_s5 + $0x208] sm:$0xff]  }
 0x4d9   : > { %5613 = vmatmul.mubr.bf16.vlgmr.msra.gmra.mrb[120].mxu0 %v5436_v36  ;;  %v5290_v14 = vpop.permute.xlu0 %5289  ;;  %v5315_v2 = vld [vmem:[#allocation3 + $0x8] sm:$0xff]  ;;  %v10002_v36 = vld [vmem:[%s12933_s5 + $0x98] sm:$0xff]  }
 0x4da   : > { %9361 = vmatpush3.bf16.msra.mxu0 %v12451_v54  ;;  %5292 = vst.msk [vmem:[#allocation3 + $0x80] sm:$0xf] %vm5101_vm11, %v5290_v14  ;;  %v5446_v44 = vsel %vm407_vm2, %v5438_v37, %v5445_v39  ;;  %v5327_v4 = vpack.c.bf16 %v12507_v51, %v5315_v2  ;;  %v9987_v54 = vld [vmem:[%s12933_s5 + $0x130] sm:$0xff]   ;;  %v5443_v57 = vrot.slane %v5381_v1, 2  ;;  %v5447_v37 = vrot.slane %v5383_v12, 2  ;;  %v10005_v14 = vld [vmem:[%s12933_s5 + $0x180] sm:$0xff]  }
 0x4db   : > { %5620 = vmatprep.mubr.bf16.mxu0 %v5446_v44  ;;  %v5282_v40 = vpop.permute.xlu1 %5281  ;;  %9362 = vmatprep.subr.bf16.mxu0 %v9984_v50  ;;  %v5314_v45 = vld [vmem:[#allocation3] sm:$0xff]  ;;  %v10003_v39 = vld [vmem:[%s12933_s5 + $0x250] sm:$0xff]   ;;  %v10007_v44 = vld [vmem:[%s12933_s5 + $0x258] sm:$0xff]  }
 0x4dc   : > { %5284 = vst.msk [vmem:[#allocation3 + $0x78] sm:$0xf] %vm5101_vm11, %v5282_v40  ;;  %5836 = vmatprep.mubr.bf16.mxu1 %v5327_v4  ;;  %v5326_v25 = vpack.c.bf16 %v12517_v53, %v5314_v45  ;;  %v5444_v13 = vsel %vm407_vm2, %v5435_v49, %v5443_v57  ;;  %v5448_v43 = vsel %vm407_vm2, %v5441_v52, %v5447_v37  ;;  %v9997_v49 = vld [vmem:[%s12933_s5 + $0x240] sm:$0xff]   ;;  %v6180_v45 = vld [vmem:[#allocation3 + $0x18] sm:$0xf0]  ;;  %v10019_v12 = vld [vmem:[%s12933_s5 + $0x2d0] sm:$0xff]  }
 0x4dd   : > { %v5310_v61 = vpop.permute.xlu0 %5309  ;;  %v12563_v48 = vld [vmem:[#allocation3 + $0x68] sm:$0xff]  ;;  %v10006_v40 = vld [vmem:[%s12933_s5 + $0x140] sm:$0xff]   ;;  %v10024_v23 = vld [vmem:[%s12933_s5 + $0x298] sm:$0xff]  }
 0x4de   : > { %9363 = vmatpush3.bf16.msra.mxu0 %v9984_v50  ;;  %5312 = vst.msk [vmem:[#allocation3 + $0x80] sm:$0xf0] %vm5123_vm12, %v5310_v61  ;;  %5837 = vmatmul.mubr.bf16.vlgmr.msra.gmra.mrb[156].mxu1 %v5326_v25  ;;  %v12567_v10 = vpack.c.bf16 %v12563_v48, %v5324_v35  ;;  %v10000_v50 = vld [vmem:[%s12933_s5 + $0x248] sm:$0xff]   ;;  %v10011_v57 = vld [vmem:[%s12933_s5 + $0x2c0] sm:$0xff]   ;;  %v10042_v53 = vld [vmem:[%s12933_s5 + $0x1d8] sm:$0xff]  }
 0x4df   : > { %8998 = vmatpush3.bf16.msra.mxu1 %v9986_v56  ;;  %5844 = vmatprep.mubr.bf16.mxu1 %v12515_v19  ;;  %v5302_v24 = vpop.permute.xlu1 %5301  ;;  %v12629_v1 = vld [vmem:[#allocation3 + $0x60] sm:$0xff]  ;;  %v10009_v25 = vld [vmem:[%s12933_s5 + $0x188] sm:$0xff]  }
 0x4e0   : > { %5304 = vst.msk [vmem:[#allocation3 + $0x78] sm:$0xf0] %vm5123_vm12, %v5302_v24  ;;  %9364 = vmatprep.subr.bf16.mxu0 %v9987_v54  ;;  %8999 = vmatprep.subr.bf16.mxu1 %v9988_v32  ;;  %v6258_v35 = vrot.slane %v12567_v10, 2  ;;  %v12642_v4 = vpack.c.bf16 %v12629_v1, %v12528_v18  ;;  %v6195_v18 = vpack.c.bf16 %v12519_v28, %v6180_v45  ;;  %v10010_v61 = vld [vmem:[%s12933_s5 + $0x148] sm:$0xff]   ;;  %v10013_v24 = vld [vmem:[%s12933_s5 + $0x190] sm:$0xff]  }
 0x4e1   : > { %5621 = vmatmul.mubr.bf16.gmra.mrb[124].mxu0 %v5444_v13  ;;  %v6193_v2 = vld [vmem:[#allocation3 + $0x80] sm:$0xf]  ;;  %v10014_v13 = vld [vmem:[%s12933_s5 + $0x150] sm:$0xff]   ;;  %v6194_v63 = vld [vmem:[#allocation3 + $0x88] sm:$0xf] }
 0x4e2   : > { %9365 = vmatpush3.bf16.msra.mxu0 %v9987_v54  ;;  %9368 = vmatprep.mubr.msk.bf16.mxu0 %vm5573_vm13, %v5442_v5  ;;  %v6259_v38 = vsel %vm407_vm2, %v6257_v41, %v6258_v35  ;;  %v6202_v56 = vpack.c.bf16 %v6193_v2, %v6193_v2  ;;  %v5906_v54 = vpack.c.bf16 %v12511_v17, %v12507_v51  ;;  %v6255_v32 = vrot.slane %v12642_v4, 2  ;;  %v10012_v17 = vld [vmem:[%s12933_s5 + $0x280] sm:$0xff]   ;;  %v10040_v2 = vld [vmem:[%s12933_s5 + $0x1c8] sm:$0xff]  }
 0x4e3   : > { %9000 = vmatpush3.bf16.msra.mxu1 %v9989_v21  ;;  %9366 = vmatprep.subr.bf16.mxu0 %v9990_v47  ;;  %v6192_v9 = vld [vmem:[#allocation3 + $0x78] sm:$0xf]  ;;  %v6254_v51 = vrot.slane %v6195_v18, 2  ;;  %v10021_v41 = vld [vmem:[%s12933_s5 + $0x1a0] sm:$0xff]  }
 0x4e4   : > { %9001 = vmatprep.subr.bf16.mxu1 %v9991_v46  ;;  %v6265_v52 = vrot.slane %v6202_v56, 2  ;;  %v10016_v46 = vld [vmem:[%s12933_s5 + $0x288] sm:$0xff]   ;;  %v10052_v18 = vld [vmem:[%s12935_s7 + $0x20] sm:$0xff]  }
 0x4e5   : > { %v6256_v21 = vsel %vm407_vm2, %v6254_v51, %v6255_v32 }
 0x4e6   : > { %9367 = vmatpush3.bf16.msra.mxu0 %v9990_v47  ;;  %5845 = vmatmul.mubr.bf16.gmra.mrb[160].mxu1 %v12533_v29  ;;  %v6201_v47 = vpack.c.bf16 %v6192_v9, %v6192_v9  ;;  %v6266_v60 = vsel %vm407_vm2, %v6258_v35, %v6265_v52  ;;  %v10018_v35 = vld [vmem:[%s12933_s5 + $0x158] sm:$0xff]  }
 0x4e7   : > { %9002 = vmatpush3.bf16.msra.mxu1 %v9992_v31  ;;  %6431 = vmatprep.mubr.bf16.mxu1 %v6259_v38  ;;  %v10020_v31 = vld [vmem:[%s12933_s5 + $0x290] sm:$0xff]   ;;  %v10025_v38 = vld [vmem:[%s12933_s5 + $0x1a8] sm:$0xff]   ;;  %v6501_v28 = vld [vmem:[#allocation3 + $0x78] sm:$0xff] }
 0x4e8   : > { %9372 = vmatprep.subr.bf16.mxu0 %v9993_v7  ;;  %9003 = vmatprep.subr.bf16.mxu1 %v9994_v42  ;;  %v6263_v5 = vrot.slane %v6201_v47, 2  ;;  %v10022_v42 = vld [vmem:[%s12933_s5 + $0x160] sm:$0xff]  }
 0x4e9   : > { %9369 = vmatmul.mubr.msk.bf16.vlgmr.msra.gmra.mrb[128].mxu0 %vm5573_vm13, %v5448_v43  ;;  %v10029_v43 = vld [vmem:[%s12933_s5 + $0x1b0] sm:$0xff]  }
 0x4ea   : > { %9373 = vmatpush3.bf16.msra.mxu0 %v9993_v7  ;;  %9380 = vmatprep.mubr.msk.bf16.mxu0 %vm5573_vm13, %v5328_v16  ;;  %v10023_v7 = vld [vmem:[%s12933_s5 + $0x2d8] sm:$0xff]   ;;  %v6264_v37 = vsel %vm407_vm2, %v6255_v32, %v6263_v5  ;;  %v10031_v16 = vld [vmem:[%s12933_s5 + $0x2e8] sm:$0xff]  }
 0x4eb   : > { %9004 = vmatpush3.bf16.msra.mxu1 %v9995_v62  ;;  %9374 = vmatprep.subr.bf16.mxu0 %v9996_v27  ;;  %v10027_v62 = vld [vmem:[%s12933_s5 + $0x2e0] sm:$0xff]  }
 0x4ec   : > { %9005 = vmatprep.subr.bf16.mxu1 %v9997_v49  ;;  %v10030_v49 = vld [vmem:[%s12933_s5 + $0x170] sm:$0xff]  }
 0x4ee   : > { %9375 = vmatpush3.bf16.msra.mxu0 %v9996_v27  ;;  %v10026_v27 = vld [vmem:[%s12933_s5 + $0x168] sm:$0xff]  }
 0x4ef   : > { %9006 = vmatpush3.bf16.msra.mxu1 %v9998_v6  ;;  %9376 = vmatprep.subr.bf16.mxu0 %v9999_v55  ;;  %v10032_v6 = vld [vmem:[%s12933_s5 + $0x2a8] sm:$0xff]  }
 0x4f0   : > { %9007 = vmatprep.subr.bf16.mxu1 %v10000_v50  ;;  %v10035_v50 = vld [vmem:[%s12933_s5 + $0x2f0] sm:$0xff]  }
 0x4f2   : > { %9377 = vmatpush3.bf16.msra.mxu0 %v9999_v55  ;;  %v10033_v55 = vld [vmem:[%s12933_s5 + $0x1b8] sm:$0xff]  }
 0x4f3   : > { %9008 = vmatpush3.bf16.msra.mxu1 %v10001_v30  ;;  %9378 = vmatprep.subr.bf16.mxu0 %v10002_v36  ;;  %v10034_v30 = vld [vmem:[%s12933_s5 + $0x178] sm:$0xff]  }
 0x4f4   : > { %9009 = vmatprep.subr.bf16.mxu1 %v10003_v39  ;;  %v10037_v39 = vld [vmem:[%s12933_s5 + $0x1c0] sm:$0xff]  }
 0x4f6   : > { %9379 = vmatpush3.bf16.msra.mxu0 %v10002_v36  ;;  %v10036_v36 = vld [vmem:[%s12933_s5 + $0x2b0] sm:$0xff]  }
 0x4f7   : > { %9010 = vmatpush3.bf16.msra.mxu1 %v10004_v8  ;;  %8963 = vmatprep.subr.bf16.mxu0 %v10005_v14  ;;  %v10038_v8 = vld [vmem:[%s12933_s5 + $0x2f8] sm:$0xff]  }
 0x4f8   : > { %9011 = vmatprep.subr.bf16.mxu1 %v10007_v44  ;;  %v10039_v14 = vld [vmem:[%s12933_s5 + $0x2b8] sm:$0xff]   ;;  %v6502_v44 = vld [vmem:[#allocation3 + $0x80] sm:$0xff] }
 0x4f9   : > { %9381 = vmatmul.mubr.msk.bf16.vlgmr.msra.gmra.mrb[128].mxu0 %vm5573_vm13, %v12544_v0  ;;  %v6508_v45 = vpack.c.bf16 %v6502_v44, %v12563_v48  ;;  %v10044_v48 = vld [vmem:[%s12933_s5 + $0x268] sm:$0xff]  }
 0x4fa   : > { %8964 = vmatpush3.bf16.msra.mxu0 %v10006_v40  ;;  %6110 = vmatprep.mubr.bf16.mxu0 %v5906_v54  ;;  %v10041_v40 = vld [vmem:[%s12933_s5 + $0x1d0] sm:$0xff]   ;;  %v10081_v54 = vmov 0.0  }
 0x4fb   : > { %9012 = vmatpush3.bf16.msra.mxu1 %v10008_v15  ;;  %8965 = vmatprep.subr.bf16.mxu0 %v10009_v25  ;;  %v10049_v15 = vld [vmem:[%s12933_s5 + $0x310] sm:$0xff]   ;;  %v10050_v25 = vld [vmem:[%s12933_s5 + $0x318] sm:$0xff]  }
 0x4fc   : > { %9031 = vmatprep.subr.bf16.mxu1 %v10011_v57 }
 0x4fe   : > { %8966 = vmatpush3.bf16.msra.mxu0 %v10010_v61  ;;  %6432 = vmatmul.mubr.bf16.vlgmr.msra.gmra.mrb[164].mxu1 %v6256_v21 }
 0x4ff   : > { %6439 = vmatprep.mubr.bf16.mxu1 %v6266_v60  ;;  %9032 = vmatpush3.bf16.msra.mxu1 %v10012_v17 }
 0x500   : > { %8967 = vmatprep.subr.bf16.mxu0 %v10013_v24  ;;  %9033 = vmatprep.subr.bf16.mxu1 %v10015_v20 }
 0x502   : > { %8968 = vmatpush3.bf16.msra.mxu0 %v10014_v13 }
 0x503   : > { %9034 = vmatpush3.bf16.msra.mxu1 %v10016_v46  ;;  %8969 = vmatprep.subr.bf16.mxu0 %v10017_v11 }
 0x504   : > { %9035 = vmatprep.subr.bf16.mxu1 %v10019_v12 }
 0x506   : > { %8970 = vmatpush3.bf16.msra.mxu0 %v10018_v35  ;;  %6440 = vmatmul.mubr.bf16.gmra.mrb[168].mxu1 %v6264_v37 }
 0x507   : > { %9036 = vmatpush3.bf16.msra.mxu1 %v10020_v31  ;;  %6709 = vmatprep.mubr.bf16.mxu1 %v12515_v19  ;;  %v10028_v19 = vld [vmem:[%s12933_s5 + $0x2a0] sm:$0xff]  }
 0x508   : > { %8971 = vmatprep.subr.bf16.mxu0 %v10021_v41  ;;  %9037 = vmatprep.subr.bf16.mxu1 %v10023_v7 }
 0x50a   : > { %8972 = vmatpush3.bf16.msra.mxu0 %v10022_v42 }
 0x50b   : > { %9038 = vmatpush3.bf16.msra.mxu1 %v10024_v23  ;;  %8973 = vmatprep.subr.bf16.mxu0 %v10025_v38 }
 0x50c   : > { %9039 = vmatprep.subr.bf16.mxu1 %v10027_v62 }
 0x50e   : > { %8974 = vmatpush3.bf16.msra.mxu0 %v10026_v27 }
 0x50f   : > { %9040 = vmatpush3.bf16.msra.mxu1 %v10028_v19  ;;  %8975 = vmatprep.subr.bf16.mxu0 %v10029_v43 }
 0x510   : > { %9041 = vmatprep.subr.bf16.mxu1 %v10031_v16 }
 0x512   : > { %8976 = vmatpush3.bf16.msra.mxu0 %v10030_v49 }
 0x513   : > { %9042 = vmatpush3.bf16.msra.mxu1 %v10032_v6  ;;  %8977 = vmatprep.subr.bf16.mxu0 %v10033_v55 }
 0x514   : > { %9043 = vmatprep.subr.bf16.mxu1 %v10035_v50 }
 0x516   : > { %8978 = vmatpush3.bf16.msra.mxu0 %v10034_v30 }
 0x517   : > { %9044 = vmatpush3.bf16.msra.mxu1 %v10036_v36  ;;  %9384 = vmatprep.subr.bf16.mxu0 %v10037_v39 }
 0x518   : > { %9045 = vmatprep.subr.bf16.mxu1 %v10038_v8 }
 0x519   : > { %6111 = vmatmul.mubr.bf16.vlgmr.msra.gmra.mrb[132].mxu0 %v5905_v3  ;;  %v10043_v3 = vld [vmem:[%s12933_s5 + $0x260] sm:$0xff]  }
 0x51a   : > { %6118 = vmatprep.mubr.bf16.mxu0 %v12567_v10  ;;  %9385 = vmatpush3.bf16.msra.mxu0 %v10037_v39  ;;  %v6203_v10 = vpack.c.bf16 %v6194_v63, %v6194_v63 }
 0x51b   : > { %9046 = vmatpush3.bf16.msra.mxu1 %v10039_v14  ;;  %9386 = vmatprep.subr.bf16.mxu0 %v10040_v2 }
 0x51c   : > { %9420 = vmatprep.subr.bf16.mxu1 %v10081_v54 }
 0x51e   : > { %9387 = vmatpush3.bf16.msra.mxu0 %v10040_v2  ;;  %6710 = vmatmul.mubr.bf16.vlgmr.msra.gmra.mrb[172].mxu1 %v12533_v29  ;;  %v6507_v29 = vpack.c.bf16 %v6501_v28, %v12629_v1  ;;  %v10047_v1 = vld [vmem:[%s12933_s5 + $0x300] sm:$0xff]  }
 0x51f   : > { %6717 = vmatprep.mubr.bf16.mxu1 %v6508_v45  ;;  %9388 = vmatprep.subr.bf16.mxu0 %v10041_v40 }
 0x520   : > { %9421 = vmatpush3.bf16.msra.mxu1 %v10052_v18 }
 0x521   : > { %6119 = vmatmul.mubr.bf16.gmra.mrb[136].mxu0 %v12642_v4  ;;  %v10048_v4 = vld [vmem:[%s12933_s5 + $0x308] sm:$0xff]   ;;  %9422 = vmatprep.subr.bf16.mxu1 %v10081_v54 }
 0x522   : > { %9389 = vmatpush3.bf16.msra.mxu0 %v10041_v40  ;;  %9392 = vmatprep.mubr.msk.bf16.mxu0 %vm5573_vm13, %v5907_v59  ;;  %v10046_v59 = vld [vmem:[%s12933_s5 + $0x278] sm:$0xff]  }
 0x523   : > { %9390 = vmatprep.subr.bf16.mxu0 %v10042_v53 }
 0x526   : > { %9391 = vmatpush3.bf16.msra.mxu0 %v10042_v53  ;;  %6718 = vmatmul.mubr.bf16.gmra.mrb[176].mxu1 %v6507_v29 }
 0x527   : > { %9396 = vmatprep.subr.bf16.mxu0 %v10043_v3  ;;  %9428 = vmatprep.mubr.msk.bf16.mxu1 %vm10082_vm14, %v10081_v54 }
 0x529   : > { %9393 = vmatmul.mubr.msk.bf16.vlgmr.msra.gmra.mrb[128].mxu0 %vm5573_vm13, %v12455_v58  ;;  %v6503_v58 = vld [vmem:[#allocation3 + $0x88] sm:$0xff] }
 0x52a   : > { %9397 = vmatpush3.bf16.msra.mxu0 %v10043_v3  ;;  %9404 = vmatprep.mubr.msk.bf16.mxu0 %vm5573_vm13, %v12472_v22  ;;  %v6267_v22 = vrot.slane %v6203_v10, 2 }
 0x52b   : > { %9398 = vmatprep.subr.bf16.mxu0 %v10044_v48 }
 0x52c   : > { %v6268_v56 = vsel %vm407_vm2, %v6261_v33, %v6267_v22  ;;  %v6509_v33 = vpack.c.bf16 %v6503_v58, %v12446_v34  ;;  %vm6804_vm2 = vcmask 523525  }
 0x52e   : > { %9399 = vmatpush3.bf16.msra.mxu0 %v10044_v48 }
 0x52f   : > { %9400 = vmatprep.subr.bf16.mxu0 %v10045_v26 }
 0x532   : > { %9401 = vmatpush3.bf16.msra.mxu0 %v10045_v26 }
 0x533   : > { %9402 = vmatprep.subr.bf16.mxu0 %v10046_v59 }
 0x536   : > { %9403 = vmatpush3.bf16.msra.mxu0 %v10046_v59 }
 0x537   : > { %9408 = vmatprep.subr.bf16.mxu0 %v10047_v1 }
 0x539   : > { %9405 = vmatmul.mubr.msk.bf16.vlgmr.msra.gmra.mrb[128].mxu0 %vm5573_vm13, %v6268_v56 }
 0x53a   : > { %9409 = vmatpush3.bf16.msra.mxu0 %v10047_v1  ;;  %9416 = vmatprep.mubr.msk.bf16.mxu0 %vm5573_vm13, %v12544_v0  ;;  %v10051_v0 = vld [vmem:[%s12935_s7] sm:$0xff]  }
 0x53b   : > { %9410 = vmatprep.subr.bf16.mxu0 %v10048_v4 }
 0x53e   : > { %9411 = vmatpush3.bf16.msra.mxu0 %v10048_v4 }
 0x53f   : > { %9412 = vmatprep.subr.bf16.mxu0 %v10049_v15 }
 0x542   : > { %9413 = vmatpush3.bf16.msra.mxu0 %v10049_v15 }
 0x543   : > { %9414 = vmatprep.subr.bf16.mxu0 %v10050_v25 }
 0x546   : > { %9415 = vmatpush3.bf16.msra.mxu0 %v10050_v25 }
 0x547   : > { %9432 = vmatprep.subr.bf16.mxu0 %v10081_v54 }
 0x549   : > { %9417 = vmatmul.mubr.msk.bf16.vlgmr.msra.gmra.mrb[128].mxu0 %vm5573_vm13, %v6509_v33 }
 0x54a   : > { %9433 = vmatpush3.bf16.msra.mxu0 %v10051_v0  ;;  %9440 = vmatprep.mubr.msk.bf16.mxu0 %vm10082_vm14, %v10081_v54 }
 0x54b   : > { %9434 = vmatprep.subr.bf16.mxu0 %v10081_v54 }
 0x5ac   : > { %v8911_v57 = vpop.f32.mrb[120].mxu0 }
 0x5ad   : > { %v8912_v32 = vpop.f32.mrb[121].mxu0 }
 0x5ae   : > { %v8913_v34 = vadd.f32 %v8912_v32, %v8911_v57  ;;  %v8914_v61 = vpop.f32.mrb[122].mxu0 }
 0x5af   : > { %v8915_v52 = vpop.f32.mrb[123].mxu0 }
 0x5b0   : > { %v8916_v9 = vadd.f32 %v8915_v52, %v8914_v61 }
 0x5b1   : > { %v8945_v51 = vpop.f32.mrb[156].mxu1 }
 0x5b2   : > { %v8946_v17 = vpop.f32.mrb[157].mxu1 }
 0x5b3   : > { %v8947_v24 = vadd.f32 %v8946_v17, %v8945_v51  ;;  %v8948_v20 = vpop.f32.mrb[158].mxu1 }
 0x5b4   : > { %v8917_v21 = vpop.f32.mrb[124].mxu0  ;;  %v8949_v47 = vpop.f32.mrb[159].mxu1 }
 0x5b5   : > { %v9557_v60 = vadd.f32 %v8947_v24, %v8913_v34  ;;  %v8950_v13 = vadd.f32 %v8949_v47, %v8948_v20  ;;  %v8918_v46 = vpop.f32.mrb[125].mxu0 }
 0x5b6   : > { %v8919_v11 = vadd.f32 %v8918_v46, %v8917_v21  ;;  %v8920_v12 = vpop.f32.mrb[126].mxu0  ;;  %v10054_v46 = vld [vmem:[%s12935_s7 + $0x28] sm:$0xff]  }
 0x5b7   : > { %v9567_v5 = vadd.f32 %v8950_v13, %v8916_v9  ;;  %v8921_v35 = vpop.f32.mrb[127].mxu0  ;;  %v10053_v13 = vld [vmem:[%s12935_s7 + $0x8] sm:$0xff]   ;;  %9423 = vmatpush3.bf16.msra.mxu1 %v10054_v46 }
 0x5b8   : > { %v8922_v31 = vadd.f32 %v8921_v35, %v8920_v12  ;;  %9435 = vmatpush3.bf16.msra.mxu0 %v10053_v13  ;;  %9424 = vmatprep.subr.bf16.mxu1 %v10081_v54 }
 0x5b9   : > { %v8951_v41 = vpop.f32.mrb[160].mxu1  ;;  %9436 = vmatprep.subr.bf16.mxu0 %v10081_v54 }
 0x5ba   : > { %v8952_v7 = vpop.f32.mrb[161].mxu1 }
 0x5bb   : > { %v8953_v37 = vadd.f32 %v8952_v7, %v8951_v41  ;;  %v8954_v42 = vpop.f32.mrb[162].mxu1  ;;  %v10056_v41 = vld [vmem:[%s12935_s7 + $0x30] sm:$0xff]   ;;  %v10057_v7 = vld [vmem:[%s12935_s7 + $0x18] sm:$0xff]  }
 0x5bc   : > { %v8955_v23 = vpop.f32.mrb[163].mxu1  ;;  %9425 = vmatpush3.bf16.msra.mxu1 %v10056_v41 }
 0x5bd   : > { %v9552_v38 = vadd.f32 %v8953_v37, %v8919_v11  ;;  %v8956_v62 = vadd.f32 %v8955_v23, %v8954_v42  ;;  %v10055_v11 = vld [vmem:[%s12935_s7 + $0x10] sm:$0xff]   ;;  %9426 = vmatprep.subr.bf16.mxu1 %v10081_v54 }
 0x5be   : > { %9437 = vmatpush3.bf16.msra.mxu0 %v10055_v11 }
 0x5bf   : > { %v9562_v27 = vadd.f32 %v8956_v62, %v8922_v31  ;;  %9438 = vmatprep.subr.bf16.mxu0 %v10081_v54 }
 0x5c2   : > { %9439 = vmatpush3.bf16.msra.mxu0 %v10057_v7 }
 0x5c3   : > { %9456 = vmatprep.subr.bf16.mxu0 %v10081_v54 }
 0x5d1   : > { %v9013_v19 = vpop.f32.mrb[164].mxu1 }
 0x5d2   : > { %v9014_v43 = vpop.f32.mrb[165].mxu1 }
 0x5d3   : > { %v9015_v16 = vadd.f32 %v9014_v43, %v9013_v19  ;;  %v9016_v49 = vpop.f32.mrb[166].mxu1 }
 0x5d4   : > { %v9017_v6 = vpop.f32.mrb[167].mxu1 }
 0x5d5   : > { %v9018_v55 = vadd.f32 %v9017_v6, %v9016_v49 }
 0x5d9   : > { %v9019_v50 = vpop.f32.mrb[168].mxu1 }
 0x5da   : > { %v9020_v30 = vpop.f32.mrb[169].mxu1 }
 0x5db   : > { %v9021_v36 = vadd.f32 %v9020_v30, %v9019_v50  ;;  %v9022_v39 = vpop.f32.mrb[170].mxu1 }
 0x5dc   : > { %v9023_v8 = vpop.f32.mrb[171].mxu1 }
 0x5dd   : > { %v9024_v14 = vadd.f32 %v9023_v8, %v9022_v39 }
 0x5ec   : > { %v8979_v2 = vpop.f32.mrb[132].mxu0 }
 0x5ed   : > { %v8980_v44 = vpop.f32.mrb[133].mxu0 }
 0x5ee   : > { %v8981_v40 = vadd.f32 %v8980_v44, %v8979_v2  ;;  %v8982_v45 = vpop.f32.mrb[134].mxu0 }
 0x5ef   : > { %v8983_v53 = vpop.f32.mrb[135].mxu0 }
 0x5f0   : > { %v9558_v28 = vadd.f32 %v9557_v60, %v8981_v40  ;;  %v8984_v3 = vadd.f32 %v8983_v53, %v8982_v45  ;;  %v10059_v40 = vld [vmem:[%s12935_s7 + $0x60] sm:$0xff]  }
 0x5f1   : > { %v9047_v29 = vpop.f32.mrb[172].mxu1 }
 0x5f2   : > { %v9568_v48 = vadd.f32 %v9567_v5, %v8984_v3  ;;  %v9048_v26 = vpop.f32.mrb[173].mxu1  ;;  %v9559_v63 = vadd.f32 %v9558_v28, %v9015_v16  ;;  %v8178_v5 = vld [vmem:[%s12934_s6] ss:$0 sm:$0xff] }
 0x5f3   : > { %v9049_v59 = vadd.f32 %v9048_v26, %v9047_v29  ;;  %v9050_v10 = vpop.f32.mrb[174].mxu1  ;;  %v10060_v3 = vld [vmem:[%s12935_s7 + $0x40] sm:$0xff]   ;;  %v10062_v26 = vld [vmem:[%s12935_s7 + $0x48] sm:$0xff]  }
 0x5f4   : > { %v8985_v1 = vpop.f32.mrb[136].mxu0  ;;  %v9051_v22 = vpop.f32.mrb[175].mxu1  ;;  %v9569_v4 = vadd.f32 %v9568_v48, %v9018_v55  ;;  %v10061_v48 = vld [vmem:[%s12935_s7 + $0x68] sm:$0xff]  }
 0x5f5   : > { %v9052_v56 = vadd.f32 %v9051_v22, %v9050_v10  ;;  %v8986_v15 = vpop.f32.mrb[137].mxu0  ;;  %v9560_v25 = vadd.f32 %v9559_v63, %v9049_v59  ;;  %v10063_v63 = vld [vmem:[%s12935_s7 + $0x70] sm:$0xff]   ;;  %v10065_v10 = vld [vmem:[%s12935_s7 + $0x78] sm:$0xff]  }
 0x5f6   : > { %v8987_v58 = vadd.f32 %v8986_v15, %v8985_v1  ;;  %v8988_v33 = vpop.f32.mrb[138].mxu0  ;;  %v10064_v59 = vld [vmem:[%s12935_s7 + $0x50] sm:$0xff]   ;;  %v10066_v1 = vld [vmem:[%s12935_s7 + $0x58] sm:$0xff]  }
 0x5f7   : > { %v8989_v0 = vpop.f32.mrb[139].mxu0  ;;  %v9570_v18 = vadd.f32 %v9569_v4, %v9052_v56 }
 0x5f8   : > { %v9553_v57 = vadd.f32 %v9552_v38, %v8987_v58  ;;  %v8990_v32 = vadd.f32 %v8989_v0, %v8988_v33  ;;  %v10067_v58 = vld [vmem:[%s12935_s7 + $0x80] sm:$0xff]   ;;  %v10068_v0 = vld [vmem:[%s12935_s7 + $0x88] sm:$0xff]  }
 0x5f9   : > { %v9053_v34 = vpop.f32.mrb[176].mxu1 }
 0x5fa   : > { %v9563_v61 = vadd.f32 %v9562_v27, %v8990_v32  ;;  %v9054_v52 = vpop.f32.mrb[177].mxu1  ;;  %v9554_v9 = vadd.f32 %v9553_v57, %v9021_v36  ;;  %v10058_v27 = vld [vmem:[%s12935_s7 + $0x38] sm:$0xff]  }
 0x5fb   : > { %v9055_v51 = vadd.f32 %v9054_v52, %v9053_v34  ;;  %v9056_v17 = vpop.f32.mrb[178].mxu1  ;;  %9427 = vmatpush3.bf16.msra.mxu1 %v10058_v27  ;;  %v10070_v57 = vld [vmem:[%s12935_s7 + $0x98] sm:$0xff]  }
 0x5fc   : > { %v9057_v24 = vpop.f32.mrb[179].mxu1  ;;  %v9564_v20 = vadd.f32 %v9563_v61, %v9024_v14  ;;  %9444 = vmatprep.subr.bf16.mxu1 %v10081_v54 }
 0x5fd   : > { %v9058_v21 = vadd.f32 %v9057_v24, %v9056_v17  ;;  %v9555_v47 = vadd.f32 %v9554_v9, %v9055_v51 }
 0x5ff   : > { %v9565_v60 = vadd.f32 %v9564_v20, %v9058_v21 }
 0x61c   : > { %v9418_v12 = vpop.f32.mrb[128].mxu0 }
 0x61d   : > { %v9556_v35 = vadd.f32 %v9555_v47, %v9418_v12  ;;  %v6760_v31 = vpop.f32.mrb[129].mxu0 }
 0x61e   : > { %v9561_v37 = vadd.f32 %v9560_v25, %v6760_v31  ;;  %v9419_v42 = vpop.f32.mrb[130].mxu0 }
 0x61f   : > { %v6788_v23 = vadd.f32 %v9556_v35, %v8178_v5  ;;  %v9566_v38 = vadd.f32 %v9565_v60, %v9419_v42  ;;  %v6763_v62 = vpop.f32.mrb[131].mxu0 }
 0x620   : > { %v6786_v19 = vadd.f32 %v9561_v37, %v8178_v5  ;;  %v9571_v43 = vadd.f32 %v9570_v18, %v6763_v62  ;;  %v10069_v18 = vld [vmem:[%s12935_s7 + $0x90] sm:$0xff]   ;;  %v8236_v62 = vld [vmem:[%s12936_s8] ss:$0 sm:$0xff] }
 0x621   : > { %v6792_v16 = vmax.f32 %v6788_v23, 0.0  ;;  %v6789_v49 = vadd.f32 %v9566_v38, %v8178_v5 }
 0x622   : > { %v6790_v6 = vmax.f32 %v6786_v19, 0.0  ;;  %v6787_v55 = vadd.f32 %v9571_v43, %v8178_v5 }
 0x623   : > { %v6793_v50 = vmax.f32 %v6789_v49, 0.0  ;;  %6814 = vst.msk [vmem:[#allocation4 + $0xc] sm:$0x7] %vm6794_vm15, %v6792_v16 }
 0x624   : > { %6820 = vst.msk [vmem:[#allocation4 + $0xb] sm:$0x70] %vm6802_vm0, %v6792_v16  ;;  %v6791_v30 = vmax.f32 %v6787_v55, 0.0  ;;  %6797 = vrot.lane.b32.xlu0 %v6790_v6, %s10083_s24  ;;  %6803 = vst.msk [vmem:[#allocation4 - $0x1] sm:$0x70] %vm6802_vm0, %v6790_v6 }
 0x625   : > { %6795 = vst.msk [vmem:[#allocation4] sm:$0x7] %vm6794_vm15, %v6790_v6  ;;  %6822 = vst.msk [vmem:[#allocation4 + $0x12] sm:$0x7] %vm6794_vm15, %v6793_v50 }
 0x626   : > { %6828 = vst.msk [vmem:[#allocation4 + $0x11] sm:$0x70] %vm6802_vm0, %v6793_v50  ;;  %6808 = vrot.lane.b32.xlu1 %v6791_v30, %s10083_s24  ;;  %6812 = vst.msk [vmem:[#allocation4 + $0x5] sm:$0x70] %vm6802_vm0, %v6791_v30 }
 0x627   : > { %6806 = vst.msk [vmem:[#allocation4 + $0x6] sm:$0x7] %vm6794_vm15, %v6791_v30 }
 0x628   : > { %6816 = vrot.lane.b32.xlu0 %v6792_v16, %s10083_s24 }
 0x62a   : > { %6824 = vrot.lane.b32.xlu1 %v6793_v50, %s10083_s24 }
 0x696   : > { %v6798_v36 = vpop.permute.xlu0 %6797 }
 0x697   : > { %6801 = vst.msk [vmem:[#allocation4 - $0x1] sm:$0xe] %vm6800_vm1, %v6798_v36 }
 0x698   : > { %6805 = vst.msk [vmem:[#allocation4 - $0x2] sm:$0xe0] %vm6804_vm2, %v6798_v36  ;;  %v6809_v39 = vpop.permute.xlu1 %6808 }
 0x699   : > { %6811 = vst.msk [vmem:[#allocation4 + $0x5] sm:$0xe] %vm6800_vm1, %v6809_v39 }
 0x69a   : > { %6813 = vst.msk [vmem:[#allocation4 + $0x4] sm:$0xe0] %vm6804_vm2, %v6809_v39  ;;  %v6817_v8 = vpop.permute.xlu0 %6816 }
 0x69b   : > { %6819 = vst.msk [vmem:[#allocation4 + $0xb] sm:$0xe] %vm6800_vm1, %v6817_v8 }
 0x69c   : > { %6821 = vst.msk [vmem:[#allocation4 + $0xa] sm:$0xe0] %vm6804_vm2, %v6817_v8  ;;  %v6825_v14 = vpop.permute.xlu1 %6824 }
 0x69d   : > { %6827 = vst.msk [vmem:[#allocation4 + $0x11] sm:$0xe] %vm6800_vm1, %v6825_v14 }
 0x69e   : > { %6829 = vst.msk [vmem:[#allocation4 + $0x10] sm:$0xe0] %vm6804_vm2, %v6825_v14 }
 0x6a0   : > { %v6830_v2 = vld [vmem:[#allocation4] sm:$0xff] }
 0x6a1   : > { %v6831_v44 = vld [vmem:[#allocation4 + $0x8] sm:$0xf] }
 0x6a2   : > { %v6832_v45 = vpack.c.bf16 %v6831_v44, %v6830_v2  ;;  %v6841_v53 = vld [vmem:[#allocation4 + $0x3] sm:$0xff]  ;;  %v6842_v28 = vld [vmem:[#allocation4 + $0xb] sm:$0xf] }
 0x6a3   : > { %v6843_v29 = vpack.c.bf16 %v6842_v28, %v6841_v53  ;;  %v7071_v4 = vld [vmem:[#allocation4 + $0x9] sm:$0xff] }
 0x6a4   : > { %9441 = vmatmul.mubr.msk.bf16.vlgmr.msra.gmra.mrb[140].mxu0 %vm5573_vm13, %v6832_v45  ;;  %v7072_v22 = vld [vmem:[#allocation4 + $0x11] sm:$0xf]  ;;  %v6989_v56 = vld [vmem:[#allocation4 + $0x6] sm:$0xff] }
 0x6a5   : > { %9457 = vmatpush3.bf16.msra.mxu0 %v10059_v40  ;;  %9464 = vmatprep.mubr.msk.bf16.mxu0 %vm10082_vm14, %v10081_v54  ;;  %v6990_v15 = vld [vmem:[#allocation4 + $0xe] sm:$0xf]  ;;  %v7073_v25 = vpack.c.bf16 %v7072_v22, %v7071_v4  ;;  %v7154_v34 = vld [vmem:[#allocation4 + $0x14] sm:$0xf] }
 0x6a6   : > { %9429 = vmatmul.mubr.msk.bf16.vlgmr.msra.gmra.mrb[180].mxu1 %vm5573_vm13, %v6843_v29  ;;  %9458 = vmatprep.subr.bf16.mxu0 %v10081_v54  ;;  %v6991_v33 = vpack.c.bf16 %v6990_v15, %v6989_v56  ;;  %v7153_v32 = vld [vmem:[#allocation4 + $0xc] sm:$0xff] }
 0x6a7   : > { %9445 = vmatpush3.bf16.msra.mxu1 %v10060_v3  ;;  %9452 = vmatprep.mubr.msk.bf16.mxu1 %vm10082_vm14, %v10081_v54  ;;  %v7155_v61 = vpack.c.bf16 %v7154_v34, %v7153_v32 }
 0x6a8   : > { %9446 = vmatprep.subr.bf16.mxu1 %v10081_v54 }
 0x6a9   : > { %9459 = vmatpush3.bf16.msra.mxu0 %v10061_v48 }
 0x6aa   : > { %9460 = vmatprep.subr.bf16.mxu0 %v10081_v54 }
 0x6ab   : > { %9447 = vmatpush3.bf16.msra.mxu1 %v10062_v26 }
 0x6ac   : > { %9448 = vmatprep.subr.bf16.mxu1 %v10081_v54 }
 0x6ad   : > { %9461 = vmatpush3.bf16.msra.mxu0 %v10063_v63 }
 0x6ae   : > { %9462 = vmatprep.subr.bf16.mxu0 %v10081_v54 }
 0x6af   : > { %9449 = vmatpush3.bf16.msra.mxu1 %v10064_v59 }
 0x6b0   : > { %9450 = vmatprep.subr.bf16.mxu1 %v10081_v54 }
 0x6b1   : > { %9463 = vmatpush3.bf16.msra.mxu0 %v10065_v10 }
 0x6b3   : > { %9451 = vmatpush3.bf16.msra.mxu1 %v10066_v1 }
 0x6b4   : > { %9465 = vmatmul.mubr.msk.bf16.vlgmr.msra.gmra.mrb[144].mxu0 %vm5573_vm13, %v7073_v25  ;;  %9468 = vmatprep.subr.bf16.mxu1 %v10081_v54 }
 0x6b6   : > { %9453 = vmatmul.mubr.msk.bf16.vlgmr.msra.gmra.mrb[184].mxu1 %vm5573_vm13, %v6991_v33 }
 0x6b7   : > { %9469 = vmatpush3.bf16.msra.mxu1 %v10067_v58  ;;  %9476 = vmatprep.mubr.msk.bf16.mxu1 %vm10082_vm14, %v10081_v54 }
 0x6b8   : > { %9470 = vmatprep.subr.bf16.mxu1 %v10081_v54 }
 0x6bb   : > { %9471 = vmatpush3.bf16.msra.mxu1 %v10068_v0 }
 0x6bc   : > { %9472 = vmatprep.subr.bf16.mxu1 %v10081_v54 }
 0x6bf   : > { %9473 = vmatpush3.bf16.msra.mxu1 %v10069_v18 }
 0x6c0   : > { %9474 = vmatprep.subr.bf16.mxu1 %v10081_v54 }
 0x6c3   : > { %9475 = vmatpush3.bf16.msra.mxu1 %v10070_v57 }
 0x6c6   : > { %9477 = vmatmul.mubr.msk.bf16.vlgmr.msra.gmra.mrb[188].mxu1 %vm5573_vm13, %v7155_v61 }
 0x777   : > { %v6982_v52 = vpop.f32.mrb[140].mxu0 }
 0x778   : > { %v9442_v9 = vpop.f32.mrb[141].mxu0 }
 0x779   : > { %v6914_v51 = vpop.f32.mrb[180].mxu1  ;;  %v6985_v17 = vpop.f32.mrb[142].mxu0 }
 0x77a   : > { %v6983_v24 = vadd.f32 %v6982_v52, %v6914_v51  ;;  %v9430_v20 = vpop.f32.mrb[181].mxu1  ;;  %v9443_v21 = vpop.f32.mrb[143].mxu0 }
 0x77b   : > { %v6917_v47 = vpop.f32.mrb[182].mxu1 }
 0x77c   : > { %v6986_v60 = vadd.f32 %v6985_v17, %v6917_v47  ;;  %v9431_v13 = vpop.f32.mrb[183].mxu1 }
 0x787   : > { %v7144_v46 = vpop.f32.mrb[144].mxu0 }
 0x788   : > { %v9466_v11 = vpop.f32.mrb[145].mxu0 }
 0x789   : > { %v7062_v54 = vpop.f32.mrb[184].mxu1  ;;  %v7147_v12 = vpop.f32.mrb[146].mxu0 }
 0x78a   : > { %v7069_v5 = vadd.f32 %v7062_v54, %v6983_v24  ;;  %v9454_v35 = vpop.f32.mrb[185].mxu1  ;;  %v9467_v31 = vpop.f32.mrb[147].mxu0 }
 0x78b   : > { %v7065_v41 = vpop.f32.mrb[186].mxu1 }
 0x78c   : > { %v7070_v7 = vadd.f32 %v7065_v41, %v6986_v60  ;;  %v9455_v37 = vpop.f32.mrb[187].mxu1  ;;  %v7151_v42 = vadd.f32 %v7144_v46, %v7069_v5 }
 0x78e   : > { %v7152_v23 = vadd.f32 %v7147_v12, %v7070_v7 }
 0x799   : > { %v7226_v38 = vpop.f32.mrb[188].mxu1 }
 0x79a   : > { %v7233_v27 = vadd.f32 %v7226_v38, %v7151_v42  ;;  %v9478_v19 = vpop.f32.mrb[189].mxu1 }
 0x79b   : > { %v7229_v43 = vpop.f32.mrb[190].mxu1 }
 0x79c   : > { %v7242_v16 = vadd.f32 %v8236_v62, %v7233_v27  ;;  %v7234_v49 = vadd.f32 %v7229_v43, %v7152_v23  ;;  %v9479_v6 = vpop.f32.mrb[191].mxu1 }
 0x79e   : > { %v7244_v55 = vmax.f32 %v7242_v16, 0.0  ;;  %v7243_v50 = vadd.f32 %v8236_v62, %v7234_v49 }
 0x7a0   : > { %7247 = vst.msk [vmem:[%s332_s16] sm:$0xff] %vm7246_vm3, %v7244_v55  ;;  %v7245_v30 = vmax.f32 %v7243_v50, 0.0 }
 0x7a2   : > { %7249 = vst.msk [vmem:[%s332_s16 + $0x8] sm:$0xf] %vm7248_vm4, %v7245_v30 }
 0x7a3 PF: > { %s19_s30 = sadd.s32 1, %s10077_s30  }
 0x7a4   : > { %p16_p4 = scmp.ge.s32.totalorder %s19_s30, 4  }
 0x7a6   :  { %18 = sbr.rel (!%p16_p4) target bundleno = 1 (0x1), region = 102 }

</bundles_post_ra>
